<compile_context>
chip_gen: v7x
topology: tpu7x:2x2x1
jax: 0.10.0
libtpu: 0.0.40
codegen_flags: <defaults>
</compile_context>

<pallas_src>
import functools
import math

import jax
import jax.numpy as jnp
import numpy as np
from jax.experimental import pallas as pl
from jax.experimental.pallas import tpu as pltpu

_VMEM_LIMIT_BYTES = 48 * 1024 * 1024  # above default scoped limits, below v7x physical


def _layernorm(x, gamma, beta, eps):
    mu = jnp.mean(x, axis=-1, keepdims=True)
    var = jnp.mean((x - mu) ** 2, axis=-1, keepdims=True)
    return (x - mu) * jax.lax.rsqrt(var + eps) * gamma + beta


def _gelu_exact(x):
    # nn.GELU / HF ACT2FN["gelu"] (erf-based, exact)
    return 0.5 * x * (1.0 + jax.lax.erf(x * (1.0 / math.sqrt(2.0))))


# --------------------------------------------------------------------------
# Pass 1: LN1 + fused QKV projection.  Writes q/k/v in (B, H, S, hd) bf16.
# The attention scale is already folded into wq / bq by the wrapper.
# --------------------------------------------------------------------------
def _qkv_kernel(x_ref, ln1_g_ref, ln1_b_ref,
                wq_ref, bq_ref, wk_ref, wv_ref, bv_ref,
                q_ref, k_ref, v_ref, *, num_heads, head_dim, eps):
    x = x_ref[0]                                            # (tq, E) f32
    h = _layernorm(x, ln1_g_ref[...], ln1_b_ref[...], eps)
    hb = h.astype(jnp.bfloat16)
    # Full-width (lane-dense) projections -> good MXU shapes.
    q = jnp.dot(hb, wq_ref[...], preferred_element_type=jnp.float32) + bq_ref[...]
    k = jnp.dot(hb, wk_ref[...], preferred_element_type=jnp.float32)   # k_proj: bias=False
    v = jnp.dot(hb, wv_ref[...], preferred_element_type=jnp.float32) + bv_ref[...]
    # Split heads on the store (static unroll over a small head count).
    for i in range(num_heads):
        sl = slice(i * head_dim, (i + 1) * head_dim)
        q_ref[0, i] = q[:, sl].astype(q_ref.dtype)
        k_ref[0, i] = k[:, sl].astype(k_ref.dtype)
        v_ref[0, i] = v[:, sl].astype(v_ref.dtype)


# --------------------------------------------------------------------------
# Pass 2: flash attention, all heads batched in one einsum, online softmax
# over kv tiles.  mask is an additive key-padding row of shape (B, 1, S).
# --------------------------------------------------------------------------
def _flash_attn_kernel(q_ref, k_ref, v_ref, mask_ref, o_ref,
                       m_ref, l_ref, acc_ref):
    ki = pl.program_id(2)

    @pl.when(ki == 0)
    def _():
        m_ref[...] = jnp.full(m_ref.shape, -1e30, dtype=m_ref.dtype)
        l_ref[...] = jnp.zeros(l_ref.shape, dtype=l_ref.dtype)
        acc_ref[...] = jnp.zeros(acc_ref.shape, dtype=acc_ref.dtype)

    q = q_ref[0]                                            # (H, tq, hd) bf16 (pre-scaled)
    k = k_ref[0]                                            # (H, tk, hd) bf16
    v = v_ref[0]                                            # (H, tk, hd) bf16

    s = jnp.einsum('hqd,hkd->hqk', q, k,
                   preferred_element_type=jnp.float32)      # (H, tq, tk) f32
    s = s + mask_ref[0][None]                               # broadcast key-padding bias

    m_prev = m_ref[...]
    m_new = jnp.maximum(m_prev, jnp.max(s, axis=-1, keepdims=True))
    alpha = jnp.exp(m_prev - m_new)
    p = jnp.exp(s - m_new)
    l_ref[...] = alpha * l_ref[...] + jnp.sum(p, axis=-1, keepdims=True)
    acc_ref[...] = alpha * acc_ref[...] + jnp.einsum(
        'hqk,hkd->hqd', p.astype(jnp.bfloat16), v,
        preferred_element_type=jnp.float32)
    m_ref[...] = m_new

    @pl.when(ki == pl.num_programs(2) - 1)
    def _():
        o_ref[0] = (acc_ref[...] * pl.reciprocal(l_ref[...], approx=True)
                    ).astype(o_ref.dtype)


# --------------------------------------------------------------------------
# Pass 3: out_proj + residual + LN2 + FFN (streamed over F tiles) + residual.
# The head merge is folded into out_proj:  concat_h(ctx_h) @ Wo
#   == sum_h ctx_h @ Wo[h*hd:(h+1)*hd, :]   (no concatenate / transpose).
# --------------------------------------------------------------------------
def _out_ffn_kernel(x_ref, ctx_ref,
                    wo_ref, bo_ref, ln2_g_ref, ln2_b_ref,
                    w1_ref, b1_ref, w2_ref, b2_ref,
                    out_ref, h2_ref, *, num_heads, head_dim, eps):
    fi = pl.program_id(2)

    @pl.when(fi == 0)
    def _():
        x = x_ref[0]                                        # (tq, E) f32 residual
        ctx = ctx_ref[0]                                    # (H, tq, hd) bf16
        tq, e = x.shape
        attn = jnp.zeros((tq, e), jnp.float32)
        for i in range(num_heads):
            attn = attn + jnp.dot(
                ctx[i], wo_ref[i * head_dim:(i + 1) * head_dim, :],
                preferred_element_type=jnp.float32)
        h1 = x + attn + bo_ref[...]                         # residual 1
        h2 = _layernorm(h1, ln2_g_ref[...], ln2_b_ref[...], eps)
        h2_ref[...] = h2.astype(jnp.bfloat16)
        out_ref[0] = h1 + b2_ref[...]                       # residual 2 + fc2 bias

    # One F-tile of the FFN, accumulated in f32 into the resident output block.
    f = jnp.dot(h2_ref[...], w1_ref[...],
                preferred_element_type=jnp.float32) + b1_ref[...]
    f = _gelu_exact(f)
    out_ref[0] += jnp.dot(f.astype(jnp.bfloat16), w2_ref[...],
                          preferred_element_type=jnp.float32)


# --------------------------------------------------------------------------
# Wrapper
# --------------------------------------------------------------------------
def whisper_encoder_layer(x, key_padding_bias, params, num_heads, eps=1e-5,
                          tq=128, tk=128, tf=256):
    """x: (B, S, E) f32.  key_padding_bias: (B, S) additive mask (0 / -1e9)."""
    B, S, E = x.shape
    hd = E // num_heads
    F = params['w1'].shape[1]
    assert num_heads * hd == E

    tq = min(tq, S)
    tk = min(tk, S)
    tf = min(tf, F)
    assert S % tq == 0 and S % tk == 0 and F % tf == 0, "tiles must divide S / F"
    assert (tq == S or tq % 8 == 0) and (tk == S or tk % 128 == 0) \
        and (tf == F or tf % 128 == 0), "tiles must respect (8,128) tiling"
    # TODO(synk): ragged S (not a multiple of the tile) would need masked tails.
    nq, nk, nf = S // tq, S // tk, F // tf

    f32, bf16 = jnp.float32, jnp.bfloat16
    scale = 1.0 / math.sqrt(hd)
    # Fold the attention scale into q_proj; cast matmul weights to bf16.
    wq = (params['wq'] * scale).astype(bf16)
    bq = (params['bq'] * scale).astype(f32)
    wk = params['wk'].astype(bf16)
    wv = params['wv'].astype(bf16)
    bv = params['bv'].astype(f32)
    wo = params['wo'].astype(bf16)
    bo = params['bo'].astype(f32)
    w1 = params['w1'].astype(bf16)
    b1 = params['b1'].astype(f32)
    w2 = params['w2'].astype(bf16)
    b2 = params['b2'].astype(f32)
    ln1_g = params['ln1_g'].astype(f32)
    ln1_b = params['ln1_b'].astype(f32)
    ln2_g = params['ln2_g'].astype(f32)
    ln2_b = params['ln2_b'].astype(f32)

    key_bias = key_padding_bias.astype(f32).reshape(B, 1, S)

    def const_spec(arr):  # whole array, constant block index (stays resident)
        return pl.BlockSpec(arr.shape, lambda *_, nd=arr.ndim: (0,) * nd)

    # ---- pass 1: LN1 + QKV projection --------------------------------------
    qkv_shape = jax.ShapeDtypeStruct((B, num_heads, S, hd), bf16)
    head_out_spec = pl.BlockSpec((1, num_heads, tq, hd), lambda b, qi: (b, 0, qi, 0))
    q, k, v = pl.pallas_call(
        functools.partial(_qkv_kernel, num_heads=num_heads, head_dim=hd, eps=eps),
        grid=(B, nq),
        in_specs=[pl.BlockSpec((1, tq, E), lambda b, qi: (b, qi, 0)),
                  const_spec(ln1_g), const_spec(ln1_b),
                  const_spec(wq), const_spec(bq),
                  const_spec(wk),
                  const_spec(wv), const_spec(bv)],
        out_specs=(head_out_spec, head_out_spec, head_out_spec),
        out_shape=(qkv_shape, qkv_shape, qkv_shape),
        compiler_params=pltpu.CompilerParams(
            dimension_semantics=("parallel", "parallel"),
            vmem_limit_bytes=_VMEM_LIMIT_BYTES),
    )(x, ln1_g, ln1_b, wq, bq, wk, wv, bv)

    # ---- pass 2: flash attention (online softmax over kv tiles) ------------
    ctx = pl.pallas_call(
        _flash_attn_kernel,
        grid=(B, nq, nk),
        in_specs=[pl.BlockSpec((1, num_heads, tq, hd), lambda b, qi, ki: (b, 0, qi, 0)),
                  pl.BlockSpec((1, num_heads, tk, hd), lambda b, qi, ki: (b, 0, ki, 0)),
                  pl.BlockSpec((1, num_heads, tk, hd), lambda b, qi, ki: (b, 0, ki, 0)),
                  pl.BlockSpec((1, 1, tk), lambda b, qi, ki: (b, 0, ki))],
        out_specs=pl.BlockSpec((1, num_heads, tq, hd), lambda b, qi, ki: (b, 0, qi, 0)),
        out_shape=jax.ShapeDtypeStruct((B, num_heads, S, hd), bf16),
        scratch_shapes=[pltpu.VMEM((num_heads, tq, 1), f32),
                        pltpu.VMEM((num_heads, tq, 1), f32),
                        pltpu.VMEM((num_heads, tq, hd), f32)],
        compiler_params=pltpu.CompilerParams(
            dimension_semantics=("parallel", "parallel", "arbitrary"),
            vmem_limit_bytes=_VMEM_LIMIT_BYTES),
    )(q, k, v, key_bias)

    # ---- pass 3: out_proj + residual + LN2 + FFN + residual ----------------
    out = pl.pallas_call(
        functools.partial(_out_ffn_kernel, num_heads=num_heads, head_dim=hd, eps=eps),
        grid=(B, nq, nf),
        in_specs=[pl.BlockSpec((1, tq, E), lambda b, qi, fi: (b, qi, 0)),
                  pl.BlockSpec((1, num_heads, tq, hd), lambda b, qi, fi: (b, 0, qi, 0)),
                  const_spec(wo), const_spec(bo),
                  const_spec(ln2_g), const_spec(ln2_b),
                  pl.BlockSpec((E, tf), lambda b, qi, fi: (0, fi)),
                  pl.BlockSpec((1, tf), lambda b, qi, fi: (0, fi)),
                  pl.BlockSpec((tf, E), lambda b, qi, fi: (fi, 0)),
                  const_spec(b2)],
        out_specs=pl.BlockSpec((1, tq, E), lambda b, qi, fi: (b, qi, 0)),
        out_shape=jax.ShapeDtypeStruct((B, S, E), f32),
        scratch_shapes=[pltpu.VMEM((tq, E), bf16)],
        compiler_params=pltpu.CompilerParams(
            dimension_semantics=("parallel", "parallel", "arbitrary"),
            vmem_limit_bytes=_VMEM_LIMIT_BYTES),
    )(x, ctx, wo, bo, ln2_g, ln2_b, w1, b1, w2, b2)

    return out


# ----------------------------- reference (plain JAX, f32) -----------------------------
def reference_layer(x, attn_mask, params, num_heads, eps=1e-5):
    B, S, E = x.shape
    hd = E // num_heads
    h = _layernorm(x, params['ln1_g'], params['ln1_b'], eps)
    q = h @ params['wq'] + params['bq']
    k = h @ params['wk']
    v = h @ params['wv'] + params['bv']
    qh = q.reshape(B, S, num_heads, hd).transpose(0, 2, 1, 3)
    kh = k.reshape(B, S, num_heads, hd).transpose(0, 2, 1, 3)
    vh = v.reshape(B, S, num_heads, hd).transpose(0, 2, 1, 3)
    scores = jnp.einsum('bhqd,bhkd->bhqk', qh, kh) / math.sqrt(hd) + attn_mask
    p = jax.nn.softmax(scores, axis=-1)
    attn = jnp.einsum('bhqk,bhkd->bhqd', p, vh).transpose(0, 2, 1, 3).reshape(B, S, E)
    attn = attn @ params['wo'] + params['bo']
    h1 = x + attn
    h2 = _layernorm(h1, params['ln2_g'], params['ln2_b'], eps)
    f = _gelu_exact(h2 @ params['w1'] + params['b1']) @ params['w2'] + params['b2']
    return h1 + f


if __name__ == "__main__":
    # Small but TPU-tile-friendly shapes (Whisper-style head_dim=64, ffn=4*E).
    B, S, E, H, F = 2, 256, 256, 4, 1024

    key = jax.random.PRNGKey(0)
    keys = jax.random.split(key, 16)

    def init(k, shape, scale=0.05):
        return (scale * jax.random.normal(k, shape)).astype(jnp.float32)

    params = {
        'ln1_g': (1.0 + 0.1 * jax.random.normal(keys[12], (1, E))).astype(jnp.float32),
        'ln1_b': init(keys[13], (1, E)),
        # Linear weights pre-transposed to (in, out) so kernels do x @ W + b
        'wq': init(keys[0], (E, E)), 'bq': init(keys[1], (1, E)),
        'wk': init(keys[2], (E, E)),                      # k_proj: bias=False
        'wv': init(keys[3], (E, E)), 'bv': init(keys[4], (1, E)),
        'wo': init(keys[5], (E, E)), 'bo': init(keys[6], (1, E)),
        'ln2_g': (1.0 + 0.1 * jax.random.normal(keys[14], (1, E))).astype(jnp.float32),
        'ln2_b': init(keys[15], (1, E)),
        'w1': init(keys[7], (E, F)), 'b1': init(keys[8], (1, F)),
        'w2': init(keys[9], (F, E)), 'b2': init(keys[10], (1, E)),
    }

    x = jax.random.normal(keys[11], (B, S, E), dtype=jnp.float32)

    # Additive key-padding bias: second batch element has 64 padded positions.
    lens = jnp.array([S, S - 64])
    key_pos = jnp.arange(S)
    key_bias = jnp.where(key_pos[None, :] >= lens[:, None], -1e9, 0.0).astype(jnp.float32)  # (B, S)

    out = whisper_encoder_layer(x, key_bias, params, num_heads=H)
    out = jax.block_until_ready(out)

    # Reference uses the equivalent full (B,1,S,S) additive mask, all-f32 math.
    attn_mask_full = jnp.broadcast_to(key_bias[:, None, None, :], (B, 1, S, S))
    ref = reference_layer(x, attn_mask_full, params, num_heads=H)

    # bf16 matmul inputs (f32 accumulation) => loosen tolerance vs the f32 reference.
    np.testing.assert_allclose(np.asarray(out), np.asarray(ref), atol=5e-2, rtol=5e-2)

    print("KERNEL_OK")
</pallas_src>

<mosaic_0001>
module attributes {stable_mosaic.version = 11 : i64} {
  func.func @_qkv_kernel(%arg0: i32, %arg1: i32, %arg2: memref<1x128x256xf32, #tpu.memory_space<vmem>>, %arg3: memref<1x256xf32, #tpu.memory_space<vmem>>, %arg4: memref<1x256xf32, #tpu.memory_space<vmem>>, %arg5: memref<256x256xbf16, #tpu.memory_space<vmem>>, %arg6: memref<1x256xf32, #tpu.memory_space<vmem>>, %arg7: memref<256x256xbf16, #tpu.memory_space<vmem>>, %arg8: memref<256x256xbf16, #tpu.memory_space<vmem>>, %arg9: memref<1x256xf32, #tpu.memory_space<vmem>>, %arg10: memref<1x4x128x64xbf16, #tpu.memory_space<vmem>>, %arg11: memref<1x4x128x64xbf16, #tpu.memory_space<vmem>>, %arg12: memref<1x4x128x64xbf16, #tpu.memory_space<vmem>>) attributes {dimension_semantics = [#tpu.dimension_semantics<parallel>, #tpu.dimension_semantics<parallel>], iteration_bounds = array<i64: 2, 2>, scalar_prefetch = 0 : i64, scratch_operands = 0 : i64, tpu.core_type = #tpu.core_type<tc>, window_params = [{transform_indices = @transform_0, window_bounds = array<i64: 1, 128, 256>}, {pipeline_mode = #tpu.pipeline_mode<synchronous>, transform_indices = @transform_1, window_bounds = array<i64: 1, 256>}, {pipeline_mode = #tpu.pipeline_mode<synchronous>, transform_indices = @transform_2, window_bounds = array<i64: 1, 256>}, {pipeline_mode = #tpu.pipeline_mode<synchronous>, transform_indices = @transform_3, window_bounds = array<i64: 256, 256>}, {pipeline_mode = #tpu.pipeline_mode<synchronous>, transform_indices = @transform_4, window_bounds = array<i64: 1, 256>}, {pipeline_mode = #tpu.pipeline_mode<synchronous>, transform_indices = @transform_5, window_bounds = array<i64: 256, 256>}, {pipeline_mode = #tpu.pipeline_mode<synchronous>, transform_indices = @transform_6, window_bounds = array<i64: 256, 256>}, {pipeline_mode = #tpu.pipeline_mode<synchronous>, transform_indices = @transform_7, window_bounds = array<i64: 1, 256>}, {transform_indices = @transform_8, window_bounds = array<i64: 1, 4, 128, 64>}, {transform_indices = @transform_9, window_bounds = array<i64: 1, 4, 128, 64>}, {transform_indices = @transform_10, window_bounds = array<i64: 1, 4, 128, 64>}]} {
    %c0 = arith.constant 0 : index
    %c0_0 = arith.constant 0 : index
    %c0_1 = arith.constant 0 : index
    %0 = vector.load %arg2[%c0, %c0_0, %c0_1] : memref<1x128x256xf32, #tpu.memory_space<vmem>>, vector<1x128x256xf32>
    %1 = vector.shape_cast %0 : vector<1x128x256xf32> to vector<128x256xf32>
    %c0_2 = arith.constant 0 : index
    %c0_3 = arith.constant 0 : index
    %2 = vector.load %arg3[%c0_2, %c0_3] : memref<1x256xf32, #tpu.memory_space<vmem>>, vector<1x256xf32>
    %c0_4 = arith.constant 0 : index
    %c0_5 = arith.constant 0 : index
    %3 = vector.load %arg4[%c0_4, %c0_5] : memref<1x256xf32, #tpu.memory_space<vmem>>, vector<1x256xf32>
    %cst = arith.constant dense<0.000000e+00> : vector<128xf32>
    %4 = vector.multi_reduction <add>, %1, %cst [1] : vector<128x256xf32> to vector<128xf32>
    %5 = vector.shape_cast %4 : vector<128xf32> to vector<128x1xf32>
    %cst_6 = arith.constant 2.560000e+02 : f32
    %6 = vector.broadcast %cst_6 : f32 to vector<128x1xf32>
    %7 = arith.divf %5, %6 : vector<128x1xf32>
    %8 = vector.broadcast %7 : vector<128x1xf32> to vector<128x256xf32>
    %9 = arith.subf %1, %8 : vector<128x256xf32>
    %10 = arith.mulf %9, %9 : vector<128x256xf32>
    %cst_7 = arith.constant dense<0.000000e+00> : vector<128xf32>
    %11 = vector.multi_reduction <add>, %10, %cst_7 [1] : vector<128x256xf32> to vector<128xf32>
    %12 = vector.shape_cast %11 : vector<128xf32> to vector<128x1xf32>
    %cst_8 = arith.constant 2.560000e+02 : f32
    %13 = vector.broadcast %cst_8 : f32 to vector<128x1xf32>
    %14 = arith.divf %12, %13 : vector<128x1xf32>
    %15 = vector.broadcast %7 : vector<128x1xf32> to vector<128x256xf32>
    %16 = arith.subf %1, %15 : vector<128x256xf32>
    %cst_9 = arith.constant 9.99999974E-6 : f32
    %17 = vector.broadcast %cst_9 : f32 to vector<128x1xf32>
    %18 = arith.addf %14, %17 : vector<128x1xf32>
    %19 = math.rsqrt %18 : vector<128x1xf32>
    %20 = vector.broadcast %19 : vector<128x1xf32> to vector<128x256xf32>
    %21 = arith.mulf %16, %20 : vector<128x256xf32>
    %22 = vector.broadcast %2 : vector<1x256xf32> to vector<128x256xf32>
    %23 = arith.mulf %21, %22 : vector<128x256xf32>
    %24 = vector.broadcast %3 : vector<1x256xf32> to vector<128x256xf32>
    %25 = arith.addf %23, %24 : vector<128x256xf32>
    %26 = arith.truncf %25 : vector<128x256xf32> to vector<128x256xbf16>
    %c0_10 = arith.constant 0 : index
    %c0_11 = arith.constant 0 : index
    %27 = vector.load %arg5[%c0_10, %c0_11] : memref<256x256xbf16, #tpu.memory_space<vmem>>, vector<256x256xbf16>
    %cst_12 = arith.constant dense<0.000000e+00> : vector<128x256xf32>
    %28 = tpu.matmul %26, %27, %cst_12 {dimension_numbers = #tpu.dot_dimension_numbers<[1], [0], [0], [1], [0, 0, 1, 1], [], []>} : vector<128x256xbf16>, vector<256x256xbf16>, vector<128x256xf32> -> vector<128x256xf32>
    %c0_13 = arith.constant 0 : index
    %c0_14 = arith.constant 0 : index
    %29 = vector.load %arg6[%c0_13, %c0_14] : memref<1x256xf32, #tpu.memory_space<vmem>>, vector<1x256xf32>
    %30 = vector.broadcast %29 : vector<1x256xf32> to vector<128x256xf32>
    %31 = arith.addf %28, %30 : vector<128x256xf32>
    %c0_15 = arith.constant 0 : index
    %c0_16 = arith.constant 0 : index
    %32 = vector.load %arg7[%c0_15, %c0_16] : memref<256x256xbf16, #tpu.memory_space<vmem>>, vector<256x256xbf16>
    %cst_17 = arith.constant dense<0.000000e+00> : vector<128x256xf32>
    %33 = tpu.matmul %26, %32, %cst_17 {dimension_numbers = #tpu.dot_dimension_numbers<[1], [0], [0], [1], [0, 0, 1, 1], [], []>} : vector<128x256xbf16>, vector<256x256xbf16>, vector<128x256xf32> -> vector<128x256xf32>
    %c0_18 = arith.constant 0 : index
    %c0_19 = arith.constant 0 : index
    %34 = vector.load %arg8[%c0_18, %c0_19] : memref<256x256xbf16, #tpu.memory_space<vmem>>, vector<256x256xbf16>
    %cst_20 = arith.constant dense<0.000000e+00> : vector<128x256xf32>
    %35 = tpu.matmul %26, %34, %cst_20 {dimension_numbers = #tpu.dot_dimension_numbers<[1], [0], [0], [1], [0, 0, 1, 1], [], []>} : vector<128x256xbf16>, vector<256x256xbf16>, vector<128x256xf32> -> vector<128x256xf32>
    %c0_21 = arith.constant 0 : index
    %c0_22 = arith.constant 0 : index
    %36 = vector.load %arg9[%c0_21, %c0_22] : memref<1x256xf32, #tpu.memory_space<vmem>>, vector<1x256xf32>
    %37 = vector.broadcast %36 : vector<1x256xf32> to vector<128x256xf32>
    %38 = arith.addf %35, %37 : vector<128x256xf32>
    %39 = vector.extract_strided_slice %31 {offsets = [0, 0], sizes = [128, 64], strides = [1, 1]} : vector<128x256xf32> to vector<128x64xf32>
    %40 = arith.truncf %39 : vector<128x64xf32> to vector<128x64xbf16>
    %c0_23 = arith.constant 0 : index
    %c0_24 = arith.constant 0 : index
    %c0_25 = arith.constant 0 : index
    %c0_26 = arith.constant 0 : index
    %41 = vector.load %arg10[%c0_23, %c0_24, %c0_25, %c0_26] : memref<1x4x128x64xbf16, #tpu.memory_space<vmem>>, vector<1x1x128x64xbf16>
    %42 = vector.shape_cast %41 : vector<1x1x128x64xbf16> to vector<128x64xbf16>
    %43 = vector.shape_cast %40 : vector<128x64xbf16> to vector<1x1x128x64xbf16>
    tpu.vector_store %arg10[%c0_23, %c0_24, %c0_25, %c0_26], %43 {strides = array<i32>} : memref<1x4x128x64xbf16, #tpu.memory_space<vmem>>, vector<1x1x128x64xbf16>,
    %44 = vector.extract_strided_slice %33 {offsets = [0, 0], sizes = [128, 64], strides = [1, 1]} : vector<128x256xf32> to vector<128x64xf32>
    %45 = arith.truncf %44 : vector<128x64xf32> to vector<128x64xbf16>
    %c0_27 = arith.constant 0 : index
    %c0_28 = arith.constant 0 : index
    %c0_29 = arith.constant 0 : index
    %c0_30 = arith.constant 0 : index
    %46 = vector.load %arg11[%c0_27, %c0_28, %c0_29, %c0_30] : memref<1x4x128x64xbf16, #tpu.memory_space<vmem>>, vector<1x1x128x64xbf16>
    %47 = vector.shape_cast %46 : vector<1x1x128x64xbf16> to vector<128x64xbf16>
    %48 = vector.shape_cast %45 : vector<128x64xbf16> to vector<1x1x128x64xbf16>
    tpu.vector_store %arg11[%c0_27, %c0_28, %c0_29, %c0_30], %48 {strides = array<i32>} : memref<1x4x128x64xbf16, #tpu.memory_space<vmem>>, vector<1x1x128x64xbf16>,
    %49 = vector.extract_strided_slice %38 {offsets = [0, 0], sizes = [128, 64], strides = [1, 1]} : vector<128x256xf32> to vector<128x64xf32>
    %50 = arith.truncf %49 : vector<128x64xf32> to vector<128x64xbf16>
    %c0_31 = arith.constant 0 : index
    %c0_32 = arith.constant 0 : index
    %c0_33 = arith.constant 0 : index
    %c0_34 = arith.constant 0 : index
    %51 = vector.load %arg12[%c0_31, %c0_32, %c0_33, %c0_34] : memref<1x4x128x64xbf16, #tpu.memory_space<vmem>>, vector<1x1x128x64xbf16>
    %52 = vector.shape_cast %51 : vector<1x1x128x64xbf16> to vector<128x64xbf16>
    %53 = vector.shape_cast %50 : vector<128x64xbf16> to vector<1x1x128x64xbf16>
    tpu.vector_store %arg12[%c0_31, %c0_32, %c0_33, %c0_34], %53 {strides = array<i32>} : memref<1x4x128x64xbf16, #tpu.memory_space<vmem>>, vector<1x1x128x64xbf16>,
    %54 = vector.extract_strided_slice %31 {offsets = [0, 64], sizes = [128, 64], strides = [1, 1]} : vector<128x256xf32> to vector<128x64xf32>
    %55 = arith.truncf %54 : vector<128x64xf32> to vector<128x64xbf16>
    %c0_35 = arith.constant 0 : index
    %c1 = arith.constant 1 : index
    %c0_36 = arith.constant 0 : index
    %c0_37 = arith.constant 0 : index
    %56 = vector.load %arg10[%c0_35, %c1, %c0_36, %c0_37] : memref<1x4x128x64xbf16, #tpu.memory_space<vmem>>, vector<1x1x128x64xbf16>
    %57 = vector.shape_cast %56 : vector<1x1x128x64xbf16> to vector<128x64xbf16>
    %58 = vector.shape_cast %55 : vector<128x64xbf16> to vector<1x1x128x64xbf16>
    tpu.vector_store %arg10[%c0_35, %c1, %c0_36, %c0_37], %58 {strides = array<i32>} : memref<1x4x128x64xbf16, #tpu.memory_space<vmem>>, vector<1x1x128x64xbf16>,
    %59 = vector.extract_strided_slice %33 {offsets = [0, 64], sizes = [128, 64], strides = [1, 1]} : vector<128x256xf32> to vector<128x64xf32>
    %60 = arith.truncf %59 : vector<128x64xf32> to vector<128x64xbf16>
    %c0_38 = arith.constant 0 : index
    %c1_39 = arith.constant 1 : index
    %c0_40 = arith.constant 0 : index
    %c0_41 = arith.constant 0 : index
    %61 = vector.load %arg11[%c0_38, %c1_39, %c0_40, %c0_41] : memref<1x4x128x64xbf16, #tpu.memory_space<vmem>>, vector<1x1x128x64xbf16>
    %62 = vector.shape_cast %61 : vector<1x1x128x64xbf16> to vector<128x64xbf16>
    %63 = vector.shape_cast %60 : vector<128x64xbf16> to vector<1x1x128x64xbf16>
    tpu.vector_store %arg11[%c0_38, %c1_39, %c0_40, %c0_41], %63 {strides = array<i32>} : memref<1x4x128x64xbf16, #tpu.memory_space<vmem>>, vector<1x1x128x64xbf16>,
    %64 = vector.extract_strided_slice %38 {offsets = [0, 64], sizes = [128, 64], strides = [1, 1]} : vector<128x256xf32> to vector<128x64xf32>
    %65 = arith.truncf %64 : vector<128x64xf32> to vector<128x64xbf16>
    %c0_42 = arith.constant 0 : index
    %c1_43 = arith.constant 1 : index
    %c0_44 = arith.constant 0 : index
    %c0_45 = arith.constant 0 : index
    %66 = vector.load %arg12[%c0_42, %c1_43, %c0_44, %c0_45] : memref<1x4x128x64xbf16, #tpu.memory_space<vmem>>, vector<1x1x128x64xbf16>
    %67 = vector.shape_cast %66 : vector<1x1x128x64xbf16> to vector<128x64xbf16>
    %68 = vector.shape_cast %65 : vector<128x64xbf16> to vector<1x1x128x64xbf16>
    tpu.vector_store %arg12[%c0_42, %c1_43, %c0_44, %c0_45], %68 {strides = array<i32>} : memref<1x4x128x64xbf16, #tpu.memory_space<vmem>>, vector<1x1x128x64xbf16>,
    %69 = vector.extract_strided_slice %31 {offsets = [0, 128], sizes = [128, 64], strides = [1, 1]} : vector<128x256xf32> to vector<128x64xf32>
    %70 = arith.truncf %69 : vector<128x64xf32> to vector<128x64xbf16>
    %c0_46 = arith.constant 0 : index
    %c2 = arith.constant 2 : index
    %c0_47 = arith.constant 0 : index
    %c0_48 = arith.constant 0 : index
    %71 = vector.load %arg10[%c0_46, %c2, %c0_47, %c0_48] : memref<1x4x128x64xbf16, #tpu.memory_space<vmem>>, vector<1x1x128x64xbf16>
    %72 = vector.shape_cast %71 : vector<1x1x128x64xbf16> to vector<128x64xbf16>
    %73 = vector.shape_cast %70 : vector<128x64xbf16> to vector<1x1x128x64xbf16>
    tpu.vector_store %arg10[%c0_46, %c2, %c0_47, %c0_48], %73 {strides = array<i32>} : memref<1x4x128x64xbf16, #tpu.memory_space<vmem>>, vector<1x1x128x64xbf16>,
    %74 = vector.extract_strided_slice %33 {offsets = [0, 128], sizes = [128, 64], strides = [1, 1]} : vector<128x256xf32> to vector<128x64xf32>
    %75 = arith.truncf %74 : vector<128x64xf32> to vector<128x64xbf16>
    %c0_49 = arith.constant 0 : index
    %c2_50 = arith.constant 2 : index
    %c0_51 = arith.constant 0 : index
    %c0_52 = arith.constant 0 : index
    %76 = vector.load %arg11[%c0_49, %c2_50, %c0_51, %c0_52] : memref<1x4x128x64xbf16, #tpu.memory_space<vmem>>, vector<1x1x128x64xbf16>
    %77 = vector.shape_cast %76 : vector<1x1x128x64xbf16> to vector<128x64xbf16>
    %78 = vector.shape_cast %75 : vector<128x64xbf16> to vector<1x1x128x64xbf16>
    tpu.vector_store %arg11[%c0_49, %c2_50, %c0_51, %c0_52], %78 {strides = array<i32>} : memref<1x4x128x64xbf16, #tpu.memory_space<vmem>>, vector<1x1x128x64xbf16>,
    %79 = vector.extract_strided_slice %38 {offsets = [0, 128], sizes = [128, 64], strides = [1, 1]} : vector<128x256xf32> to vector<128x64xf32>
    %80 = arith.truncf %79 : vector<128x64xf32> to vector<128x64xbf16>
    %c0_53 = arith.constant 0 : index
    %c2_54 = arith.constant 2 : index
    %c0_55 = arith.constant 0 : index
    %c0_56 = arith.constant 0 : index
    %81 = vector.load %arg12[%c0_53, %c2_54, %c0_55, %c0_56] : memref<1x4x128x64xbf16, #tpu.memory_space<vmem>>, vector<1x1x128x64xbf16>
    %82 = vector.shape_cast %81 : vector<1x1x128x64xbf16> to vector<128x64xbf16>
    %83 = vector.shape_cast %80 : vector<128x64xbf16> to vector<1x1x128x64xbf16>
    tpu.vector_store %arg12[%c0_53, %c2_54, %c0_55, %c0_56], %83 {strides = array<i32>} : memref<1x4x128x64xbf16, #tpu.memory_space<vmem>>, vector<1x1x128x64xbf16>,
    %84 = vector.extract_strided_slice %31 {offsets = [0, 192], sizes = [128, 64], strides = [1, 1]} : vector<128x256xf32> to vector<128x64xf32>
    %85 = arith.truncf %84 : vector<128x64xf32> to vector<128x64xbf16>
    %c0_57 = arith.constant 0 : index
    %c3 = arith.constant 3 : index
    %c0_58 = arith.constant 0 : index
    %c0_59 = arith.constant 0 : index
    %86 = vector.load %arg10[%c0_57, %c3, %c0_58, %c0_59] : memref<1x4x128x64xbf16, #tpu.memory_space<vmem>>, vector<1x1x128x64xbf16>
    %87 = vector.shape_cast %86 : vector<1x1x128x64xbf16> to vector<128x64xbf16>
    %88 = vector.shape_cast %85 : vector<128x64xbf16> to vector<1x1x128x64xbf16>
    tpu.vector_store %arg10[%c0_57, %c3, %c0_58, %c0_59], %88 {strides = array<i32>} : memref<1x4x128x64xbf16, #tpu.memory_space<vmem>>, vector<1x1x128x64xbf16>,
    %89 = vector.extract_strided_slice %33 {offsets = [0, 192], sizes = [128, 64], strides = [1, 1]} : vector<128x256xf32> to vector<128x64xf32>
    %90 = arith.truncf %89 : vector<128x64xf32> to vector<128x64xbf16>
    %c0_60 = arith.constant 0 : index
    %c3_61 = arith.constant 3 : index
    %c0_62 = arith.constant 0 : index
    %c0_63 = arith.constant 0 : index
    %91 = vector.load %arg11[%c0_60, %c3_61, %c0_62, %c0_63] : memref<1x4x128x64xbf16, #tpu.memory_space<vmem>>, vector<1x1x128x64xbf16>
    %92 = vector.shape_cast %91 : vector<1x1x128x64xbf16> to vector<128x64xbf16>
    %93 = vector.shape_cast %90 : vector<128x64xbf16> to vector<1x1x128x64xbf16>
    tpu.vector_store %arg11[%c0_60, %c3_61, %c0_62, %c0_63], %93 {strides = array<i32>} : memref<1x4x128x64xbf16, #tpu.memory_space<vmem>>, vector<1x1x128x64xbf16>,
    %94 = vector.extract_strided_slice %38 {offsets = [0, 192], sizes = [128, 64], strides = [1, 1]} : vector<128x256xf32> to vector<128x64xf32>
    %95 = arith.truncf %94 : vector<128x64xf32> to vector<128x64xbf16>
    %c0_64 = arith.constant 0 : index
    %c3_65 = arith.constant 3 : index
    %c0_66 = arith.constant 0 : index
    %c0_67 = arith.constant 0 : index
    %96 = vector.load %arg12[%c0_64, %c3_65, %c0_66, %c0_67] : memref<1x4x128x64xbf16, #tpu.memory_space<vmem>>, vector<1x1x128x64xbf16>
    %97 = vector.shape_cast %96 : vector<1x1x128x64xbf16> to vector<128x64xbf16>
    %98 = vector.shape_cast %95 : vector<128x64xbf16> to vector<1x1x128x64xbf16>
    tpu.vector_store %arg12[%c0_64, %c3_65, %c0_66, %c0_67], %98 {strides = array<i32>} : memref<1x4x128x64xbf16, #tpu.memory_space<vmem>>, vector<1x1x128x64xbf16>,
    return
  }
  func.func @transform_0(%arg0: i32, %arg1: i32) -> (i32, i32, i32) {
    %c0_i32 = arith.constant 0 : i32
    %c0_i32_0 = arith.constant 0 : i32
    return %arg0, %arg1, %c0_i32 : i32, i32, i32
  }
  func.func @transform_1(%arg0: i32, %arg1: i32) -> (i32, i32) {
    %c0_i32 = arith.constant 0 : i32
    %c0_i32_0 = arith.constant 0 : i32
    %c0_i32_1 = arith.constant 0 : i32
    return %c0_i32, %c0_i32_0 : i32, i32
  }
  func.func @transform_2(%arg0: i32, %arg1: i32) -> (i32, i32) {
    %c0_i32 = arith.constant 0 : i32
    %c0_i32_0 = arith.constant 0 : i32
    %c0_i32_1 = arith.constant 0 : i32
    return %c0_i32, %c0_i32_0 : i32, i32
  }
  func.func @transform_3(%arg0: i32, %arg1: i32) -> (i32, i32) {
    %c0_i32 = arith.constant 0 : i32
    %c0_i32_0 = arith.constant 0 : i32
    %c0_i32_1 = arith.constant 0 : i32
    return %c0_i32, %c0_i32_0 : i32, i32
  }
  func.func @transform_4(%arg0: i32, %arg1: i32) -> (i32, i32) {
    %c0_i32 = arith.constant 0 : i32
    %c0_i32_0 = arith.constant 0 : i32
    %c0_i32_1 = arith.constant 0 : i32
    return %c0_i32, %c0_i32_0 : i32, i32
  }
  func.func @transform_5(%arg0: i32, %arg1: i32) -> (i32, i32) {
    %c0_i32 = arith.constant 0 : i32
    %c0_i32_0 = arith.constant 0 : i32
    %c0_i32_1 = arith.constant 0 : i32
    return %c0_i32, %c0_i32_0 : i32, i32
  }
  func.func @transform_6(%arg0: i32, %arg1: i32) -> (i32, i32) {
    %c0_i32 = arith.constant 0 : i32
    %c0_i32_0 = arith.constant 0 : i32
    %c0_i32_1 = arith.constant 0 : i32
    return %c0_i32, %c0_i32_0 : i32, i32
  }
  func.func @transform_7(%arg0: i32, %arg1: i32) -> (i32, i32) {
    %c0_i32 = arith.constant 0 : i32
    %c0_i32_0 = arith.constant 0 : i32
    %c0_i32_1 = arith.constant 0 : i32
    return %c0_i32, %c0_i32_0 : i32, i32
  }
  func.func @transform_8(%arg0: i32, %arg1: i32) -> (i32, i32, i32, i32) {
    %c0_i32 = arith.constant 0 : i32
    %c0_i32_0 = arith.constant 0 : i32
    %c0_i32_1 = arith.constant 0 : i32
    return %arg0, %c0_i32, %arg1, %c0_i32_0 : i32, i32, i32, i32
  }
  func.func @transform_9(%arg0: i32, %arg1: i32) -> (i32, i32, i32, i32) {
    %c0_i32 = arith.constant 0 : i32
    %c0_i32_0 = arith.constant 0 : i32
    %c0_i32_1 = arith.constant 0 : i32
    return %arg0, %c0_i32, %arg1, %c0_i32_0 : i32, i32, i32, i32
  }
  func.func @transform_10(%arg0: i32, %arg1: i32) -> (i32, i32, i32, i32) {
    %c0_i32 = arith.constant 0 : i32
    %c0_i32_0 = arith.constant 0 : i32
    %c0_i32_1 = arith.constant 0 : i32
    return %arg0, %c0_i32, %arg1, %c0_i32_0 : i32, i32, i32, i32
  }
}

</mosaic_0001>

<bundles_post_ra>
// kernel: tpu_custom_call.1
= control target key start
LH: loop header
LB: loop body
LE: loop exit
PB: predicated region body
PF: predicated region fallthrough
CT: control target
= control target key end

     0   :  { %s6631_s0 = inlined_call_operand.hbm [shape: f32[2,256,256], index: 0, kind: input, shape index: {}]   ;;  %s6632_s1 = inlined_call_operand.vmem [shape: f32[1,256], index: 1, kind: input, shape index: {}]   ;;  %s6633_s2 = inlined_call_operand.vmem [shape: f32[1,256], index: 2, kind: input, shape index: {}]   ;;  %s6634_s3 = inlined_call_operand.hbm [shape: bf16[256,256], index: 3, kind: input, shape index: {}]   ;;  %s6635_s4 = inlined_call_operand.vmem [shape: f32[1,256], index: 4, kind: input, shape index: {}]   ;;  %s6636_s5 = inlined_call_operand.hbm [shape: bf16[256,256], index: 5, kind: input, shape index: {}]   ;;  %s6637_s6 = inlined_call_operand.hbm [shape: bf16[256,256], index: 6, kind: input, shape index: {}]   ;;  %s6638_s7 = inlined_call_operand.vmem [shape: f32[1,256], index: 7, kind: input, shape index: {}]   ;;  %s6639_s8 = inlined_call_operand.vmem [shape: bf16[2,4,256,64], index: 8, kind: output, shape index: {0}]   ;;  %s6640_s9 = inlined_call_operand.vmem [shape: bf16[2,4,256,64], index: 9, kind: output, shape index: {1}]   ;;  %s6641_s10 = inlined_call_operand.vmem [shape: bf16[2,4,256,64], index: 10, kind: output, shape index: {2}]  }
   0x1   :  { %6647 = sst [smem:[#allocation18_spill]] %s6634_s3 }
   0x2   :  { %6648 = sst [smem:[#allocation19_spill]] %s6636_s5 }
   0x3   :  { %6649 = sst [smem:[#allocation20_spill]] %s6637_s6 }
   0x4   :  { %6650 = sst [smem:[#allocation21_spill]] %s6638_s7 }
   0x5   :  { %6651 = sst [smem:[#allocation22_spill]] %s6639_s8 }
   0x6   :  { %6652 = sst [smem:[#allocation23_spill]] %s6640_s9 }
   0x7   :  { %6653 = sst [smem:[#allocation24_spill]] %s6641_s10 }
   0x8   :  { %16 = vsyncpa [#allocation3], 0 }
   0x9   :  { %18 = vsyncpa [#allocation3 + $0x1], 0 }
   0xa   :  { %19 = vsyncpa [#allocation5], 0 }
   0xb   :  { %20 = vsyncpa [#allocation8], 0  ;;  %s4779_s13 = smov 0   ;;  %s4781_s14 = smov 0  }
   0xc   :  { %s4783_s15 = smov 0   ;;  %s4785_s16 = smov 0  }
   0xd   :  { %s4787_s17 = smov 0   ;;  %s4789_s18 = smov 0  }
   0xe   :  { %s4791_s19 = smov 0   ;;  %s4793_s20 = smov 0  }
   0xf LB: > { %6654 = sst [smem:[#allocation15_spill]] %s4697_s16  ;;  %s3743_s21 = sadd.s32 4294967295, %s4713_s20   ;;  %s4713_s20 = sphi %s4793_s20, %s26_s20   ;;  %s4709_s19 = sphi %s4791_s19, %s6690_s19   ;;  %s4705_s18 = sphi %s4789_s18, %s6689_s18   ;;  %s4701_s17 = sphi %s4787_s17, %s6688_s17   ;;  %s4697_s16 = sphi %s4785_s16, %s6687_s16   ;;  %s4693_s15 = sphi %s4783_s15, %s6686_s15   ;;  %s4689_s14 = sphi %s4781_s14, %s6685_s14   ;;  %s4685_s13 = sphi %s4779_s13, %s6684_s13  }
  0x10   : > { %6655 = sst [smem:[#allocation16_spill]] %s4701_s17  ;;  %p60_p0 = scmp.ne.s32.totalorder %s4689_s14, %s4685_s13 }
  0x11   : > { %p4819_p1 = scmp.eq.s32.totalorder %s3743_s21, 0  ;;  %p4823_p2 = scmp.eq.s32.totalorder %s3743_s21, 3 }
  0x12   : > { %p3745_p3 = scmp.ge.s32.totalorder %s4713_s20, 1  ;;  %p302_p4 = scmp.lt.s32.totalorder %s4713_s20, 5 }
  0x13   : > { %s6656_s22 = scalar_select %p4819_p1, 1, 0 }
  0x14   : > { %s6657_s23 = scalar_select %p4823_p2, 1, 0 }
  0x15   : > { %p4831_p5 = por %p4819_p1, %p60_p0  ;;  %p4835_p6 = pnand %p3745_p3, %p302_p4 }
  0x16   : > { %s4715_s26 = smov [#allocation4]   ;;  %s4716_s29 = smov [#allocation6]  }
  0x17   : > { %s6658_s24 = scalar_select %p4831_p5, 1, 0 }
  0x18   : > { %s6659_s25 = scalar_select %p4835_p6, 1, 0 }
  0x19   : > { %s320_s27 = sshll.u32 %s4715_s26, 4  ;;  %p4256_p7 = pneg %p4835_p6  ;;  %s321_s27 = int_to_ptr.vmem [resolvable:$true] %s320_s27 }
  0x1a   : > { %s336_s30 = sshll.u32 %s4716_s29, 4  ;;  %s6661_s3 = sld [smem:[#allocation18_spill]]  ;;  %s4847_s30 = int_to_ptr.vmem [resolvable:$true] %s336_s30 }
  0x1b   : > { %p4843_p8 = pnand %p4256_p7, %p4819_p1 }
  0x1d   : > { %p4857_p10 = pneg %p4843_p8 }
  0x20   : > { %s4525_s13 = scalar_lea.hbm %s6661_s3, 4096 }
  0x21   : > { %p4526_p9 = scmp.ne.s32.totalorder %s6661_s3, %s4525_s13  ;;  %p4532_p13 = scmp.lt.u32.totalorder %s4525_s13, %s6661_s3 }
  0x23   : > { %p4528_p11 = pnand %p4857_p10, %p4526_p9 }
  0x25   : > { %p4529_p12 = pneg %p4528_p11 }
  0x27   : > { %p4534_p0 = pnand %p4532_p13, %p4529_p12 }
  0x29   : > { %4537 = shalt.err (!%p4534_p0)
}
  0x2a   : > { %s4538_s11 = scalar_lea.vmem %s321_s27, 4096  ;;  %p4546_p1 = scmp.lt.s32.totalorder %s321_s27, %s321_s27 }
  0x2b   : > { %p4539_p3 = scmp.ne.s32.totalorder %s321_s27, %s4538_s11  ;;  %p4547_p5 = scmp.lt.s32.totalorder %s4538_s11, %s4538_s11 }
  0x2d   : > { %p4541_p4 = pnand %p4539_p3, %p4857_p10  ;;  %p4548_p6 = por %p4547_p5, %p4546_p1 }
  0x2f   : > { %p4542_p7 = pneg %p4541_p4 }
  0x31   : > { %p4549_p2 = pnand %p4548_p6, %p4542_p7 }
  0x33   : > { %4552 = shalt.err (!%p4549_p2)
}
  0x34   : > { %s4717_s10 = smov 128   ;;  %s4718_s12 = smov 8  }
  0x35   : > { %4259 = dma.hbm_to_vmem [thread:$0]  (!%p4843_p8), %s6661_s3, 4096, %s321_s27, [#allocation5], %s4717_s10, %s4717_s10, %s4718_s12  }
  0x36   : > { %s6663_s5 = sld [smem:[#allocation19_spill]] }
  0x3c   : > { %s4553_s8 = scalar_lea.hbm %s6663_s5, 4096 }
  0x3d   : > { %p4554_p1 = scmp.ne.s32.totalorder %s6663_s5, %s4553_s8  ;;  %p4560_p6 = scmp.lt.u32.totalorder %s4553_s8, %s6663_s5 }
  0x3f   : > { %p4556_p2 = pnand %p4554_p1, %p4857_p10 }
  0x41   : > { %p4557_p5 = pneg %p4556_p2 }
  0x43   : > { %p4562_p9 = pnand %p4560_p6, %p4557_p5 }
  0x45   : > { %4565 = shalt.err (!%p4562_p9)
}
  0x46   : > { %s4566_s27 = scalar_lea.vmem %s4847_s30, 4096  ;;  %p4574_p0 = scmp.lt.s32.totalorder %s4847_s30, %s4847_s30 }
  0x47   : > { %p4567_p11 = scmp.ne.s32.totalorder %s4847_s30, %s4566_s27  ;;  %p4575_p3 = scmp.lt.s32.totalorder %s4566_s27, %s4566_s27 }
  0x49   : > { %p4569_p12 = pnand %p4567_p11, %p4857_p10  ;;  %p4576_p4 = por %p4575_p3, %p4574_p0 }
  0x4b   : > { %p4570_p13 = pneg %p4569_p12 }
  0x4d   : > { %p4577_p7 = pnand %p4576_p4, %p4570_p13 }
  0x4f   : > { %4580 = shalt.err (!%p4577_p7)
}
  0x50   : > { %4262 = dma.hbm_to_vmem [thread:$0]  (!%p4843_p8), %s6663_s5, 4096, %s4847_s30, [#allocation5], %s4717_s10, %s4717_s10, %s4718_s12  }
  0x51   : > { %s4719_s16 = smov [#allocation7]   ;;  %s6664_s6 = sld [smem:[#allocation20_spill]] }
  0x52   : > { %s349_s17 = sshll.u32 %s4719_s16, 4  ;;  %s350_s17 = int_to_ptr.vmem [resolvable:$true] %s349_s17 }
  0x57   : > { %s4581_s21 = scalar_lea.hbm %s6664_s6, 4096 }
  0x58   : > { %p4582_p1 = scmp.ne.s32.totalorder %s6664_s6, %s4581_s21  ;;  %p4588_p6 = scmp.lt.u32.totalorder %s4581_s21, %s6664_s6 }
  0x5a   : > { %p4584_p2 = pnand %p4582_p1, %p4857_p10 }
  0x5c   : > { %p4585_p5 = pneg %p4584_p2 }
  0x5e   : > { %p4590_p9 = pnand %p4588_p6, %p4585_p5 }
  0x60   : > { %4593 = shalt.err (!%p4590_p9)
}
  0x61   : > { %s4594_s30 = scalar_lea.vmem %s350_s17, 4096  ;;  %p4602_p0 = scmp.lt.s32.totalorder %s350_s17, %s350_s17 }
  0x62   : > { %p4595_p11 = scmp.ne.s32.totalorder %s350_s17, %s4594_s30  ;;  %p4603_p3 = scmp.lt.s32.totalorder %s4594_s30, %s4594_s30 }
  0x64   : > { %p4597_p12 = pnand %p4595_p11, %p4857_p10  ;;  %p4604_p4 = por %p4603_p3, %p4602_p0 }
  0x66   : > { %p4598_p13 = pneg %p4597_p12 }
  0x68   : > { %p4605_p7 = pnand %p4604_p4, %p4598_p13 }
  0x6a   : > { %4608 = shalt.err (!%p4605_p7)
}
  0x6b   : > { %4265 = dma.hbm_to_vmem [thread:$0]  (!%p4843_p8), %s6664_s6, 4096, %s350_s17, [#allocation8], %s4717_s10, %s4717_s10, %s4718_s12  }
  0x6c   : > { %s35_s26 = sadd.s32 1, %s4705_s18  ;;  %s38_s28 = sadd.s32 1, %s4709_s19 }
  0x6d   : > { %p36_p10 = scmp.ge.s32.totalorder %s35_s26, 2  ;;  %s47_s8 = sadd.s32 1, %s4693_s15 }
  0x6e   : > { %p54_p1 = scmp.ne.s32.totalorder %s4693_s15, %s4689_s14  ;;  %p55_p2 = scmp.eq.s32.totalorder %s4713_s20, 0 }
  0x6f   : > { %s6692_s26 = smov (%p36_p10, %s35_s26), 0  ;;  %s6694_s28 = smov (!%p36_p10, %s38_s28), %s4709_s19 }
  0x70   : > { %6665 = sst [smem:[#allocation17_spill]] %s6692_s26  ;;  %s43_s16 = ssub.s32 %s4705_s18, %s6692_s26 }
  0x71   : > { %p4934_p5 = por %p55_p2, %p54_p1  ;;  %p40_p8 = scmp.ge.s32.totalorder %s6694_s28, 2 }
  0x72   : > { %p6667_p6 = scmp.ne.s32.totalorder %s6657_s23, 0  ;;  %p4273_p11 = scmp.lt.s32.totalorder %s4713_s20, 4 }
  0x73   : > { %s366_s12 = sand.u32 1, %s4693_s15   ;;  %s6696_s28 = smov (%p40_p8, %s6694_s28), 0 }
  0x74   : > { %p4940_p9 = por %p6667_p6, %p54_p1  ;;  %s3750_s17 = sshll.u32 %s366_s12, 8 }
  0x75   : > { %s42_s13 = ssub.s32 %s4709_s19, %s6696_s28  ;;  %s4113_s29 = sshll.u32 %s4705_s18, 5 }
  0x76   : > { %s44_s21 = sor.u32 %s43_s16, %s42_s13  ;;  %s3753_s11 = sshll.u32 %s4709_s19, 6 }
  0x77   : > { %p45_p12 = scmp.eq.s32.totalorder %s44_s21, 0  ;;  %s377_s27 = sadd.s32 %s4113_s29, %s3753_s11 }
  0x78   : > { %s370_s30 = scalar_lea.vmem [#allocation2], %s3750_s17  ;;  %s3754_s7 = sshll.u32 %s377_s27, 7 }
  0x79   : > { %s380_s23 = sshll.u32 %s370_s30, 4  ;;  %s4960_s26 = scalar_lea.hbm %s6631_s0, %s3754_s7  ;;  %s4955_s23 = int_to_ptr.vmem [resolvable:$true] %s380_s23 }
  0x7a   : > { %s4953_s3 = scalar_select %p45_p12, %s4693_s15, %s47_s8  }
  0x7b   : > { %p4966_p13 = pnand %p4273_p11, %p4934_p5  ;;  %s4970_s8 = scalar_lea.sflag [#allocation3], %s366_s12 }
  0x7c   : > { %s4609_s17 = scalar_lea.hbm %s4960_s26, 4096  ;;  %s4614_s9 = scalar_lea.hbm %s6631_s0, 16384 }
  0x7d   : > { %p4610_p0 = scmp.ne.s32.totalorder %s4960_s26, %s4609_s17  ;;  %p4611_p3 = pneg %p4966_p13 }
  0x7e   : > { %p4615_p10 = scmp.lt.u32.totalorder %s4960_s26, %s6631_s0  ;;  %p4616_p1 = scmp.lt.u32.totalorder %s4614_s9, %s4609_s17 }
  0x7f   : > { %p4612_p4 = pnand %p4611_p3, %p4610_p0  ;;  %p4618_p5 = scmp.lt.u32.totalorder %s4609_s17, %s4960_s26 }
  0x80   : > { %p4617_p2 = por %p4616_p1, %p4615_p10 }
  0x81   : > { %p4613_p7 = pneg %p4612_p4 }
  0x82   : > { %p4619_p8 = por %p4618_p5, %p4617_p2 }
  0x84   : > { %p4620_p6 = pnand %p4619_p8, %p4613_p7 }
  0x86   : > { %4623 = shalt.err (!%p4620_p6)
}
  0x87   : > { %s4624_s12 = scalar_lea.vmem %s4955_s23, 4096  ;;  %s4720_s29 = smov [#allocation2]  }
  0x88   : > { %p4625_p11 = scmp.ne.s32.totalorder %s4955_s23, %s4624_s12  ;;  %s4629_s11 = sshll.u32 %s4720_s29, 4  ;;  %s4630_s11 = int_to_ptr.vmem [resolvable:$false] %s4629_s11 }
  0x89   : > { %s4631_s27 = scalar_lea.vmem %s4630_s11, 8192  ;;  %p4632_p4 = scmp.lt.s32.totalorder %s4955_s23, %s4630_s11 }
  0x8a   : > { %p4627_p12 = pnand %p4625_p11, %p4611_p3  ;;  %p4633_p10 = scmp.lt.s32.totalorder %s4631_s27, %s4624_s12 }
  0x8c   : > { %p4628_p0 = pneg %p4627_p12  ;;  %p4634_p1 = por %p4633_p10, %p4632_p4 }
  0x8e   : > { %p4635_p2 = pnand %p4634_p1, %p4628_p0 }
  0x90   : > { %4638 = shalt.err (!%p4635_p2)
}
  0x91   : > { %s4721_s30 = smov 256   ;;  %s4722_s7 = smov 16  }
  0x92   : > { %4269 = dma.hbm_to_vmem [thread:$0]  (!%p4966_p13), %s4960_s26, 4096, %s4955_s23, %s4970_s8, %s4721_s30, %s4721_s30, %s4722_s7  }
  0x93   : > { %p6670_p3 = scmp.ne.s32.totalorder %s6659_s25, 0 }
  0x94   : > { %s394_s17 = sand.u32 (!%p6670_p3), 1, %s4689_s14   ;;  %p6671_p7 = scmp.ne.s32.totalorder (!%p6670_p3), %s6658_s24, 0 }
  0x95   : > { %392 = sbr.rel (%p6670_p3) target bundleno = 1063 (0x427), region = 52  ;;  %s5001_s5 = sshll.u32 (!%p6670_p3), %s394_s17, 8 }
  0x96   : > { %s395_s6 = scalar_lea.sflag (!%p6670_p3), [#allocation3], %s394_s17  ;;  %s5004_s9 = scalar_lea.vmem (!%p6670_p3), [#allocation2], %s5001_s5 }
  0x9c   : > { %4672 = dma.done.wait (%p6671_p7), %s395_s6, 4096  }
  0x9d   : > { %4674 = vsyncadd (%p6671_p7), %s395_s6, 4294963200  ;;  %p6672_p5 = scmp.ne.s32.totalorder %s6656_s22, 0 }
  0x9f   : > { %4676 = dma.done.wait (%p6672_p5), [#allocation5], 8192  }
  0xa0   : > { %4678 = vsyncadd (%p6672_p5), [#allocation5], 4294959104 }
  0xa1   : > { %4680 = dma.done.wait (%p6672_p5), [#allocation8], 4096  }
  0xa2   : > { %4682 = vsyncadd (%p6672_p5), [#allocation8], 4294963200  ;;  %v5019_v0 = vld [vmem:[%s5004_s9] sm:$0xff]  ;;  %v5022_v1 = vld [vmem:[%s5004_s9 + $0x8] sm:$0xff]  ;;  %vm1854_vm0 = vcmask 519168   ;;  %s5501_s8 = scalar_lea.vmem [#allocation10], %s5001_s5 }
  0xa3   : > { %v5025_v2 = vld [vmem:[%s5004_s9 + $0x20] sm:$0xff]  ;;  %v492_v3 = vadd.f32 %v5022_v1, %v5019_v0  ;;  %v5030_v4 = vld [vmem:[%s5004_s9 + $0x28] sm:$0xff]  ;;  %v5033_v5 = vld [vmem:[%s5004_s9 + $0x10] sm:$0xff]  ;;  %s4723_s13 = smov 64   ;;  %s5511_s21 = scalar_lea.vmem [#allocation9], %s5001_s5 }
  0xa4   : > { %v5036_v6 = vld [vmem:[%s5004_s9 + $0x18] sm:$0xff]  ;;  %v498_v7 = vadd.f32 %v5030_v4, %v5025_v2  ;;  %v5041_v8 = vld [vmem:[%s5004_s9 + $0x30] sm:$0xff]  ;;  %v5051_v12 = vld [vmem:[%s5004_s9 + $0x40] sm:$0xff]  ;;  %s6673_s11 = sld [smem:[#allocation21_spill]]  ;;  %s5894_s27 = scalar_lea.vmem [#allocation11], %s5001_s5 }
  0xa5   : > { %v5044_v9 = vld [vmem:[%s5004_s9 + $0x38] sm:$0xff]  ;;  %493 = vadd.xlane.f32.xlu0 %v492_v3  ;;  %v495_v10 = vadd.f32 %v5036_v6, %v5033_v5  ;;  %v5054_v13 = vld [vmem:[%s5004_s9 + $0x48] sm:$0xff]  ;;  %v5057_v14 = vld [vmem:[%s5004_s9 + $0x50] sm:$0xff]  ;;  %s6674_s30 = sld [smem:[#allocation15_spill]] (%p4940_p9)  ;;  %s6675_s7 = sld [smem:[#allocation16_spill]] (%p4940_p9) }
  0xa6   : > { %499 = vadd.xlane.f32.xlu1 %v498_v7  ;;  %v501_v11 = vadd.f32 %v5044_v9, %v5041_v8  ;;  %v5060_v15 = vld [vmem:[%s5004_s9 + $0x58] sm:$0xff]  ;;  %v504_v16 = vadd.f32 %v5054_v13, %v5051_v12  ;;  %v5067_v18 = vld [vmem:[%s5004_s9 + $0x60] sm:$0xff]  ;;  %v5070_v19 = vld [vmem:[%s5004_s9 + $0x68] sm:$0xff]  ;;  %s6676_s25 = sld [smem:[#allocation22_spill]] (%p4940_p9) }
  0xa7   : > { %v507_v17 = vadd.f32 %v5060_v15, %v5057_v14  ;;  %v5073_v20 = vld [vmem:[%s5004_s9 + $0x70] sm:$0xff]  ;;  %v5076_v21 = vld [vmem:[%s5004_s9 + $0x78] sm:$0xff]  ;;  %v5079_v22 = vld [vmem:[%s5004_s9 + $0x80] sm:$0xff]  ;;  %v510_v24 = vadd.f32 %v5070_v19, %v5067_v18 }
  0xa8   : > { %v5082_v23 = vld [vmem:[%s5004_s9 + $0x88] sm:$0xff]  ;;  %v5087_v25 = vld [vmem:[%s5004_s9 + $0x90] sm:$0xff]  ;;  %v5090_v26 = vld [vmem:[%s5004_s9 + $0x98] sm:$0xff]  ;;  %v513_v27 = vadd.f32 %v5076_v21, %v5073_v20 }
  0xa9   : > { %496 = vadd.xlane.f32.xlu0 %v495_v10  ;;  %v5095_v28 = vld [vmem:[%s5004_s9 + $0xa0] sm:$0xff]  ;;  %v5098_v29 = vld [vmem:[%s5004_s9 + $0xa8] sm:$0xff]  ;;  %v516_v30 = vadd.f32 %v5082_v23, %v5079_v22  ;;  %v5103_v31 = vld [vmem:[%s5004_s9 + $0xb0] sm:$0xff]  ;;  %v519_v33 = vadd.f32 %v5090_v26, %v5087_v25 }
  0xaa   : > { %502 = vadd.xlane.f32.xlu1 %v501_v11  ;;  %v5106_v32 = vld [vmem:[%s5004_s9 + $0xb8] sm:$0xff]  ;;  %v5111_v34 = vld [vmem:[%s5004_s9 + $0xc0] sm:$0xff]  ;;  %v5114_v35 = vld [vmem:[%s5004_s9 + $0xc8] sm:$0xff]  ;;  %v522_v36 = vadd.f32 %v5098_v29, %v5095_v28 }
  0xab   : > { %v5119_v37 = vld [vmem:[%s5004_s9 + $0xd0] sm:$0xff]  ;;  %v5122_v38 = vld [vmem:[%s5004_s9 + $0xd8] sm:$0xff]  ;;  %v525_v39 = vadd.f32 %v5106_v32, %v5103_v31  ;;  %v5127_v40 = vld [vmem:[%s5004_s9 + $0xe0] sm:$0xff]  ;;  %v528_v42 = vadd.f32 %v5114_v35, %v5111_v34  ;;  %s4102_s17 = sshll.u32 (%p4940_p9), %s6674_s30, 4  ;;  %s4103_s5 = sshll.u32 (%p4940_p9), %s6675_s7, 7 }
  0xac   : > { %v5130_v41 = vld [vmem:[%s5004_s9 + $0xe8] sm:$0xff]  ;;  %v5135_v43 = vld [vmem:[%s5004_s9 + $0xf0] sm:$0xff]  ;;  %v5138_v44 = vld [vmem:[%s5004_s9 + $0xf8] sm:$0xff]  ;;  %v531_v45 = vadd.f32 %v5122_v38, %v5119_v37  ;;  %s2681_s6 = sadd.s32 (%p4940_p9), %s4103_s5, %s4102_s17 }
  0xad   : > { %505 = vadd.xlane.f32.xlu0 %v504_v16  ;;  %v534_v46 = vadd.f32 %v5130_v41, %v5127_v40  ;;  %v537_v47 = vadd.f32 %v5138_v44, %v5135_v43  ;;  %v4349_v48 = vld [vmem:[#allocation4 + $0x4] ss:$8 sps:$4 sm:$0xff]   ;;  %v4353_v50 = vld [vmem:[#allocation4] ss:$8 sps:$4 sm:$0xff]   ;;  %v4355_v52 = vld [vmem:[#allocation4 + $0x14] ss:$8 sps:$4 sm:$0xff]  }
  0xae   : > { %508 = vadd.xlane.f32.xlu1 %v507_v17  ;;  %v4351_v49 = vld [vmem:[#allocation6 + $0x4] ss:$8 sps:$4 sm:$0xff]   ;;  %v4354_v51 = vld [vmem:[#allocation6] ss:$8 sps:$4 sm:$0xff]   ;;  %v4357_v53 = vld [vmem:[#allocation6 + $0x14] ss:$8 sps:$4 sm:$0xff]   ;;  %1055 = vmatprep.subr.bf16.mxu0 %v4349_v48 }
  0xaf   : > { %1360 = vmatprep.subr.bf16.mxu1 %v4351_v49  ;;  %1056 = vmatpush1.bf16.msra.mxu0 %v4353_v50  ;;  %v4359_v54 = vld [vmem:[#allocation4 + $0x10] ss:$8 sps:$4 sm:$0xff]   ;;  %v4361_v56 = vld [vmem:[#allocation4 + $0x24] ss:$8 sps:$4 sm:$0xff]   ;;  %v4365_v58 = vld [vmem:[#allocation4 + $0x20] ss:$8 sps:$4 sm:$0xff]  }
  0xb0   : > { %1361 = vmatpush1.bf16.msra.mxu1 %v4354_v51  ;;  %v4360_v55 = vld [vmem:[#allocation6 + $0x10] ss:$8 sps:$4 sm:$0xff]   ;;  %1057 = vmatprep.subr.bf16.mxu0 %v4355_v52  ;;  %v4363_v57 = vld [vmem:[#allocation6 + $0x24] ss:$8 sps:$4 sm:$0xff]   ;;  %v4366_v59 = vld [vmem:[#allocation6 + $0x20] ss:$8 sps:$4 sm:$0xff]  }
  0xb1   : > { %511 = vadd.xlane.f32.xlu0 %v510_v24  ;;  %1362 = vmatprep.subr.bf16.mxu1 %v4357_v53  ;;  %v4367_v60 = vld [vmem:[#allocation4 + $0x34] ss:$8 sps:$4 sm:$0xff]   ;;  %v4371_v62 = vld [vmem:[#allocation4 + $0x30] ss:$8 sps:$4 sm:$0xff]   ;;  %v4373_v3 = vld [vmem:[#allocation4 + $0x44] ss:$8 sps:$4 sm:$0xff]  }
  0xb2   : > { %514 = vadd.xlane.f32.xlu1 %v513_v27  ;;  %v4369_v61 = vld [vmem:[#allocation6 + $0x34] ss:$8 sps:$4 sm:$0xff]   ;;  %v4372_v63 = vld [vmem:[#allocation6 + $0x30] ss:$8 sps:$4 sm:$0xff]   ;;  %v4375_v7 = vld [vmem:[#allocation6 + $0x44] ss:$8 sps:$4 sm:$0xff]  }
  0xb3   : > { %1058 = vmatpush1.bf16.msra.mxu0 %v4359_v54  ;;  %v4377_v10 = vld [vmem:[#allocation4 + $0x40] ss:$8 sps:$4 sm:$0xff]   ;;  %v4379_v16 = vld [vmem:[#allocation4 + $0x54] ss:$8 sps:$4 sm:$0xff]   ;;  %v4383_v24 = vld [vmem:[#allocation4 + $0x50] ss:$8 sps:$4 sm:$0xff]  }
  0xb4   : > { %1363 = vmatpush1.bf16.msra.mxu1 %v4360_v55  ;;  %1059 = vmatprep.subr.bf16.mxu0 %v4361_v56  ;;  %v4378_v11 = vld [vmem:[#allocation6 + $0x40] ss:$8 sps:$4 sm:$0xff]   ;;  %v4381_v17 = vld [vmem:[#allocation6 + $0x54] ss:$8 sps:$4 sm:$0xff]   ;;  %v4384_v27 = vld [vmem:[#allocation6 + $0x50] ss:$8 sps:$4 sm:$0xff]  }
  0xb5   : > { %517 = vadd.xlane.f32.xlu0 %v516_v30  ;;  %1364 = vmatprep.subr.bf16.mxu1 %v4363_v57  ;;  %v4385_v30 = vld [vmem:[#allocation4 + $0x64] ss:$8 sps:$4 sm:$0xff]   ;;  %v4401_v50 = vld [vmem:[#allocation4 + $0x80] ss:$8 sps:$4 sm:$0xff]   ;;  %s4104_s9 = sshll.u32 (%p4940_p9), %s2681_s6, 2 }
  0xb6   : > { %520 = vadd.xlane.f32.xlu1 %v519_v33  ;;  %v4387_v33 = vld [vmem:[#allocation6 + $0x64] ss:$8 sps:$4 sm:$0xff]   ;;  %v4402_v51 = vld [vmem:[#allocation6 + $0x80] ss:$8 sps:$4 sm:$0xff]   ;;  %s6404_s26 = scalar_lea.vmem (%p4940_p9), %s6676_s25, %s4104_s9 }
  0xb7   : > { %1060 = vmatpush1.bf16.msra.mxu0 %v4365_v58  ;;  %v4397_v48 = vld [vmem:[#allocation4 + $0x84] ss:$8 sps:$4 sm:$0xff]  }
  0xb8   : > { %1365 = vmatpush1.bf16.msra.mxu1 %v4366_v59  ;;  %1061 = vmatprep.subr.bf16.mxu0 %v4367_v60  ;;  %v4399_v49 = vld [vmem:[#allocation6 + $0x84] ss:$8 sps:$4 sm:$0xff]  }
  0xb9   : > { %523 = vadd.xlane.f32.xlu0 %v522_v36  ;;  %1366 = vmatprep.subr.bf16.mxu1 %v4369_v61  ;;  %v4389_v36 = vld [vmem:[#allocation4 + $0x60] ss:$8 sps:$4 sm:$0xff]  }
  0xba   : > { %526 = vadd.xlane.f32.xlu1 %v525_v39  ;;  %v4390_v39 = vld [vmem:[#allocation6 + $0x60] ss:$8 sps:$4 sm:$0xff]  }
  0xbb   : > { %1062 = vmatpush1.bf16.msra.mxu0 %v4371_v62 }
  0xbc   : > { %1367 = vmatpush1.bf16.msra.mxu1 %v4372_v63  ;;  %1063 = vmatprep.subr.bf16.mxu0 %v4373_v3 }
  0xbd   : > { %529 = vadd.xlane.f32.xlu0 %v528_v42  ;;  %1368 = vmatprep.subr.bf16.mxu1 %v4375_v7  ;;  %v4391_v42 = vld [vmem:[#allocation4 + $0x74] ss:$8 sps:$4 sm:$0xff]  }
  0xbe   : > { %532 = vadd.xlane.f32.xlu1 %v531_v45  ;;  %v4393_v45 = vld [vmem:[#allocation6 + $0x74] ss:$8 sps:$4 sm:$0xff]  }
  0xbf   : > { %1064 = vmatpush1.bf16.msra.mxu0 %v4377_v10 }
  0xc0   : > { %1369 = vmatpush1.bf16.msra.mxu1 %v4378_v11  ;;  %1065 = vmatprep.subr.bf16.mxu0 %v4379_v16 }
  0xc1   : > { %535 = vadd.xlane.f32.xlu0 %v534_v46  ;;  %1370 = vmatprep.subr.bf16.mxu1 %v4381_v17  ;;  %v4395_v46 = vld [vmem:[#allocation4 + $0x70] ss:$8 sps:$4 sm:$0xff]  }
  0xc2   : > { %538 = vadd.xlane.f32.xlu1 %v537_v47  ;;  %v4396_v47 = vld [vmem:[#allocation6 + $0x70] ss:$8 sps:$4 sm:$0xff]  }
  0xc3   : > { %1066 = vmatpush1.bf16.msra.mxu0 %v4383_v24 }
  0xc4   : > { %1371 = vmatpush1.bf16.msra.mxu1 %v4384_v27  ;;  %1067 = vmatprep.subr.bf16.mxu0 %v4385_v30 }
  0xc5   : > { %1372 = vmatprep.subr.bf16.mxu1 %v4387_v33 }
  0xc7   : > { %1068 = vmatpush1.bf16.msra.mxu0 %v4389_v36 }
  0xc8   : > { %1373 = vmatpush1.bf16.msra.mxu1 %v4390_v39  ;;  %1069 = vmatprep.subr.bf16.mxu0 %v4391_v42 }
  0xc9   : > { %1374 = vmatprep.subr.bf16.mxu1 %v4393_v45 }
  0xcb   : > { %1070 = vmatpush1.bf16.msra.mxu0 %v4395_v46 }
  0xcc   : > { %1375 = vmatpush1.bf16.msra.mxu1 %v4396_v47  ;;  %1071 = vmatprep.subr.bf16.mxu0 %v4397_v48 }
  0xcd   : > { %1376 = vmatprep.subr.bf16.mxu1 %v4399_v49 }
  0xcf   : > { %1072 = vmatpush1.bf16.msra.mxu0 %v4401_v50 }
  0xd0   : > { %1377 = vmatpush1.bf16.msra.mxu1 %v4402_v51 }
 0x132   : > { %v494_v52 = vpop.xlane.xlu0 %493 }
 0x133   : > { %v541_v53 = vmul.f32 0.00390625, %v494_v52  ;;  %v500_v54 = vpop.xlane.xlu1 %499 }
 0x134   : > { %v543_v55 = vmul.f32 0.00390625, %v500_v54 }
 0x135   : > { %v5147_v56 = vsub.f32 %v5019_v0, %v541_v53  ;;  %v5150_v57 = vsub.f32 %v5022_v1, %v541_v53 }
 0x136   : > { %v5153_v58 = vsub.f32 %v5025_v2, %v543_v55  ;;  %v5156_v59 = vsub.f32 %v5030_v4, %v543_v55  ;;  %v497_v60 = vpop.xlane.xlu0 %496 }
 0x137   : > { %v542_v61 = vmul.f32 0.00390625, %v497_v60  ;;  %v503_v62 = vpop.xlane.xlu1 %502  ;;  %v589_v63 = vmul.f32 %v5147_v56, %v5147_v56  ;;  %v590_v3 = vmul.f32 %v5150_v57, %v5150_v57 }
 0x138   : > { %v544_v0 = vmul.f32 0.00390625, %v503_v62  ;;  %v593_v1 = vmul.f32 %v5153_v58, %v5153_v58  ;;  %v594_v2 = vmul.f32 %v5156_v59, %v5156_v59 }
 0x139   : > { %v5167_v7 = vsub.f32 %v5033_v5, %v542_v61  ;;  %v5170_v4 = vsub.f32 %v5036_v6, %v542_v61  ;;  %v621_v10 = vadd.f32 %v590_v3, %v589_v63 }
 0x13a   : > { %v5173_v11 = vsub.f32 %v5041_v8, %v544_v0  ;;  %v5176_v16 = vsub.f32 %v5044_v9, %v544_v0  ;;  %v506_v17 = vpop.xlane.xlu0 %505  ;;  %v627_v30 = vadd.f32 %v594_v2, %v593_v1 }
 0x13b   : > { %v545_v24 = vmul.f32 0.00390625, %v506_v17  ;;  %622 = vadd.xlane.f32.xlu0 %v621_v10  ;;  %v509_v27 = vpop.xlane.xlu1 %508  ;;  %v591_v33 = vmul.f32 %v5167_v7, %v5167_v7  ;;  %v592_v5 = vmul.f32 %v5170_v4, %v5170_v4 }
 0x13c   : > { %v546_v6 = vmul.f32 0.00390625, %v509_v27  ;;  %v595_v36 = vmul.f32 %v5173_v11, %v5173_v11  ;;  %v596_v8 = vmul.f32 %v5176_v16, %v5176_v16 }
 0x13d   : > { %v5187_v9 = vsub.f32 %v5051_v12, %v545_v24  ;;  %v5190_v39 = vsub.f32 %v5054_v13, %v545_v24  ;;  %v624_v42 = vadd.f32 %v592_v5, %v591_v33 }
 0x13e   : > { %v5193_v45 = vsub.f32 %v5057_v14, %v546_v6  ;;  %v5196_v46 = vsub.f32 %v5060_v15, %v546_v6  ;;  %v512_v47 = vpop.xlane.xlu0 %511  ;;  %v630_v50 = vadd.f32 %v596_v8, %v595_v36  ;;  %v4403_v6 = vld [vmem:[#allocation4 + $0x94] ss:$8 sps:$4 sm:$0xff]  }
 0x13f   : > { %v547_v48 = vmul.f32 0.00390625, %v512_v47  ;;  %628 = vadd.xlane.f32.xlu0 %v627_v30  ;;  %625 = vadd.xlane.f32.xlu1 %v624_v42  ;;  %v515_v49 = vpop.xlane.xlu1 %514  ;;  %v597_v12 = vmul.f32 %v5187_v9, %v5187_v9  ;;  %v598_v13 = vmul.f32 %v5190_v39, %v5190_v39  ;;  %v4405_v36 = vld [vmem:[#allocation6 + $0x94] ss:$8 sps:$4 sm:$0xff]   ;;  %v4407_v42 = vld [vmem:[#allocation4 + $0x90] ss:$8 sps:$4 sm:$0xff]  }
 0x140   : > { %v548_v51 = vmul.f32 0.00390625, %v515_v49  ;;  %v599_v14 = vmul.f32 %v5193_v45, %v5193_v45  ;;  %v600_v15 = vmul.f32 %v5196_v46, %v5196_v46  ;;  %v4408_v47 = vld [vmem:[#allocation6 + $0x90] ss:$8 sps:$4 sm:$0xff]   ;;  %1073 = vmatprep.subr.bf16.mxu0 %v4403_v6  ;;  %1378 = vmatprep.subr.bf16.mxu1 %v4405_v36  ;;  %v4417_v6 = vld [vmem:[#allocation6 + $0xb4] ss:$8 sps:$4 sm:$0xff]  }
 0x141   : > { %v5207_v52 = vsub.f32 %v5067_v18, %v547_v48  ;;  %v5210_v53 = vsub.f32 %v5070_v19, %v547_v48  ;;  %v633_v54 = vadd.f32 %v598_v13, %v597_v12  ;;  %1074 = vmatpush1.bf16.msra.mxu0 %v4407_v42  ;;  %1379 = vmatpush1.bf16.msra.mxu1 %v4408_v47  ;;  %v4420_v42 = vld [vmem:[#allocation6 + $0xb0] ss:$8 sps:$4 sm:$0xff]  }
 0x142   : > { %v5213_v55 = vsub.f32 %v5073_v20, %v548_v51  ;;  %v5216_v60 = vsub.f32 %v5076_v21, %v548_v51  ;;  %v518_v61 = vpop.xlane.xlu0 %517  ;;  %v636_v3 = vadd.f32 %v600_v15, %v599_v14 }
 0x143   : > { %v549_v62 = vmul.f32 0.00390625, %v518_v61  ;;  %631 = vadd.xlane.f32.xlu1 %v630_v50  ;;  %634 = vadd.xlane.f32.xlu0 %v633_v54  ;;  %v521_v63 = vpop.xlane.xlu1 %520  ;;  %v601_v18 = vmul.f32 %v5207_v52, %v5207_v52  ;;  %v602_v19 = vmul.f32 %v5210_v53, %v5210_v53 }
 0x144   : > { %v550_v0 = vmul.f32 0.00390625, %v521_v63  ;;  %v603_v20 = vmul.f32 %v5213_v55, %v5213_v55  ;;  %v604_v21 = vmul.f32 %v5216_v60, %v5216_v60  ;;  %v4411_v63 = vld [vmem:[#allocation6 + $0xa4] ss:$8 sps:$4 sm:$0xff]  }
 0x145   : > { %v5227_v1 = vsub.f32 %v5079_v22, %v549_v62  ;;  %v5230_v2 = vsub.f32 %v5082_v23, %v549_v62  ;;  %v639_v10 = vadd.f32 %v602_v19, %v601_v18  ;;  %v4409_v62 = vld [vmem:[#allocation4 + $0xa4] ss:$8 sps:$4 sm:$0xff]   ;;  %1380 = vmatprep.subr.bf16.mxu1 %v4411_v63  ;;  %v4432_v63 = vld [vmem:[#allocation6 + $0xd0] ss:$8 sps:$4 sm:$0xff]  }
 0x146   : > { %v5233_v17 = vsub.f32 %v5087_v25, %v550_v0  ;;  %v5236_v24 = vsub.f32 %v5090_v26, %v550_v0  ;;  %v524_v27 = vpop.xlane.xlu0 %523  ;;  %v642_v5 = vadd.f32 %v604_v21, %v603_v20  ;;  %v4413_v0 = vld [vmem:[#allocation4 + $0xa0] ss:$8 sps:$4 sm:$0xff]   ;;  %1075 = vmatprep.subr.bf16.mxu0 %v4409_v62  ;;  %v4431_v62 = vld [vmem:[#allocation4 + $0xd0] ss:$8 sps:$4 sm:$0xff]  }
 0x147   : > { %v551_v30 = vmul.f32 0.00390625, %v524_v27  ;;  %637 = vadd.xlane.f32.xlu1 %v636_v3  ;;  %640 = vadd.xlane.f32.xlu0 %v639_v10  ;;  %v527_v33 = vpop.xlane.xlu1 %526  ;;  %v605_v22 = vmul.f32 %v5227_v1, %v5227_v1  ;;  %v606_v23 = vmul.f32 %v5230_v2, %v5230_v2  ;;  %v4414_v20 = vld [vmem:[#allocation6 + $0xa0] ss:$8 sps:$4 sm:$0xff]  }
 0x148   : > { %v552_v8 = vmul.f32 0.00390625, %v527_v33  ;;  %v607_v25 = vmul.f32 %v5233_v17, %v5233_v17  ;;  %v608_v26 = vmul.f32 %v5236_v24, %v5236_v24  ;;  %1076 = vmatpush1.bf16.msra.mxu0 %v4413_v0  ;;  %1381 = vmatpush1.bf16.msra.mxu1 %v4414_v20  ;;  %v4435_v0 = vld [vmem:[#allocation6 + $0xe4] ss:$8 sps:$4 sm:$0xff]   ;;  %v4437_v20 = vld [vmem:[#allocation4 + $0xe0] ss:$8 sps:$4 sm:$0xff]  }
 0x149   : > { %v5247_v48 = vsub.f32 %v5095_v28, %v551_v30  ;;  %v5250_v49 = vsub.f32 %v5098_v29, %v551_v30  ;;  %v645_v50 = vadd.f32 %v606_v23, %v605_v22  ;;  %v4415_v23 = vld [vmem:[#allocation4 + $0xb4] ss:$8 sps:$4 sm:$0xff]   ;;  %1382 = vmatprep.subr.bf16.mxu1 %v4417_v6 }
 0x14a   : > { %v5253_v12 = vsub.f32 %v5103_v31, %v552_v8  ;;  %v5256_v13 = vsub.f32 %v5106_v32, %v552_v8  ;;  %v530_v51 = vpop.xlane.xlu0 %529  ;;  %v648_v15 = vadd.f32 %v608_v26, %v607_v25  ;;  %v4419_v26 = vld [vmem:[#allocation4 + $0xb0] ss:$8 sps:$4 sm:$0xff]   ;;  %1077 = vmatprep.subr.bf16.mxu0 %v4415_v23  ;;  %v750_v23 = vlaneseq }
 0x14b   : > { %v553_v14 = vmul.f32 0.00390625, %v530_v51  ;;  %643 = vadd.xlane.f32.xlu1 %v642_v5  ;;  %646 = vadd.xlane.f32.xlu0 %v645_v50  ;;  %v533_v28 = vpop.xlane.xlu1 %532  ;;  %v609_v29 = vmul.f32 %v5247_v48, %v5247_v48  ;;  %v610_v54 = vmul.f32 %v5250_v49, %v5250_v49 }
 0x14c   : > { %v554_v61 = vmul.f32 0.00390625, %v533_v28  ;;  %v611_v31 = vmul.f32 %v5253_v12, %v5253_v12  ;;  %v612_v32 = vmul.f32 %v5256_v13, %v5256_v13  ;;  %1078 = vmatpush1.bf16.msra.mxu0 %v4419_v26  ;;  %1383 = vmatpush1.bf16.msra.mxu1 %v4420_v42  ;;  %v4423_v28 = vld [vmem:[#allocation6 + $0xc4] ss:$8 sps:$4 sm:$0xff]  }
 0x14d   : > { %v5267_v3 = vsub.f32 %v5111_v34, %v553_v14  ;;  %v5270_v18 = vsub.f32 %v5114_v35, %v553_v14  ;;  %v651_v19 = vadd.f32 %v610_v54, %v609_v29  ;;  %v4425_v29 = vld [vmem:[#allocation4 + $0xc0] ss:$8 sps:$4 sm:$0xff]   ;;  %1384 = vmatprep.subr.bf16.mxu1 %v4423_v28 }
 0x14e   : > { %v5273_v21 = vsub.f32 %v5119_v37, %v554_v61  ;;  %v5276_v10 = vsub.f32 %v5122_v38, %v554_v61  ;;  %v536_v27 = vpop.xlane.xlu0 %535  ;;  %v654_v33 = vadd.f32 %v612_v32, %v611_v31  ;;  %v4426_v54 = vld [vmem:[#allocation6 + $0xc0] ss:$8 sps:$4 sm:$0xff]   ;;  %v4427_v31 = vld [vmem:[#allocation4 + $0xd4] ss:$8 sps:$4 sm:$0xff]  }
 0x14f   : > { %v555_v30 = vmul.f32 0.00390625, %v536_v27  ;;  %649 = vadd.xlane.f32.xlu1 %v648_v15  ;;  %652 = vadd.xlane.f32.xlu0 %v651_v19  ;;  %v539_v34 = vpop.xlane.xlu1 %538  ;;  %v613_v35 = vmul.f32 %v5267_v3, %v5267_v3  ;;  %v614_v5 = vmul.f32 %v5270_v18, %v5270_v18  ;;  %v4429_v32 = vld [vmem:[#allocation6 + $0xd4] ss:$8 sps:$4 sm:$0xff]   ;;  %v4433_v19 = vld [vmem:[#allocation4 + $0xe4] ss:$8 sps:$4 sm:$0xff]  }
 0x150   : > { %v556_v22 = vmul.f32 0.00390625, %v539_v34  ;;  %v615_v37 = vmul.f32 %v5273_v21, %v5273_v21  ;;  %v616_v38 = vmul.f32 %v5276_v10, %v5276_v10  ;;  %1385 = vmatpush1.bf16.msra.mxu1 %v4426_v54  ;;  %v4438_v27 = vld [vmem:[#allocation6 + $0xe0] ss:$8 sps:$4 sm:$0xff]   ;;  %v4441_v34 = vld [vmem:[#allocation6 + $0xf4] ss:$8 sps:$4 sm:$0xff]  }
 0x151   : > { %v5287_v36 = vsub.f32 %v5127_v40, %v555_v30  ;;  %v5290_v8 = vsub.f32 %v5130_v41, %v555_v30  ;;  %v657_v25 = vadd.f32 %v614_v5, %v613_v35  ;;  %1386 = vmatprep.subr.bf16.mxu1 %v4429_v32  ;;  %v4439_v30 = vld [vmem:[#allocation4 + $0xf4] ss:$8 sps:$4 sm:$0xff]   ;;  %v4444_v35 = vld [vmem:[#allocation6 + $0xf0] ss:$8 sps:$4 sm:$0xff]   ;;  %v4447_v5 = vld [vmem:[#allocation7 + $0x4] ss:$8 sps:$4 sm:$0xff]  }
 0x152   : > { %v5293_v47 = vsub.f32 %v5135_v43, %v556_v22  ;;  %v5296_v50 = vsub.f32 %v5138_v44, %v556_v22  ;;  %v660_v51 = vadd.f32 %v616_v38, %v615_v37  ;;  %v4421_v44 = vld [vmem:[#allocation4 + $0xc4] ss:$8 sps:$4 sm:$0xff]  }
 0x153   : > { %655 = vadd.xlane.f32.xlu1 %v654_v33  ;;  %658 = vadd.xlane.f32.xlu0 %v657_v25  ;;  %v617_v40 = vmul.f32 %v5287_v36, %v5287_v36  ;;  %v618_v41 = vmul.f32 %v5290_v8, %v5290_v8  ;;  %v4443_v33 = vld [vmem:[#allocation4 + $0xf0] ss:$8 sps:$4 sm:$0xff]  }
 0x154   : > { %v619_v14 = vmul.f32 %v5293_v47, %v5293_v47  ;;  %v620_v43 = vmul.f32 %v5296_v50, %v5296_v50  ;;  %1079 = vmatprep.subr.bf16.mxu0 %v4421_v44  ;;  %1387 = vmatpush1.bf16.msra.mxu1 %v4432_v63 }
 0x155   : > { %v663_v15 = vadd.f32 %v618_v41, %v617_v40  ;;  %1080 = vmatpush1.bf16.msra.mxu0 %v4425_v29  ;;  %1388 = vmatprep.subr.bf16.mxu1 %v4435_v0  ;;  %v751_v41 = vshrl.u32 %v750_v23, 7 }
 0x156   : > { %v666_v61 = vadd.f32 %v620_v43, %v619_v14  ;;  %1081 = vmatprep.subr.bf16.mxu0 %v4427_v31 }
 0x157   : > { %661 = vadd.xlane.f32.xlu1 %v660_v51  ;;  %664 = vadd.xlane.f32.xlu0 %v663_v15  ;;  %v5306_v54 = vsub.s32 1, %v751_v41 }
 0x158   : > { %1389 = vmatpush1.bf16.msra.mxu1 %v4438_v27  ;;  %v491_v27 = vld [vmem:[%s6633_s2] sm:$0x3] }
 0x159   : > { %1082 = vmatpush1.bf16.msra.mxu0 %v4431_v62  ;;  %1390 = vmatprep.subr.bf16.mxu1 %v4441_v34  ;;  %v490_v62 = vld [vmem:[%s6632_s1] sm:$0x3]  ;;  %v5325_v23 = vrot.slane %v491_v27, %v5306_v54 }
 0x15a   : > { %1083 = vmatprep.subr.bf16.mxu0 %v4433_v19 }
 0x15b   : > { %667 = vadd.xlane.f32.xlu1 %v666_v61  ;;  %v5308_v61 = vsub.s32 0, %v751_v41 }
 0x15c   : > { %1391 = vmatpush1.bf16.msra.mxu1 %v4444_v35 }
 0x15d   : > { %1084 = vmatpush1.bf16.msra.mxu0 %v4437_v20  ;;  %4210 = vmatprep.subr.bf16.mxu1 %v4447_v5  ;;  %v5320_v34 = vrot.slane %v490_v62, %v5308_v61 }
 0x15e   : > { %1085 = vmatprep.subr.bf16.mxu0 %v4439_v30  ;;  %v5317_v30 = vrot.slane %v490_v62, %v5306_v54 }
 0x161   : > { %1086 = vmatpush1.bf16.msra.mxu0 %v4443_v33 }
 0x162   : > { %1677 = vmatprep.subr.bf16.mxu0 %v4447_v5 }
 0x1c8   : > { %v623_v22 = vpop.xlane.xlu0 %622 }
 0x1c9   : > { %v669_v37 = vmul.f32 0.00390625, %v623_v22 }
 0x1cb   : > { %v685_v38 = vadd.f32 1e-05, %v669_v37 }
 0x1cc   : > { %v626_v6 = vpop.xlane.xlu1 %625  ;;  %v629_v25 = vpop.xlane.xlu0 %628 }
 0x1cd   : > { %4493 = vrsqrt.f32 %v685_v38  ;;  %v670_v26 = vmul.f32 0.00390625, %v626_v6  ;;  %v671_v42 = vmul.f32 0.00390625, %v629_v25 }
 0x1cf   : > { %v686_v51 = vadd.f32 1e-05, %v670_v26  ;;  %v687_v40 = vadd.f32 1e-05, %v671_v42 }
 0x1d0   : > { %v632_v14 = vpop.xlane.xlu1 %631  ;;  %v635_v43 = vpop.xlane.xlu0 %634 }
 0x1d1   : > { %4495 = vrsqrt.f32 %v686_v51  ;;  %v672_v44 = vmul.f32 0.00390625, %v632_v14  ;;  %v673_v28 = vmul.f32 0.00390625, %v635_v43  ;;  %v5330_v51 = vrot.slane %v491_v27, %v5308_v61 }
 0x1d2   : > { %4497 = vrsqrt.f32 %v687_v40 }
 0x1d3   : > { %v688_v15 = vadd.f32 1e-05, %v672_v44  ;;  %v689_v29 = vadd.f32 1e-05, %v673_v28 }
 0x1d4   : > { %v638_v31 = vpop.xlane.xlu1 %637  ;;  %v641_v32 = vpop.xlane.xlu0 %640 }
 0x1d5   : > { %4499 = vrsqrt.f32 %v688_v15  ;;  %v674_v63 = vmul.f32 0.00390625, %v638_v31  ;;  %v675_v19 = vmul.f32 0.00390625, %v641_v32 }
 0x1d6   : > { %4501 = vrsqrt.f32 %v689_v29 }
 0x1d7   : > { %v4494_v0 = vpop.eup %4493  ;;  %v690_v20 = vadd.f32 1e-05, %v674_v63  ;;  %v691_v33 = vadd.f32 1e-05, %v675_v19 }
 0x1d8   : > { %v644_v35 = vpop.xlane.xlu1 %643  ;;  %v718_v5 = vmul.f32 %v4494_v0, %v5150_v57  ;;  %v717_v22 = vmul.f32 %v4494_v0, %v5147_v56  ;;  %v647_v38 = vpop.xlane.xlu0 %646 }
 0x1d9   : > { %4503 = vrsqrt.f32 %v690_v20  ;;  %v676_v37 = vmul.f32 0.00390625, %v644_v35  ;;  %v677_v14 = vmul.f32 0.00390625, %v647_v38 }
 0x1da   : > { %v761_v26 = vmul.f32 %v5317_v30, %v718_v5  ;;  %v760_v42 = vmul.f32 %v5320_v34, %v717_v22  ;;  %4505 = vrsqrt.f32 %v691_v33 }
 0x1db   : > { %v4496_v6 = vpop.eup %4495  ;;  %v692_v25 = vadd.f32 1e-05, %v676_v37  ;;  %v693_v27 = vadd.f32 1e-05, %v677_v14  ;;  %v4445_v37 = vld [vmem:[#allocation7] ss:$8 sps:$4 sm:$0xff]  }
 0x1dc   : > { %v4498_v40 = vpop.eup %4497  ;;  %v650_v57 = vpop.xlane.xlu1 %649  ;;  %v720_v56 = vmul.f32 %v4496_v6, %v5170_v4  ;;  %v719_v41 = vmul.f32 %v4496_v6, %v5167_v7  ;;  %v804_v32 = vadd.f32 %v5325_v23, %v761_v26  ;;  %v803_v62 = vadd.f32 %v5330_v51, %v760_v42 }
 0x1dd   : > { %4507 = vrsqrt.f32 %v692_v25  ;;  %v678_v43 = vmul.f32 0.00390625, %v650_v57  ;;  %v722_v44 = vmul.f32 %v4498_v40, %v5156_v59  ;;  %v721_v33 = vmul.f32 %v4498_v40, %v5153_v58  ;;  %v653_v35 = vpop.xlane.xlu0 %652 }
 0x1de   : > { %v763_v28 = vmul.f32 %v5317_v30, %v720_v56  ;;  %v762_v15 = vmul.f32 %v5320_v34, %v719_v41  ;;  %v679_v57 = vmul.f32 0.00390625, %v653_v35 }
 0x1df   : > { %v4500_v29 = vpop.eup %4499  ;;  %v694_v31 = vadd.f32 1e-05, %v678_v43  ;;  %v765_v63 = vmul.f32 %v5317_v30, %v722_v44  ;;  %v764_v56 = vmul.f32 %v5320_v34, %v721_v33  ;;  %v4448_v43 = vld [vmem:[#allocation7 + $0x10] ss:$8 sps:$4 sm:$0xff]  }
 0x1e0   : > { %v656_v4 = vpop.xlane.xlu1 %655  ;;  %v806_v7 = vadd.f32 %v5325_v23, %v763_v28  ;;  %v805_v19 = vadd.f32 %v5330_v51, %v762_v15  ;;  %v724_v0 = vmul.f32 %v4500_v29, %v5176_v16  ;;  %v723_v59 = vmul.f32 %v4500_v29, %v5173_v11  ;;  %v4502_v20 = vpop.eup %4501  ;;  %v4450_v16 = vld [vmem:[#allocation7 + $0x14] ss:$8 sps:$4 sm:$0xff]   ;;  %v4453_v15 = vld [vmem:[#allocation7 + $0x24] ss:$8 sps:$4 sm:$0xff]  }
 0x1e1   : > { %4509 = vrsqrt.f32 %v694_v31  ;;  %v680_v25 = vmul.f32 0.00390625, %v656_v4  ;;  %v808_v26 = vadd.f32 %v5325_v23, %v765_v63  ;;  %v726_v42 = vmul.f32 %v4502_v20, %v5190_v39 }
 0x1e2   : > { %v5345_v5 = vpack.c.bf16 %v806_v7, %v804_v32  ;;  %v5347_v22 = vpack.c.bf16 %v805_v19, %v803_v62  ;;  %v767_v38 = vmul.f32 %v5317_v30, %v724_v0  ;;  %v766_v11 = vmul.f32 %v5320_v34, %v723_v59  ;;  %v659_v19 = vpop.xlane.xlu0 %658 }
 0x1e3   : > { %v4504_v6 = vpop.eup %4503  ;;  %4511 = vrsqrt.f32 %v693_v27  ;;  %v769_v44 = vmul.f32 %v5317_v30, %v726_v42  ;;  %v696_v39 = vadd.f32 1e-05, %v680_v25  ;;  %v695_v62 = vadd.f32 1e-05, %v679_v57  ;;  %v4459_v57 = vld [vmem:[#allocation7 + $0x44] ss:$8 sps:$4 sm:$0xff]  }
 0x1e4   : > { %1087 = vmatprep.mubr.bf16.mxu0 %v5345_v5  ;;  %1392 = vmatprep.mubr.bf16.mxu1 %v5345_v5  ;;  %v810_v58 = vadd.f32 %v5325_v23, %v767_v38  ;;  %v728_v40 = vmul.f32 %v4504_v6, %v5196_v46  ;;  %v4506_v41 = vpop.eup %4505  ;;  %v809_v46 = vadd.f32 %v5330_v51, %v766_v11  ;;  %v662_v31 = vpop.xlane.xlu1 %661  ;;  %v681_v25 = vmul.f32 0.00390625, %v659_v19  ;;  %v4454_v11 = vld [vmem:[#allocation7 + $0x30] ss:$8 sps:$4 sm:$0xff]  }
 0x1e5   : > { %1088 = vmatmul.mubr.bf16.vlgmr.msra.gmra.mrb[0].mxu0 %v5347_v22  ;;  %1393 = vmatmul.mubr.bf16.vlgmr.msra.gmra.mrb[0].mxu1 %v5347_v22  ;;  %v727_v32 = vmul.f32 %v4504_v6, %v5193_v45  ;;  %v807_v63 = vadd.f32 %v5330_v51, %v764_v56  ;;  %v725_v7 = vmul.f32 %v4502_v20, %v5187_v9  ;;  %4513 = vrsqrt.f32 %v696_v39  ;;  %v4451_v45 = vld [vmem:[#allocation7 + $0x20] ss:$8 sps:$4 sm:$0xff]   ;;  %v4456_v9 = vld [vmem:[#allocation7 + $0x34] ss:$8 sps:$4 sm:$0xff]  }
 0x1e6   : > { %1678 = vmatpush1.bf16.msra.mxu0 %v4445_v37  ;;  %4226 = vmatpush1.bf16.msra.mxu1 %v4445_v37  ;;  %v5360_v14 = vpack.c.bf16 %v810_v58, %v808_v26  ;;  %v771_v29 = vmul.f32 %v5317_v30, %v728_v40  ;;  %v812_v0 = vadd.f32 %v5325_v23, %v769_v44  ;;  %v682_v33 = vmul.f32 0.00390625, %v662_v31 }
 0x1e7   : > { %v4508_v28 = vpop.eup %4507  ;;  %1679 = vmatprep.subr.bf16.mxu0 %v4450_v16  ;;  %4211 = vmatprep.subr.bf16.mxu1 %v4450_v16  ;;  %v730_v59 = vmul.f32 %v4506_v41, %v5210_v53  ;;  %v5374_v35 = vpack.c.bf16 %v809_v46, %v807_v63  ;;  %v770_v37 = vmul.f32 %v5320_v34, %v727_v32  ;;  %4515 = vrsqrt.f32 %v695_v62  ;;  %v4457_v32 = vld [vmem:[#allocation7 + $0x40] ss:$8 sps:$4 sm:$0xff]   ;;  %v4462_v63 = vld [vmem:[#allocation7 + $0x54] ss:$8 sps:$4 sm:$0xff]  }
 0x1e8   : > { %1097 = vmatprep.mubr.bf16.mxu0 %v5360_v14  ;;  %1402 = vmatprep.mubr.bf16.mxu1 %v5360_v14  ;;  %v814_v4 = vadd.f32 %v5325_v23, %v771_v29  ;;  %v732_v27 = vmul.f32 %v4508_v28, %v5216_v60  ;;  %v768_v53 = vmul.f32 %v5320_v34, %v725_v7  ;;  %v698_v16 = vadd.f32 1e-05, %v682_v33  ;;  %v668_v40 = vpop.xlane.xlu1 %667 }
 0x1e9   : > { %v773_v60 = vmul.f32 %v5317_v30, %v730_v59  ;;  %v813_v58 = vadd.f32 %v5330_v51, %v770_v37  ;;  %v731_v42 = vmul.f32 %v4508_v28, %v5213_v55  ;;  %v697_v44 = vadd.f32 1e-05, %v681_v25  ;;  %v4460_v59 = vld [vmem:[#allocation7 + $0x50] ss:$8 sps:$4 sm:$0xff]  }
 0x1ea   : > { %1680 = vmatpush1.bf16.msra.mxu0 %v4448_v43  ;;  %4227 = vmatpush1.bf16.msra.mxu1 %v4448_v43  ;;  %v5377_v38 = vpack.c.bf16 %v814_v4, %v812_v0  ;;  %v775_v20 = vmul.f32 %v5317_v30, %v732_v27  ;;  %v811_v39 = vadd.f32 %v5330_v51, %v768_v53  ;;  %4517 = vrsqrt.f32 %v698_v16 }
 0x1eb   : > { %1681 = vmatprep.subr.bf16.mxu0 %v4453_v15  ;;  %4212 = vmatprep.subr.bf16.mxu1 %v4453_v15  ;;  %v4510_v6 = vpop.eup %4509  ;;  %v729_v46 = vmul.f32 %v4506_v41, %v5207_v52  ;;  %v665_v15 = vpop.xlane.xlu0 %664  ;;  %v816_v29 = vadd.f32 %v5325_v23, %v773_v60  ;;  %v684_v55 = vmul.f32 0.00390625, %v668_v40  ;;  %v774_v62 = vmul.f32 %v5320_v34, %v731_v42 }
 0x1ec   : > { %v818_v56 = vadd.f32 %v5325_v23, %v775_v20  ;;  %v736_v43 = vmul.f32 %v4510_v6, %v5236_v24  ;;  %v5394_v28 = vpack.c.bf16 %v813_v58, %v811_v39  ;;  %4519 = vrsqrt.f32 %v697_v44  ;;  %v4468_v58 = vld [vmem:[#allocation7 + $0x74] ss:$8 sps:$4 sm:$0xff]   ;;  %v4471_v44 = vld [vmem:[#allocation7 + $0x84] ss:$8 sps:$4 sm:$0xff]  }
 0x1ed   : > { %1098 = vmatmul.mubr.bf16.gmra.mrb[4].mxu0 %v5374_v35  ;;  %1403 = vmatmul.mubr.bf16.gmra.mrb[4].mxu1 %v5374_v35  ;;  %v4512_v26 = vpop.eup %4511  ;;  %v683_v4 = vmul.f32 0.00390625, %v665_v15  ;;  %v700_v0 = vadd.f32 1e-05, %v684_v55  ;;  %v817_v27 = vadd.f32 %v5330_v51, %v774_v62  ;;  %v735_v33 = vmul.f32 %v4510_v6, %v5233_v17  ;;  %v4463_v6 = vld [vmem:[#allocation7 + $0x60] ss:$8 sps:$4 sm:$0xff]  }
 0x1ee   : > { %1107 = vmatprep.mubr.bf16.mxu0 %v5377_v38  ;;  %1412 = vmatprep.mubr.bf16.mxu1 %v5377_v38  ;;  %v734_v31 = vmul.f32 %v4512_v26, %v5230_v2  ;;  %v5397_v24 = vpack.c.bf16 %v818_v56, %v816_v29  ;;  %v779_v52 = vmul.f32 %v5317_v30, %v736_v43 }
 0x1ef   : > { %1682 = vmatpush1.bf16.msra.mxu0 %v4451_v45  ;;  %4228 = vmatpush1.bf16.msra.mxu1 %v4451_v45  ;;  %v4514_v41 = vpop.eup %4513  ;;  %v772_v2 = vmul.f32 %v5320_v34, %v729_v46  ;;  %v4465_v45 = vld [vmem:[#allocation7 + $0x64] ss:$8 sps:$4 sm:$0xff]   ;;  %v699_v20 = vadd.f32 1e-05, %v683_v4  ;;  %v733_v53 = vmul.f32 %v4512_v26, %v5227_v1  ;;  %4521 = vrsqrt.f32 %v700_v0 }
 0x1f0   : > { %1683 = vmatprep.subr.bf16.mxu0 %v4456_v9  ;;  %4213 = vmatprep.subr.bf16.mxu1 %v4456_v9  ;;  %v777_v7 = vmul.f32 %v5317_v30, %v734_v31  ;;  %v822_v37 = vadd.f32 %v5325_v23, %v779_v52  ;;  %v740_v9 = vmul.f32 %v4514_v41, %v5256_v13  ;;  %v4477_v0 = vld [vmem:[#allocation7 + $0xa4] ss:$8 sps:$4 sm:$0xff]  }
 0x1f1   : > { %v4516_v19 = vpop.eup %4515  ;;  %v815_v25 = vadd.f32 %v5330_v51, %v772_v2  ;;  %4523 = vrsqrt.f32 %v699_v20  ;;  %v739_v43 = vmul.f32 %v4514_v41, %v5253_v12  ;;  %v4469_v12 = vld [vmem:[#allocation7 + $0x80] ss:$8 sps:$4 sm:$0xff]   ;;  %v4472_v2 = vld [vmem:[#allocation7 + $0x90] ss:$8 sps:$4 sm:$0xff]  }
 0x1f2   : > { %v820_v60 = vadd.f32 %v5325_v23, %v777_v7  ;;  %v738_v16 = vmul.f32 %v4516_v19, %v5250_v49  ;;  %v783_v42 = vmul.f32 %v5317_v30, %v740_v9  ;;  %v776_v49 = vmul.f32 %v5320_v34, %v733_v53 }
 0x1f3   : > { %1684 = vmatpush1.bf16.msra.mxu0 %v4454_v11  ;;  %4229 = vmatpush1.bf16.msra.mxu1 %v4454_v11  ;;  %v5414_v17 = vpack.c.bf16 %v817_v27, %v815_v25  ;;  %v778_v11 = vmul.f32 %v5320_v34, %v735_v33  ;;  %v737_v29 = vmul.f32 %v4516_v19, %v5247_v48 }
 0x1f4   : > { %1685 = vmatprep.subr.bf16.mxu0 %v4459_v57  ;;  %4214 = vmatprep.subr.bf16.mxu1 %v4459_v57  ;;  %v5417_v13 = vpack.c.bf16 %v822_v37, %v820_v60  ;;  %v4518_v1 = vpop.eup %4517  ;;  %v781_v26 = vmul.f32 %v5317_v30, %v738_v16  ;;  %v4466_v57 = vld [vmem:[#allocation7 + $0x70] ss:$8 sps:$4 sm:$0xff]   ;;  %v826_v39 = vadd.f32 %v5325_v23, %v783_v42 }
 0x1f5   : > { %1108 = vmatmul.mubr.bf16.gmra.mrb[8].mxu0 %v5394_v28  ;;  %1413 = vmatmul.mubr.bf16.gmra.mrb[8].mxu1 %v5394_v28  ;;  %v821_v56 = vadd.f32 %v5330_v51, %v778_v11  ;;  %v744_v46 = vmul.f32 %v4518_v1, %v5276_v10  ;;  %v819_v15 = vadd.f32 %v5330_v51, %v776_v49  ;;  %v4474_v10 = vld [vmem:[#allocation7 + $0x94] ss:$8 sps:$4 sm:$0xff]   ;;  %v4478_v16 = vld [vmem:[#allocation7 + $0xb0] ss:$8 sps:$4 sm:$0xff]  }
 0x1f6   : > { %1117 = vmatprep.mubr.bf16.mxu0 %v5397_v24  ;;  %1422 = vmatprep.mubr.bf16.mxu1 %v5397_v24  ;;  %v4520_v40 = vpop.eup %4519  ;;  %v824_v31 = vadd.f32 %v5325_v23, %v781_v26  ;;  %v782_v62 = vmul.f32 %v5320_v34, %v739_v43  ;;  %v780_v48 = vmul.f32 %v5320_v34, %v737_v29  ;;  %v4492_v29 = vld [vmem:[#allocation7 + $0xf4] ss:$8 sps:$4 sm:$0xff]  }
 0x1f7   : > { %1686 = vmatpush1.bf16.msra.mxu0 %v4457_v32  ;;  %4230 = vmatpush1.bf16.msra.mxu1 %v4457_v32  ;;  %v742_v55 = vmul.f32 %v4520_v40, %v5270_v18  ;;  %v5434_v32 = vpack.c.bf16 %v821_v56, %v819_v15  ;;  %v787_v52 = vmul.f32 %v5317_v30, %v744_v46  ;;  %v4486_v56 = vld [vmem:[#allocation7 + $0xd4] ss:$8 sps:$4 sm:$0xff]   ;;  %v4487_v15 = vld [vmem:[#allocation7 + $0xe0] ss:$8 sps:$4 sm:$0xff]  }
 0x1f8   : > { %1687 = vmatprep.subr.bf16.mxu0 %v4462_v63  ;;  %4215 = vmatprep.subr.bf16.mxu1 %v4462_v63  ;;  %v5437_v63 = vpack.c.bf16 %v826_v39, %v824_v31  ;;  %v825_v7 = vadd.f32 %v5330_v51, %v782_v62  ;;  %v743_v19 = vmul.f32 %v4518_v1, %v5273_v21  ;;  %v4475_v21 = vld [vmem:[#allocation7 + $0xa0] ss:$8 sps:$4 sm:$0xff]  }
 0x1f9   : > { %v4522_v41 = vpop.eup %4521  ;;  %v785_v18 = vmul.f32 %v5317_v30, %v742_v55  ;;  %v823_v33 = vadd.f32 %v5330_v51, %v780_v48 }
 0x1fa   : > { %v748_v27 = vmul.f32 %v4522_v41, %v5296_v50  ;;  %v786_v25 = vmul.f32 %v5320_v34, %v743_v19  ;;  %v4480_v50 = vld [vmem:[#allocation7 + $0xb4] ss:$8 sps:$4 sm:$0xff]   ;;  %v747_v11 = vmul.f32 %v4522_v41, %v5293_v47 }
 0x1fb   : > { %1688 = vmatpush1.bf16.msra.mxu0 %v4460_v59  ;;  %4231 = vmatpush1.bf16.msra.mxu1 %v4460_v59  ;;  %v4524_v4 = vpop.eup %4523  ;;  %v830_v59 = vadd.f32 %v5325_v23, %v787_v52  ;;  %v828_v37 = vadd.f32 %v5325_v23, %v785_v18  ;;  %v5454_v20 = vpack.c.bf16 %v825_v7, %v823_v33 }
 0x1fc   : > { %1689 = vmatprep.subr.bf16.mxu0 %v4465_v45  ;;  %4216 = vmatprep.subr.bf16.mxu1 %v4465_v45  ;;  %v741_v45 = vmul.f32 %v4520_v40, %v5267_v3  ;;  %v746_v9 = vmul.f32 %v4524_v4, %v5290_v8  ;;  %v791_v60 = vmul.f32 %v5317_v30, %v748_v27  ;;  %v4481_v40 = vld [vmem:[#allocation7 + $0xc0] ss:$8 sps:$4 sm:$0xff]  }
 0x1fd   : > { %1118 = vmatmul.mubr.bf16.gmra.mrb[12].mxu0 %v5414_v17  ;;  %1423 = vmatmul.mubr.bf16.gmra.mrb[12].mxu1 %v5414_v17  ;;  %v5457_v53 = vpack.c.bf16 %v830_v59, %v828_v37  ;;  %v745_v49 = vmul.f32 %v4524_v4, %v5287_v36  ;;  %v4484_v36 = vld [vmem:[#allocation7 + $0xd0] ss:$8 sps:$4 sm:$0xff]  }
 0x1fe   : > { %1127 = vmatprep.mubr.bf16.mxu0 %v5417_v13  ;;  %1432 = vmatprep.mubr.bf16.mxu1 %v5417_v13  ;;  %v784_v3 = vmul.f32 %v5320_v34, %v741_v45  ;;  %v789_v8 = vmul.f32 %v5317_v30, %v746_v9  ;;  %v834_v42 = vadd.f32 %v5325_v23, %v791_v60 }
 0x1ff   : > { %1690 = vmatpush1.bf16.msra.mxu0 %v4463_v6  ;;  %4232 = vmatpush1.bf16.msra.mxu1 %v4463_v6  ;;  %v829_v6 = vadd.f32 %v5330_v51, %v786_v25  ;;  %v788_v43 = vmul.f32 %v5320_v34, %v745_v49 }
 0x200   : > { %1691 = vmatprep.subr.bf16.mxu0 %v4468_v58  ;;  %4217 = vmatprep.subr.bf16.mxu1 %v4468_v58  ;;  %v4483_v58 = vld [vmem:[#allocation7 + $0xc4] ss:$8 sps:$4 sm:$0xff]   ;;  %v827_v1 = vadd.f32 %v5330_v51, %v784_v3  ;;  %v832_v26 = vadd.f32 %v5325_v23, %v789_v8 }
 0x201   : > { %v831_v39 = vadd.f32 %v5330_v51, %v788_v43 }
 0x202   : > { %v847_v30 = vpack.c.bf16 %v829_v6, %v827_v1  ;;  %v850_v47 = vpack.c.bf16 %v834_v42, %v832_v26 }
 0x203   : > { %1692 = vmatpush1.bf16.msra.mxu0 %v4466_v57  ;;  %4233 = vmatpush1.bf16.msra.mxu1 %v4466_v57  ;;  %v790_v57 = vmul.f32 %v5320_v34, %v747_v11  ;;  %v4490_v34 = vld [vmem:[#allocation7 + $0xf0] ss:$8 sps:$4 sm:$0xff]  }
 0x204   : > { %1693 = vmatprep.subr.bf16.mxu0 %v4471_v44  ;;  %4218 = vmatprep.subr.bf16.mxu1 %v4471_v44  ;;  %v4489_v44 = vld [vmem:[#allocation7 + $0xe4] ss:$8 sps:$4 sm:$0xff]  }
 0x205   : > { %1128 = vmatmul.mubr.bf16.gmra.mrb[16].mxu0 %v5434_v32  ;;  %1433 = vmatmul.mubr.bf16.gmra.mrb[16].mxu1 %v5434_v32  ;;  %v833_v23 = vadd.f32 %v5330_v51, %v790_v57  ;;  %v883_v51 = vld [vmem:[%s6635_s4] sm:$0x3] }
 0x206   : > { %1137 = vmatprep.mubr.bf16.mxu0 %v5437_v63  ;;  %1442 = vmatprep.mubr.bf16.mxu1 %v5437_v63 }
 0x207   : > { %1694 = vmatpush1.bf16.msra.mxu0 %v4469_v12  ;;  %4234 = vmatpush1.bf16.msra.mxu1 %v4469_v12  ;;  %v849_v46 = vpack.c.bf16 %v833_v23, %v831_v39 }
 0x208   : > { %1695 = vmatprep.subr.bf16.mxu0 %v4474_v10  ;;  %4219 = vmatprep.subr.bf16.mxu1 %v4474_v10 }
 0x20b   : > { %1696 = vmatpush1.bf16.msra.mxu0 %v4472_v2  ;;  %4235 = vmatpush1.bf16.msra.mxu1 %v4472_v2 }
 0x20c   : > { %1697 = vmatprep.subr.bf16.mxu0 %v4477_v0  ;;  %4220 = vmatprep.subr.bf16.mxu1 %v4477_v0 }
 0x20d   : > { %1138 = vmatmul.mubr.bf16.gmra.mrb[20].mxu0 %v5454_v20  ;;  %1443 = vmatmul.mubr.bf16.gmra.mrb[20].mxu1 %v5454_v20 }
 0x20e   : > { %1147 = vmatprep.mubr.bf16.mxu0 %v5457_v53  ;;  %1452 = vmatprep.mubr.bf16.mxu1 %v5457_v53 }
 0x20f   : > { %1698 = vmatpush1.bf16.msra.mxu0 %v4475_v21  ;;  %4236 = vmatpush1.bf16.msra.mxu1 %v4475_v21 }
 0x210   : > { %1699 = vmatprep.subr.bf16.mxu0 %v4480_v50  ;;  %4221 = vmatprep.subr.bf16.mxu1 %v4480_v50 }
 0x213   : > { %1700 = vmatpush1.bf16.msra.mxu0 %v4478_v16  ;;  %4237 = vmatpush1.bf16.msra.mxu1 %v4478_v16 }
 0x214   : > { %1701 = vmatprep.subr.bf16.mxu0 %v4483_v58  ;;  %4222 = vmatprep.subr.bf16.mxu1 %v4483_v58 }
 0x215   : > { %1148 = vmatmul.mubr.bf16.gmra.mrb[24].mxu0 %v847_v30  ;;  %1453 = vmatmul.mubr.bf16.gmra.mrb[24].mxu1 %v847_v30 }
 0x216   : > { %1157 = vmatprep.mubr.bf16.mxu0 %v850_v47  ;;  %1462 = vmatprep.mubr.bf16.mxu1 %v850_v47 }
 0x217   : > { %1702 = vmatpush1.bf16.msra.mxu0 %v4481_v40  ;;  %4238 = vmatpush1.bf16.msra.mxu1 %v4481_v40 }
 0x218   : > { %1703 = vmatprep.subr.bf16.mxu0 %v4486_v56  ;;  %4223 = vmatprep.subr.bf16.mxu1 %v4486_v56 }
 0x21b   : > { %1704 = vmatpush1.bf16.msra.mxu0 %v4484_v36  ;;  %4239 = vmatpush1.bf16.msra.mxu1 %v4484_v36 }
 0x21c   : > { %1705 = vmatprep.subr.bf16.mxu0 %v4489_v44  ;;  %4224 = vmatprep.subr.bf16.mxu1 %v4489_v44 }
 0x21d   : > { %1158 = vmatmul.mubr.bf16.gmra.mrb[28].mxu0 %v849_v46  ;;  %1463 = vmatmul.mubr.bf16.gmra.mrb[28].mxu1 %v849_v46 }
 0x21e   : > { %1709 = vmatprep.mubr.bf16.mxu0 %v5345_v5  ;;  %1749 = vmatprep.mubr.bf16.mxu1 %v5417_v13  ;;  %v5493_v5 = vrot.slane %v883_v51, %v5308_v61 }
 0x21f   : > { %1706 = vmatpush1.bf16.msra.mxu0 %v4487_v15  ;;  %4240 = vmatpush1.bf16.msra.mxu1 %v4487_v15 }
 0x220   : > { %1707 = vmatprep.subr.bf16.mxu0 %v4492_v29  ;;  %4225 = vmatprep.subr.bf16.mxu1 %v4492_v29 }
 0x223   : > { %1708 = vmatpush1.bf16.msra.mxu0 %v4490_v34  ;;  %4241 = vmatpush1.bf16.msra.mxu1 %v4490_v34 }
 0x226   : > { %1710 = vmatmul.mubr.bf16.vlgmr.msra.gmra.mrb[32].mxu0 %v5347_v22  ;;  %1750 = vmatmul.mubr.bf16.vlgmr.msra.gmra.mrb[32].mxu1 %v5434_v32  ;;  %v5496_v22 = vrot.slane %v883_v51, %v5306_v54 }
 0x227   : > { %1719 = vmatprep.mubr.bf16.mxu0 %v5360_v14  ;;  %1759 = vmatprep.mubr.bf16.mxu1 %v5437_v63 }
 0x22e   : > { %1720 = vmatmul.mubr.bf16.gmra.mrb[36].mxu0 %v5374_v35  ;;  %1760 = vmatmul.mubr.bf16.gmra.mrb[36].mxu1 %v5454_v20 }
 0x22f   : > { %1729 = vmatprep.mubr.bf16.mxu0 %v5377_v38  ;;  %1769 = vmatprep.mubr.bf16.mxu1 %v5457_v53 }
 0x236   : > { %1730 = vmatmul.mubr.bf16.gmra.mrb[40].mxu0 %v5394_v28  ;;  %1770 = vmatmul.mubr.bf16.gmra.mrb[40].mxu1 %v847_v30 }
 0x237   : > { %1739 = vmatprep.mubr.bf16.mxu0 %v5397_v24  ;;  %1779 = vmatprep.mubr.bf16.mxu1 %v850_v47 }
 0x23e   : > { %1740 = vmatmul.mubr.bf16.gmra.mrb[44].mxu0 %v5414_v17  ;;  %1780 = vmatmul.mubr.bf16.gmra.mrb[44].mxu1 %v849_v46 }
 0x2b8   : > { %v1089_v14 = vpop.f32.mrb[0].mxu0  ;;  %v1394_v35 = vpop.f32.mrb[0].mxu1 }
 0x2b9   : > { %v1090_v38 = vadd.f32 %v1089_v14, %v5493_v5  ;;  %v4130_v28 = vpack.c.bf16 %v1394_v35, %v1394_v35  ;;  %v1091_v24 = vpop.f32.mrb[1].mxu0  ;;  %v1396_v17 = vpop.f32.mrb[1].mxu1 }
 0x2ba   : > { %v1092_v13 = vadd.f32 %v1091_v24, %v5496_v22  ;;  %v4178_v31 = vpack.c.bf16 %v1396_v17, %v1396_v17  ;;  %v1093_v55 = vpop.f32.mrb[2].mxu0  ;;  %v1398_v32 = vpop.f32.mrb[2].mxu1 }
 0x2bb   : > { %v4114_v12 = vpack.c.bf16 %v1090_v38, %v1090_v38  ;;  %1935 = vst.msk [vmem:[%s5501_s8] sm:$0xf] %vm1854_vm0, %v4130_v28  ;;  %v1094_v62 = vadd.f32 %v1093_v55, %v5493_v5  ;;  %v4131_v63 = vpack.c.bf16 %v1398_v32, %v1398_v32  ;;  %2096 = vrot.lane.b32.xlu0 %v4130_v28, %s4723_s13  ;;  %v1095_v10 = vpop.f32.mrb[3].mxu0  ;;  %v1400_v52 = vpop.f32.mrb[3].mxu1 }
 0x2bc   : > { %v4162_v41 = vpack.c.bf16 %v1092_v13, %v1092_v13  ;;  %4003 = vst.msk [vmem:[%s5501_s8 + $0x80] sm:$0xf] %vm1854_vm0, %v4178_v31  ;;  %v1096_v48 = vadd.f32 %v1095_v10, %v5496_v22  ;;  %v4179_v18 = vpack.c.bf16 %v1400_v52, %v1400_v52 }
 0x2bd   : > { %1855 = vst.msk [vmem:[%s5511_s21] sm:$0xf] %vm1854_vm0, %v4114_v12  ;;  %v4115_v4 = vpack.c.bf16 %v1094_v62, %v1094_v62  ;;  %1936 = vst.msk [vmem:[%s5501_s8 + $0x4] sm:$0xf] %vm1854_vm0, %v4131_v63  ;;  %2098 = vrot.lane.b32.xlu1 %v4131_v63, %s4723_s13 }
 0x2be   : > { %3971 = vst.msk [vmem:[%s5511_s21 + $0x80] sm:$0xf] %vm1854_vm0, %v4162_v41  ;;  %v4163_v2 = vpack.c.bf16 %v1096_v48, %v1096_v48  ;;  %4004 = vst.msk [vmem:[%s5501_s8 + $0x84] sm:$0xf] %vm1854_vm0, %v4179_v18 }
 0x2bf   : > { %1856 = vst.msk [vmem:[%s5511_s21 + $0x4] sm:$0xf] %vm1854_vm0, %v4115_v4  ;;  %2534 = vrot.lane.b32.xlu0 %v4178_v31, %s4723_s13 }
 0x2c0   : > { %3972 = vst.msk [vmem:[%s5511_s21 + $0x84] sm:$0xf] %vm1854_vm0, %v4163_v2  ;;  %v1099_v7 = vpop.f32.mrb[4].mxu0  ;;  %v1404_v19 = vpop.f32.mrb[4].mxu1 }
 0x2c1   : > { %v1100_v0 = vadd.f32 %v1099_v7, %v5493_v5  ;;  %v4132_v59 = vpack.c.bf16 %v1404_v19, %v1404_v19  ;;  %2536 = vrot.lane.b32.xlu1 %v4179_v18, %s4723_s13  ;;  %v1101_v27 = vpop.f32.mrb[5].mxu0  ;;  %v1406_v33 = vpop.f32.mrb[5].mxu1 }
 0x2c2   : > { %v1102_v45 = vadd.f32 %v1101_v27, %v5496_v22  ;;  %v4180_v37 = vpack.c.bf16 %v1406_v33, %v1406_v33  ;;  %v1103_v9 = vpop.f32.mrb[6].mxu0  ;;  %v1408_v20 = vpop.f32.mrb[6].mxu1 }
 0x2c3   : > { %v4116_v21 = vpack.c.bf16 %v1100_v0, %v1100_v0  ;;  %1937 = vst.msk [vmem:[%s5501_s8 + $0x8] sm:$0xf] %vm1854_vm0, %v4132_v59  ;;  %v1104_v25 = vadd.f32 %v1103_v9, %v5493_v5  ;;  %v4133_v53 = vpack.c.bf16 %v1408_v20, %v1408_v20  ;;  %2031 = vrot.lane.b32.xlu0 %v4114_v12, %s4723_s13  ;;  %v1105_v50 = vpop.f32.mrb[7].mxu0  ;;  %v1410_v60 = vpop.f32.mrb[7].mxu1 }
 0x2c4   : > { %v4164_v3 = vpack.c.bf16 %v1102_v45, %v1102_v45  ;;  %4005 = vst.msk [vmem:[%s5501_s8 + $0x88] sm:$0xf] %vm1854_vm0, %v4180_v37  ;;  %v1106_v8 = vadd.f32 %v1105_v50, %v5496_v22  ;;  %v5537_v16 = vpack.c.bf16 %v1410_v60, %v1410_v60 }
 0x2c5   : > { %1857 = vst.msk [vmem:[%s5511_s21 + $0x8] sm:$0xf] %vm1854_vm0, %v4116_v21  ;;  %v5541_v6 = vpack.c.bf16 %v1104_v25, %v1104_v25  ;;  %1938 = vst.msk [vmem:[%s5501_s8 + $0xc] sm:$0xf] %vm1854_vm0, %v4133_v53  ;;  %2033 = vrot.lane.b32.xlu1 %v4115_v4, %s4723_s13 }
 0x2c6   : > { %3973 = vst.msk [vmem:[%s5511_s21 + $0x88] sm:$0xf] %vm1854_vm0, %v4164_v3  ;;  %v5548_v11 = vpack.c.bf16 %v1106_v8, %v1106_v8  ;;  %4006 = vst.msk [vmem:[%s5501_s8 + $0x8c] sm:$0xf] %vm1854_vm0, %v5537_v16 }
 0x2c7   : > { %1858 = vst.msk [vmem:[%s5511_s21 + $0xc] sm:$0xf] %vm1854_vm0, %v5541_v6  ;;  %2469 = vrot.lane.b32.xlu0 %v4162_v41, %s4723_s13 }
 0x2c8   : > { %3974 = vst.msk [vmem:[%s5511_s21 + $0x8c] sm:$0xf] %vm1854_vm0, %v5548_v11  ;;  %v1109_v58 = vpop.f32.mrb[8].mxu0  ;;  %v1414_v42 = vpop.f32.mrb[8].mxu1 }
 0x2c9   : > { %v1110_v1 = vadd.f32 %v1109_v58, %v5493_v5  ;;  %v4134_v49 = vpack.c.bf16 %v1414_v42, %v1414_v42  ;;  %2471 = vrot.lane.b32.xlu1 %v4163_v2, %s4723_s13  ;;  %v1111_v26 = vpop.f32.mrb[9].mxu0  ;;  %v1416_v30 = vpop.f32.mrb[9].mxu1 }
 0x2ca   : > { %v1112_v40 = vadd.f32 %v1111_v26, %v5496_v22  ;;  %v5563_v57 = vpack.c.bf16 %v1416_v30, %v1416_v30  ;;  %v1113_v47 = vpop.f32.mrb[10].mxu0  ;;  %v1418_v56 = vpop.f32.mrb[10].mxu1 }
 0x2cb   : > { %v5565_v43 = vpack.c.bf16 %v1110_v1, %v1110_v1  ;;  %1939 = vst.msk [vmem:[%s5501_s8 + $0x10] sm:$0xf] %vm1854_vm0, %v4134_v49  ;;  %v1114_v36 = vadd.f32 %v1113_v47, %v5493_v5  ;;  %v5570_v23 = vpack.c.bf16 %v1418_v56, %v1418_v56  ;;  %2100 = vrot.lane.b32.xlu0 %v4132_v59, %s4723_s13  ;;  %v1115_v44 = vpop.f32.mrb[11].mxu0  ;;  %v1420_v39 = vpop.f32.mrb[11].mxu1 }
 0x2cc   : > { %v5573_v46 = vpack.c.bf16 %v1112_v40, %v1112_v40  ;;  %4007 = vst.msk [vmem:[%s5501_s8 + $0x90] sm:$0xf] %vm1854_vm0, %v5563_v57  ;;  %v1116_v15 = vadd.f32 %v1115_v44, %v5496_v22  ;;  %v5579_v29 = vpack.c.bf16 %v1420_v39, %v1420_v39 }
 0x2cd   : > { %1859 = vst.msk [vmem:[%s5511_s21 + $0x10] sm:$0xf] %vm1854_vm0, %v5565_v43  ;;  %v5584_v34 = vpack.c.bf16 %v1114_v36, %v1114_v36  ;;  %1940 = vst.msk [vmem:[%s5501_s8 + $0x14] sm:$0xf] %vm1854_vm0, %v5570_v23  ;;  %2035 = vrot.lane.b32.xlu1 %v4116_v21, %s4723_s13 }
 0x2ce   : > { %3975 = vst.msk [vmem:[%s5511_s21 + $0x90] sm:$0xf] %vm1854_vm0, %v5573_v46  ;;  %v5593_v51 = vpack.c.bf16 %v1116_v15, %v1116_v15  ;;  %4008 = vst.msk [vmem:[%s5501_s8 + $0x94] sm:$0xf] %vm1854_vm0, %v5579_v29 }
 0x2cf   : > { %1860 = vst.msk [vmem:[%s5511_s21 + $0x14] sm:$0xf] %vm1854_vm0, %v5584_v34  ;;  %2538 = vrot.lane.b32.xlu0 %v4180_v37, %s4723_s13 }
 0x2d0   : > { %3976 = vst.msk [vmem:[%s5511_s21 + $0x94] sm:$0xf] %vm1854_vm0, %v5593_v51  ;;  %v1119_v14 = vpop.f32.mrb[12].mxu0  ;;  %v1424_v35 = vpop.f32.mrb[12].mxu1 }
 0x2d1   : > { %v1120_v38 = vadd.f32 %v1119_v14, %v5493_v5  ;;  %v5606_v28 = vpack.c.bf16 %v1424_v35, %v1424_v35  ;;  %2102 = vrot.lane.b32.xlu1 %v4133_v53, %s4723_s13  ;;  %v1121_v24 = vpop.f32.mrb[13].mxu0  ;;  %v1426_v17 = vpop.f32.mrb[13].mxu1 }
 0x2d2   : > { %v1122_v13 = vadd.f32 %v1121_v24, %v5496_v22  ;;  %v5610_v31 = vpack.c.bf16 %v1426_v17, %v1426_v17  ;;  %v1123_v55 = vpop.f32.mrb[14].mxu0  ;;  %v1428_v32 = vpop.f32.mrb[14].mxu1 }
 0x2d3   : > { %v5612_v12 = vpack.c.bf16 %v1120_v38, %v1120_v38  ;;  %1941 = vst.msk [vmem:[%s5501_s8 + $0x18] sm:$0xf] %vm1854_vm0, %v5606_v28  ;;  %v1124_v62 = vadd.f32 %v1123_v55, %v5493_v5  ;;  %v5618_v63 = vpack.c.bf16 %v1428_v32, %v1428_v32  ;;  %2473 = vrot.lane.b32.xlu0 %v4164_v3, %s4723_s13  ;;  %v1125_v10 = vpop.f32.mrb[15].mxu0  ;;  %v1430_v52 = vpop.f32.mrb[15].mxu1 }
 0x2d4   : > { %v5621_v41 = vpack.c.bf16 %v1122_v13, %v1122_v13  ;;  %4009 = vst.msk [vmem:[%s5501_s8 + $0x98] sm:$0xf] %vm1854_vm0, %v5610_v31  ;;  %v1126_v48 = vadd.f32 %v1125_v10, %v5496_v22  ;;  %v5627_v18 = vpack.c.bf16 %v1430_v52, %v1430_v52 }
 0x2d5   : > { %1861 = vst.msk [vmem:[%s5511_s21 + $0x18] sm:$0xf] %vm1854_vm0, %v5612_v12  ;;  %v5632_v4 = vpack.c.bf16 %v1124_v62, %v1124_v62  ;;  %1942 = vst.msk [vmem:[%s5501_s8 + $0x1c] sm:$0xf] %vm1854_vm0, %v5618_v63  ;;  %2540 = vrot.lane.b32.xlu1 %v5537_v16, %s4723_s13 }
 0x2d6   : > { %3977 = vst.msk [vmem:[%s5511_s21 + $0x98] sm:$0xf] %vm1854_vm0, %v5621_v41  ;;  %v5642_v2 = vpack.c.bf16 %v1126_v48, %v1126_v48  ;;  %4010 = vst.msk [vmem:[%s5501_s8 + $0x9c] sm:$0xf] %vm1854_vm0, %v5627_v18 }
 0x2d7   : > { %1862 = vst.msk [vmem:[%s5511_s21 + $0x1c] sm:$0xf] %vm1854_vm0, %v5632_v4  ;;  %2104 = vrot.lane.b32.xlu0 %v4134_v49, %s4723_s13 }
 0x2d8   : > { %3978 = vst.msk [vmem:[%s5511_s21 + $0x9c] sm:$0xf] %vm1854_vm0, %v5642_v2  ;;  %v1129_v7 = vpop.f32.mrb[16].mxu0  ;;  %v1434_v19 = vpop.f32.mrb[16].mxu1 }
 0x2d9   : > { %v1130_v0 = vadd.f32 %v1129_v7, %v5493_v5  ;;  %v5655_v59 = vpack.c.bf16 %v1434_v19, %v1434_v19  ;;  %2037 = vrot.lane.b32.xlu1 %v5541_v6, %s4723_s13  ;;  %v1131_v27 = vpop.f32.mrb[17].mxu0  ;;  %v1436_v33 = vpop.f32.mrb[17].mxu1 }
 0x2da   : > { %v1132_v45 = vadd.f32 %v1131_v27, %v5496_v22  ;;  %v5660_v37 = vpack.c.bf16 %v1436_v33, %v1436_v33  ;;  %v1133_v9 = vpop.f32.mrb[18].mxu0  ;;  %v1438_v20 = vpop.f32.mrb[18].mxu1 }
 0x2db   : > { %v5662_v21 = vpack.c.bf16 %v1130_v0, %v1130_v0  ;;  %1943 = vst.msk [vmem:[%s5501_s8 + $0x20] sm:$0xf] %vm1854_vm0, %v5655_v59  ;;  %v1134_v25 = vadd.f32 %v1133_v9, %v5493_v5  ;;  %v5668_v53 = vpack.c.bf16 %v1438_v20, %v1438_v20  ;;  %2542 = vrot.lane.b32.xlu0 %v5563_v57, %s4723_s13  ;;  %v1135_v50 = vpop.f32.mrb[19].mxu0  ;;  %v1440_v60 = vpop.f32.mrb[19].mxu1 }
 0x2dc   : > { %v5672_v3 = vpack.c.bf16 %v1132_v45, %v1132_v45  ;;  %4011 = vst.msk [vmem:[%s5501_s8 + $0xa0] sm:$0xf] %vm1854_vm0, %v5660_v37  ;;  %v1136_v8 = vadd.f32 %v1135_v50, %v5496_v22  ;;  %v5678_v16 = vpack.c.bf16 %v1440_v60, %v1440_v60 }
 0x2dd   : > { %1863 = vst.msk [vmem:[%s5511_s21 + $0x20] sm:$0xf] %vm1854_vm0, %v5662_v21  ;;  %v5683_v6 = vpack.c.bf16 %v1134_v25, %v1134_v25  ;;  %1944 = vst.msk [vmem:[%s5501_s8 + $0x24] sm:$0xf] %vm1854_vm0, %v5668_v53  ;;  %2475 = vrot.lane.b32.xlu1 %v5548_v11, %s4723_s13 }
 0x2de   : > { %3979 = vst.msk [vmem:[%s5511_s21 + $0xa0] sm:$0xf] %vm1854_vm0, %v5672_v3  ;;  %v5693_v58 = vpack.c.bf16 %v1136_v8, %v1136_v8  ;;  %4012 = vst.msk [vmem:[%s5501_s8 + $0xa4] sm:$0xf] %vm1854_vm0, %v5678_v16 }
 0x2df   : > { %1864 = vst.msk [vmem:[%s5511_s21 + $0x24] sm:$0xf] %vm1854_vm0, %v5683_v6  ;;  %2039 = vrot.lane.b32.xlu0 %v5565_v43, %s4723_s13 }
 0x2e0   : > { %3980 = vst.msk [vmem:[%s5511_s21 + $0xa4] sm:$0xf] %vm1854_vm0, %v5693_v58  ;;  %v1139_v42 = vpop.f32.mrb[20].mxu0  ;;  %v1444_v11 = vpop.f32.mrb[20].mxu1 }
 0x2e1   : > { %v1140_v1 = vadd.f32 %v1139_v42, %v5493_v5  ;;  %v5707_v49 = vpack.c.bf16 %v1444_v11, %v1444_v11  ;;  %2106 = vrot.lane.b32.xlu1 %v5570_v23, %s4723_s13  ;;  %v1141_v26 = vpop.f32.mrb[21].mxu0  ;;  %v1446_v30 = vpop.f32.mrb[21].mxu1 }
 0x2e2   : > { %v1142_v40 = vadd.f32 %v1141_v26, %v5496_v22  ;;  %v5712_v57 = vpack.c.bf16 %v1446_v30, %v1446_v30  ;;  %v1143_v47 = vpop.f32.mrb[22].mxu0  ;;  %v1448_v56 = vpop.f32.mrb[22].mxu1 }
 0x2e3   : > { %v5714_v43 = vpack.c.bf16 %v1140_v1, %v1140_v1  ;;  %1945 = vst.msk [vmem:[%s5501_s8 + $0x28] sm:$0xf] %vm1854_vm0, %v5707_v49  ;;  %v1144_v36 = vadd.f32 %v1143_v47, %v5493_v5  ;;  %v5720_v23 = vpack.c.bf16 %v1448_v56, %v1448_v56  ;;  %2477 = vrot.lane.b32.xlu0 %v5573_v46, %s4723_s13  ;;  %v1145_v44 = vpop.f32.mrb[23].mxu0  ;;  %v1450_v39 = vpop.f32.mrb[23].mxu1  ;;  %v1505_v56 = vld [vmem:[%s6673_s11] sm:$0x3] }
 0x2e4   : > { %v5724_v15 = vpack.c.bf16 %v1142_v40, %v1142_v40  ;;  %4013 = vst.msk [vmem:[%s5501_s8 + $0xa8] sm:$0xf] %vm1854_vm0, %v5712_v57  ;;  %v1146_v14 = vadd.f32 %v1145_v44, %v5496_v22  ;;  %v5730_v35 = vpack.c.bf16 %v1450_v39, %v1450_v39 }
 0x2e5   : > { %1865 = vst.msk [vmem:[%s5511_s21 + $0x28] sm:$0xf] %vm1854_vm0, %v5714_v43  ;;  %v5735_v38 = vpack.c.bf16 %v1144_v36, %v1144_v36  ;;  %1946 = vst.msk [vmem:[%s5501_s8 + $0x2c] sm:$0xf] %vm1854_vm0, %v5720_v23  ;;  %2544 = vrot.lane.b32.xlu1 %v5579_v29, %s4723_s13 }
 0x2e6   : > { %3981 = vst.msk [vmem:[%s5511_s21 + $0xa8] sm:$0xf] %vm1854_vm0, %v5724_v15  ;;  %v5745_v46 = vpack.c.bf16 %v1146_v14, %v1146_v14  ;;  %4014 = vst.msk [vmem:[%s5501_s8 + $0xac] sm:$0xf] %vm1854_vm0, %v5730_v35  ;;  %v5866_v14 = vrot.slane %v1505_v56, %v5306_v54 }
 0x2e7   : > { %1866 = vst.msk [vmem:[%s5511_s21 + $0x2c] sm:$0xf] %vm1854_vm0, %v5735_v38  ;;  %2108 = vrot.lane.b32.xlu0 %v5606_v28, %s4723_s13 }
 0x2e8   : > { %3982 = vst.msk [vmem:[%s5511_s21 + $0xac] sm:$0xf] %vm1854_vm0, %v5745_v46  ;;  %v1149_v24 = vpop.f32.mrb[24].mxu0  ;;  %v1454_v29 = vpop.f32.mrb[24].mxu1 }
 0x2e9   : > { %v1150_v17 = vadd.f32 %v1149_v24, %v5493_v5  ;;  %v5759_v13 = vpack.c.bf16 %v1454_v29, %v1454_v29  ;;  %2041 = vrot.lane.b32.xlu1 %v5584_v34, %s4723_s13  ;;  %v1151_v55 = vpop.f32.mrb[25].mxu0  ;;  %v1456_v32 = vpop.f32.mrb[25].mxu1 }
 0x2ea   : > { %v1152_v62 = vadd.f32 %v1151_v55, %v5496_v22  ;;  %v5764_v10 = vpack.c.bf16 %v1456_v32, %v1456_v32  ;;  %v1153_v28 = vpop.f32.mrb[26].mxu0  ;;  %v1458_v52 = vpop.f32.mrb[26].mxu1 }
 0x2eb   : > { %v5766_v48 = vpack.c.bf16 %v1150_v17, %v1150_v17  ;;  %1947 = vst.msk [vmem:[%s5501_s8 + $0x30] sm:$0xf] %vm1854_vm0, %v5759_v13  ;;  %v1154_v7 = vadd.f32 %v1153_v28, %v5493_v5  ;;  %v5772_v34 = vpack.c.bf16 %v1458_v52, %v1458_v52  ;;  %2546 = vrot.lane.b32.xlu0 %v5610_v31, %s4723_s13  ;;  %v1155_v19 = vpop.f32.mrb[27].mxu0  ;;  %v1460_v0 = vpop.f32.mrb[27].mxu1 }
 0x2ec   : > { %v5776_v27 = vpack.c.bf16 %v1152_v62, %v1152_v62  ;;  %4015 = vst.msk [vmem:[%s5501_s8 + $0xb0] sm:$0xf] %vm1854_vm0, %v5764_v10  ;;  %v1156_v33 = vadd.f32 %v1155_v19, %v5496_v22  ;;  %v5782_v45 = vpack.c.bf16 %v1460_v0, %v1460_v0 }
 0x2ed   : > { %1867 = vst.msk [vmem:[%s5511_s21 + $0x30] sm:$0xf] %vm1854_vm0, %v5766_v48  ;;  %v5787_v9 = vpack.c.bf16 %v1154_v7, %v1154_v7  ;;  %1948 = vst.msk [vmem:[%s5501_s8 + $0x34] sm:$0xf] %vm1854_vm0, %v5772_v34  ;;  %2479 = vrot.lane.b32.xlu1 %v5593_v51, %s4723_s13 }
 0x2ee   : > { %3983 = vst.msk [vmem:[%s5511_s21 + $0xb0] sm:$0xf] %vm1854_vm0, %v5776_v27  ;;  %v5797_v31 = vpack.c.bf16 %v1156_v33, %v1156_v33  ;;  %4016 = vst.msk [vmem:[%s5501_s8 + $0xb4] sm:$0xf] %vm1854_vm0, %v5782_v45 }
 0x2ef   : > { %1868 = vst.msk [vmem:[%s5511_s21 + $0x34] sm:$0xf] %vm1854_vm0, %v5787_v9  ;;  %2043 = vrot.lane.b32.xlu0 %v5612_v12, %s4723_s13 }
 0x2f0   : > { %3984 = vst.msk [vmem:[%s5511_s21 + $0xb4] sm:$0xf] %vm1854_vm0, %v5797_v31  ;;  %v1159_v20 = vpop.f32.mrb[28].mxu0  ;;  %v1464_v51 = vpop.f32.mrb[28].mxu1 }
 0x2f1   : > { %v1160_v25 = vadd.f32 %v1159_v20, %v5493_v5  ;;  %v5811_v50 = vpack.c.bf16 %v1464_v51, %v1464_v51  ;;  %2110 = vrot.lane.b32.xlu1 %v5618_v63, %s4723_s13  ;;  %v1161_v60 = vpop.f32.mrb[29].mxu0  ;;  %v1466_v8 = vpop.f32.mrb[29].mxu1 }
 0x2f2   : > { %v1162_v42 = vadd.f32 %v1161_v60, %v5496_v22  ;;  %v5816_v11 = vpack.c.bf16 %v1466_v8, %v1466_v8  ;;  %v1163_v12 = vpop.f32.mrb[30].mxu0  ;;  %v1468_v1 = vpop.f32.mrb[30].mxu1 }
 0x2f3   : > { %v5818_v26 = vpack.c.bf16 %v1160_v25, %v1160_v25  ;;  %1949 = vst.msk [vmem:[%s5501_s8 + $0x38] sm:$0xf] %vm1854_vm0, %v5811_v50  ;;  %v1164_v30 = vadd.f32 %v1163_v12, %v5493_v5  ;;  %v5824_v63 = vpack.c.bf16 %v1468_v1, %v1468_v1  ;;  %2481 = vrot.lane.b32.xlu0 %v5621_v41, %s4723_s13  ;;  %v1165_v40 = vpop.f32.mrb[31].mxu0  ;;  %v1470_v47 = vpop.f32.mrb[31].mxu1 }
 0x2f4   : > { %v5831_v36 = vpack.c.bf16 %v1162_v42, %v1162_v42  ;;  %4017 = vst.msk [vmem:[%s5501_s8 + $0xb8] sm:$0xf] %vm1854_vm0, %v5816_v11  ;;  %v1166_v5 = vadd.f32 %v1165_v40, %v5496_v22  ;;  %v5837_v44 = vpack.c.bf16 %v1470_v47, %v1470_v47  ;;  %v5858_v22 = vrot.slane %v1505_v56, %v5308_v61 }
 0x2f5   : > { %1869 = vst.msk [vmem:[%s5511_s21 + $0x38] sm:$0xf] %vm1854_vm0, %v5818_v26  ;;  %v5842_v41 = vpack.c.bf16 %v1164_v30, %v1164_v30  ;;  %1950 = vst.msk [vmem:[%s5501_s8 + $0x3c] sm:$0xf] %vm1854_vm0, %v5824_v63  ;;  %2548 = vrot.lane.b32.xlu1 %v5627_v18, %s4723_s13 }
 0x2f6   : > { %3985 = vst.msk [vmem:[%s5511_s21 + $0xb8] sm:$0xf] %vm1854_vm0, %v5831_v36  ;;  %v5852_v39 = vpack.c.bf16 %v1166_v5, %v1166_v5  ;;  %4018 = vst.msk [vmem:[%s5501_s8 + $0xbc] sm:$0xf] %vm1854_vm0, %v5837_v44 }
 0x2f7   : > { %1870 = vst.msk [vmem:[%s5511_s21 + $0x3c] sm:$0xf] %vm1854_vm0, %v5842_v41  ;;  %2112 = vrot.lane.b32.xlu0 %v5655_v59, %s4723_s13 }
 0x2f8   : > { %3986 = vst.msk [vmem:[%s5511_s21 + $0xbc] sm:$0xf] %vm1854_vm0, %v5852_v39 }
 0x2f9   : > { %v1711_v18 = vpop.f32.mrb[32].mxu0  ;;  %v1751_v24 = vpop.f32.mrb[32].mxu1  ;;  %2045 = vrot.lane.b32.xlu1 %v5632_v4, %s4723_s13 }
 0x2fa   : > { %v1712_v61 = vadd.f32 %v1711_v18, %v5858_v22  ;;  %v1752_v29 = vadd.f32 %v1751_v24, %v5858_v22  ;;  %v1713_v17 = vpop.f32.mrb[33].mxu0  ;;  %v1753_v55 = vpop.f32.mrb[33].mxu1 }
 0x2fb   : > { %v1714_v32 = vadd.f32 %v1713_v17, %v5866_v14  ;;  %v1754_v54 = vadd.f32 %v1753_v55, %v5866_v14  ;;  %v1715_v59 = vpop.f32.mrb[34].mxu0  ;;  %v1755_v62 = vpop.f32.mrb[34].mxu1  ;;  %2550 = vrot.lane.b32.xlu0 %v5660_v37, %s4723_s13 }
 0x2fc   : > { %v5879_v28 = vpack.c.bf16 %v1712_v61, %v1712_v61  ;;  %v5881_v52 = vpack.c.bf16 %v1752_v29, %v1752_v29  ;;  %v1716_v4 = vadd.f32 %v1715_v59, %v5858_v22  ;;  %v1756_v7 = vadd.f32 %v1755_v62, %v5858_v22  ;;  %v1717_v19 = vpop.f32.mrb[35].mxu0  ;;  %v1757_v0 = vpop.f32.mrb[35].mxu1 }
 0x2fd   : > { %v5885_v33 = vpack.c.bf16 %v1714_v32, %v1714_v32  ;;  %v5887_v20 = vpack.c.bf16 %v1754_v54, %v1754_v54  ;;  %v1718_v51 = vadd.f32 %v1717_v19, %v5866_v14  ;;  %v1758_v25 = vadd.f32 %v1757_v0, %v5866_v14  ;;  %2483 = vrot.lane.b32.xlu1 %v5642_v2, %s4723_s13 }
 0x2fe   : > { %2015 = vst.msk [vmem:[%s5894_s27] sm:$0xf] %vm1854_vm0, %v5879_v28  ;;  %2023 = vst.msk [vmem:[%s5894_s27 + $0x20] sm:$0xf] %vm1854_vm0, %v5881_v52  ;;  %v5902_v37 = vpack.c.bf16 %v1716_v4, %v1716_v4  ;;  %v5904_v60 = vpack.c.bf16 %v1756_v7, %v1756_v7 }
 0x2ff   : > { %4035 = vst.msk [vmem:[%s5894_s27 + $0x80] sm:$0xf] %vm1854_vm0, %v5885_v33  ;;  %4043 = vst.msk [vmem:[%s5894_s27 + $0xa0] sm:$0xf] %vm1854_vm0, %v5887_v20  ;;  %v5912_v2 = vpack.c.bf16 %v1718_v51, %v1718_v51  ;;  %v5914_v8 = vpack.c.bf16 %v1758_v25, %v1758_v25  ;;  %2047 = vrot.lane.b32.xlu0 %v5662_v21, %s4723_s13 }
 0x300   : > { %2016 = vst.msk [vmem:[%s5894_s27 + $0x4] sm:$0xf] %vm1854_vm0, %v5902_v37  ;;  %2024 = vst.msk [vmem:[%s5894_s27 + $0x24] sm:$0xf] %vm1854_vm0, %v5904_v60 }
 0x301   : > { %4036 = vst.msk [vmem:[%s5894_s27 + $0x84] sm:$0xf] %vm1854_vm0, %v5912_v2  ;;  %4044 = vst.msk [vmem:[%s5894_s27 + $0xa4] sm:$0xf] %vm1854_vm0, %v5914_v8  ;;  %v1721_v42 = vpop.f32.mrb[36].mxu0  ;;  %v1761_v12 = vpop.f32.mrb[36].mxu1  ;;  %2114 = vrot.lane.b32.xlu1 %v5668_v53, %s4723_s13 }
 0x302   : > { %v1722_v1 = vadd.f32 %v1721_v42, %v5858_v22  ;;  %v1762_v21 = vadd.f32 %v1761_v12, %v5858_v22  ;;  %v1723_v30 = vpop.f32.mrb[37].mxu0  ;;  %v1763_v40 = vpop.f32.mrb[37].mxu1 }
 0x303   : > { %v1724_v47 = vadd.f32 %v1723_v30, %v5866_v14  ;;  %v1764_v56 = vadd.f32 %v1763_v40, %v5866_v14  ;;  %v1725_v5 = vpop.f32.mrb[38].mxu0  ;;  %v1765_v18 = vpop.f32.mrb[38].mxu1  ;;  %2485 = vrot.lane.b32.xlu0 %v5672_v3, %s4723_s13 }
 0x304   : > { %v5938_v24 = vpack.c.bf16 %v1722_v1, %v1722_v1  ;;  %v5940_v53 = vpack.c.bf16 %v1762_v21, %v1762_v21  ;;  %v1726_v61 = vadd.f32 %v1725_v5, %v5858_v22  ;;  %v1766_v29 = vadd.f32 %v1765_v18, %v5858_v22  ;;  %v1727_v17 = vpop.f32.mrb[39].mxu0  ;;  %v1767_v55 = vpop.f32.mrb[39].mxu1 }
 0x305   : > { %v5944_v32 = vpack.c.bf16 %v1724_v47, %v1724_v47  ;;  %v5946_v54 = vpack.c.bf16 %v1764_v56, %v1764_v56  ;;  %v1728_v3 = vadd.f32 %v1727_v17, %v5866_v14  ;;  %v1768_v59 = vadd.f32 %v1767_v55, %v5866_v14  ;;  %2552 = vrot.lane.b32.xlu1 %v5678_v16, %s4723_s13 }
 0x306   : > { %2017 = vst.msk [vmem:[%s5894_s27 + $0x8] sm:$0xf] %vm1854_vm0, %v5938_v24  ;;  %2025 = vst.msk [vmem:[%s5894_s27 + $0x28] sm:$0xf] %vm1854_vm0, %v5940_v53  ;;  %v5958_v62 = vpack.c.bf16 %v1726_v61, %v1726_v61  ;;  %v5960_v4 = vpack.c.bf16 %v1766_v29, %v1766_v29 }
 0x307   : > { %4037 = vst.msk [vmem:[%s5894_s27 + $0x88] sm:$0xf] %vm1854_vm0, %v5944_v32  ;;  %4045 = vst.msk [vmem:[%s5894_s27 + $0xa8] sm:$0xf] %vm1854_vm0, %v5946_v54  ;;  %v5968_v7 = vpack.c.bf16 %v1728_v3, %v1728_v3  ;;  %v5970_v19 = vpack.c.bf16 %v1768_v59, %v1768_v59  ;;  %2116 = vrot.lane.b32.xlu0 %v5707_v49, %s4723_s13 }
 0x308   : > { %2018 = vst.msk [vmem:[%s5894_s27 + $0xc] sm:$0xf] %vm1854_vm0, %v5958_v62  ;;  %2026 = vst.msk [vmem:[%s5894_s27 + $0x2c] sm:$0xf] %vm1854_vm0, %v5960_v4 }
 0x309   : > { %4038 = vst.msk [vmem:[%s5894_s27 + $0x8c] sm:$0xf] %vm1854_vm0, %v5968_v7  ;;  %4046 = vst.msk [vmem:[%s5894_s27 + $0xac] sm:$0xf] %vm1854_vm0, %v5970_v19  ;;  %v1731_v16 = vpop.f32.mrb[40].mxu0  ;;  %v1771_v0 = vpop.f32.mrb[40].mxu1  ;;  %2049 = vrot.lane.b32.xlu1 %v5683_v6, %s4723_s13 }
 0x30a   : > { %v1732_v51 = vadd.f32 %v1731_v16, %v5858_v22  ;;  %v1772_v49 = vadd.f32 %v1771_v0, %v5858_v22  ;;  %v1733_v25 = vpop.f32.mrb[41].mxu0  ;;  %v1773_v42 = vpop.f32.mrb[41].mxu1 }
 0x30b   : > { %v1734_v12 = vadd.f32 %v1733_v25, %v5866_v14  ;;  %v1774_v1 = vadd.f32 %v1773_v42, %v5866_v14  ;;  %v1735_v21 = vpop.f32.mrb[42].mxu0  ;;  %v1775_v30 = vpop.f32.mrb[42].mxu1  ;;  %2554 = vrot.lane.b32.xlu0 %v5712_v57, %s4723_s13 }
 0x30c   : > { %v5994_v40 = vpack.c.bf16 %v1732_v51, %v1732_v51  ;;  %v5996_v6 = vpack.c.bf16 %v1772_v49, %v1772_v49  ;;  %v1736_v47 = vadd.f32 %v1735_v21, %v5858_v22  ;;  %v1776_v56 = vadd.f32 %v1775_v30, %v5858_v22  ;;  %v1737_v5 = vpop.f32.mrb[43].mxu0  ;;  %v1777_v18 = vpop.f32.mrb[43].mxu1 }
 0x30d   : > { %v6000_v61 = vpack.c.bf16 %v1734_v12, %v1734_v12  ;;  %v6002_v29 = vpack.c.bf16 %v1774_v1, %v1774_v1  ;;  %v1738_v57 = vadd.f32 %v1737_v5, %v5866_v14  ;;  %v1778_v17 = vadd.f32 %v1777_v18, %v5866_v14  ;;  %2487 = vrot.lane.b32.xlu1 %v5693_v58, %s4723_s13 }
 0x30e   : > { %2019 = vst.msk [vmem:[%s5894_s27 + $0x10] sm:$0xf] %vm1854_vm0, %v5994_v40  ;;  %2027 = vst.msk [vmem:[%s5894_s27 + $0x30] sm:$0xf] %vm1854_vm0, %v5996_v6  ;;  %v6014_v55 = vpack.c.bf16 %v1736_v47, %v1736_v47  ;;  %v6016_v3 = vpack.c.bf16 %v1776_v56, %v1776_v56 }
 0x30f   : > { %4039 = vst.msk [vmem:[%s5894_s27 + $0x90] sm:$0xf] %vm1854_vm0, %v6000_v61  ;;  %4047 = vst.msk [vmem:[%s5894_s27 + $0xb0] sm:$0xf] %vm1854_vm0, %v6002_v29  ;;  %v6024_v59 = vpack.c.bf16 %v1738_v57, %v1738_v57  ;;  %v6026_v16 = vpack.c.bf16 %v1778_v17, %v1778_v17  ;;  %2051 = vrot.lane.b32.xlu0 %v5714_v43, %s4723_s13 }
 0x310   : > { %2020 = vst.msk [vmem:[%s5894_s27 + $0x14] sm:$0xf] %vm1854_vm0, %v6014_v55  ;;  %2028 = vst.msk [vmem:[%s5894_s27 + $0x34] sm:$0xf] %vm1854_vm0, %v6016_v3 }
 0x311   : > { %4040 = vst.msk [vmem:[%s5894_s27 + $0x94] sm:$0xf] %vm1854_vm0, %v6024_v59  ;;  %4048 = vst.msk [vmem:[%s5894_s27 + $0xb4] sm:$0xf] %vm1854_vm0, %v6026_v16  ;;  %v1741_v58 = vpop.f32.mrb[44].mxu0  ;;  %v1781_v0 = vpop.f32.mrb[44].mxu1  ;;  %2118 = vrot.lane.b32.xlu1 %v5720_v23, %s4723_s13 }
 0x312   : > { %v1742_v51 = vadd.f32 %v1741_v58, %v5858_v22  ;;  %v1782_v43 = vadd.f32 %v1781_v0, %v5858_v22  ;;  %v1743_v49 = vpop.f32.mrb[45].mxu0  ;;  %v1783_v25 = vpop.f32.mrb[45].mxu1 }
 0x313   : > { %v1744_v42 = vadd.f32 %v1743_v49, %v5866_v14  ;;  %v1784_v12 = vadd.f32 %v1783_v25, %v5866_v14  ;;  %v1745_v1 = vpop.f32.mrb[46].mxu0  ;;  %v1785_v21 = vpop.f32.mrb[46].mxu1  ;;  %2489 = vrot.lane.b32.xlu0 %v5724_v15, %s4723_s13 }
 0x314   : > { %v6050_v30 = vpack.c.bf16 %v1742_v51, %v1742_v51  ;;  %v6052_v23 = vpack.c.bf16 %v1782_v43, %v1782_v43  ;;  %v1746_v47 = vadd.f32 %v1745_v1, %v5858_v22  ;;  %v1786_v56 = vadd.f32 %v1785_v21, %v5858_v22  ;;  %v1747_v5 = vpop.f32.mrb[47].mxu0  ;;  %v1787_v18 = vpop.f32.mrb[47].mxu1 }
 0x315   : > { %v6056_v57 = vpack.c.bf16 %v1744_v42, %v1744_v42  ;;  %v6058_v17 = vpack.c.bf16 %v1784_v12, %v1784_v12  ;;  %v1748_v15 = vadd.f32 %v1747_v5, %v5866_v14  ;;  %v1788_v58 = vadd.f32 %v1787_v18, %v5866_v14  ;;  %2556 = vrot.lane.b32.xlu1 %v5730_v35, %s4723_s13 }
 0x316   : > { %2021 = vst.msk [vmem:[%s5894_s27 + $0x18] sm:$0xf] %vm1854_vm0, %v6050_v30  ;;  %2029 = vst.msk [vmem:[%s5894_s27 + $0x38] sm:$0xf] %vm1854_vm0, %v6052_v23  ;;  %v6070_v22 = vpack.c.bf16 %v1746_v47, %v1746_v47  ;;  %v6072_v0 = vpack.c.bf16 %v1786_v56, %v1786_v56 }
 0x317   : > { %4041 = vst.msk [vmem:[%s5894_s27 + $0x98] sm:$0xf] %vm1854_vm0, %v6056_v57  ;;  %4049 = vst.msk [vmem:[%s5894_s27 + $0xb8] sm:$0xf] %vm1854_vm0, %v6058_v17  ;;  %v6080_v14 = vpack.c.bf16 %v1748_v15, %v1748_v15  ;;  %v6082_v51 = vpack.c.bf16 %v1788_v58, %v1788_v58  ;;  %2120 = vrot.lane.b32.xlu0 %v5759_v13, %s4723_s13 }
 0x318   : > { %2022 = vst.msk [vmem:[%s5894_s27 + $0x1c] sm:$0xf] %vm1854_vm0, %v6070_v22  ;;  %2030 = vst.msk [vmem:[%s5894_s27 + $0x3c] sm:$0xf] %vm1854_vm0, %v6072_v0 }
 0x319   : > { %4042 = vst.msk [vmem:[%s5894_s27 + $0x9c] sm:$0xf] %vm1854_vm0, %v6080_v14  ;;  %4050 = vst.msk [vmem:[%s5894_s27 + $0xbc] sm:$0xf] %vm1854_vm0, %v6082_v51  ;;  %2053 = vrot.lane.b32.xlu1 %v5735_v38, %s4723_s13 }
 0x31b   : > { %2558 = vrot.lane.b32.xlu0 %v5764_v10, %s4723_s13 }
 0x31d   : > { %2491 = vrot.lane.b32.xlu1 %v5745_v46, %s4723_s13 }
 0x31f   : > { %2055 = vrot.lane.b32.xlu0 %v5766_v48, %s4723_s13 }
 0x321   : > { %2122 = vrot.lane.b32.xlu1 %v5772_v34, %s4723_s13 }
 0x323   : > { %2493 = vrot.lane.b32.xlu0 %v5776_v27, %s4723_s13 }
 0x325   : > { %2560 = vrot.lane.b32.xlu1 %v5782_v45, %s4723_s13 }
 0x327   : > { %2124 = vrot.lane.b32.xlu0 %v5811_v50, %s4723_s13 }
 0x329   : > { %2057 = vrot.lane.b32.xlu1 %v5787_v9, %s4723_s13 }
 0x32b   : > { %2562 = vrot.lane.b32.xlu0 %v5816_v11, %s4723_s13 }
 0x32d   : > { %2495 = vrot.lane.b32.xlu1 %v5797_v31, %s4723_s13  ;;  %v2097_v35 = vpop.permute.xlu0 %2096 }
 0x32e   : > { %3923 = vst.msk [vmem:[%s5501_s8 + $0x40] sm:$0xf] %vm1854_vm0, %v2097_v35 }
 0x32f   : > { %v2099_v38 = vpop.permute.xlu1 %2098  ;;  %2059 = vrot.lane.b32.xlu0 %v5818_v26, %s4723_s13 }
 0x330   : > { %3924 = vst.msk [vmem:[%s5501_s8 + $0x44] sm:$0xf] %vm1854_vm0, %v2099_v38 }
 0x331   : > { %2126 = vrot.lane.b32.xlu1 %v5824_v63, %s4723_s13  ;;  %v2535_v46 = vpop.permute.xlu0 %2534 }
 0x332   : > { %4067 = vst.msk [vmem:[%s5501_s8 + $0xc0] sm:$0xf] %vm1854_vm0, %v2535_v46 }
 0x333   : > { %v2537_v13 = vpop.permute.xlu1 %2536  ;;  %2497 = vrot.lane.b32.xlu0 %v5831_v36, %s4723_s13 }
 0x334   : > { %4068 = vst.msk [vmem:[%s5501_s8 + $0xc4] sm:$0xf] %vm1854_vm0, %v2537_v13 }
 0x335   : > { %2564 = vrot.lane.b32.xlu1 %v5837_v44, %s4723_s13  ;;  %v2032_v10 = vpop.permute.xlu0 %2031 }
 0x336   : > { %3907 = vst.msk [vmem:[%s5511_s21 + $0x40] sm:$0xf] %vm1854_vm0, %v2032_v10 }
 0x337   : > { %v2034_v48 = vpop.permute.xlu1 %2033  ;;  %2161 = vrot.lane.b32.xlu0 %v5879_v28, %s4723_s13 }
 0x338   : > { %3908 = vst.msk [vmem:[%s5511_s21 + $0x44] sm:$0xf] %vm1854_vm0, %v2034_v48 }
 0x339   : > { %2061 = vrot.lane.b32.xlu1 %v5842_v41, %s4723_s13  ;;  %v2470_v34 = vpop.permute.xlu0 %2469 }
 0x33a   : > { %4051 = vst.msk [vmem:[%s5511_s21 + $0xc0] sm:$0xf] %vm1854_vm0, %v2470_v34 }
 0x33b   : > { %v2472_v27 = vpop.permute.xlu1 %2471  ;;  %2177 = vrot.lane.b32.xlu0 %v5881_v52, %s4723_s13 }
 0x33c   : > { %4052 = vst.msk [vmem:[%s5511_s21 + $0xc4] sm:$0xf] %vm1854_vm0, %v2472_v27 }
 0x33d   : > { %2499 = vrot.lane.b32.xlu1 %v5852_v39, %s4723_s13  ;;  %v2101_v45 = vpop.permute.xlu0 %2100 }
 0x33e   : > { %3925 = vst.msk [vmem:[%s5501_s8 + $0x48] sm:$0xf] %vm1854_vm0, %v2101_v45 }
 0x33f   : > { %v2036_v9 = vpop.permute.xlu1 %2035  ;;  %2599 = vrot.lane.b32.xlu0 %v5885_v33, %s4723_s13 }
 0x340   : > { %3909 = vst.msk [vmem:[%s5511_s21 + $0x48] sm:$0xf] %vm1854_vm0, %v2036_v9 }
 0x341   : > { %2163 = vrot.lane.b32.xlu1 %v5902_v37, %s4723_s13  ;;  %v2539_v31 = vpop.permute.xlu0 %2538 }
 0x342   : > { %4069 = vst.msk [vmem:[%s5501_s8 + $0xc8] sm:$0xf] %vm1854_vm0, %v2539_v31 }
 0x343   : > { %v2103_v50 = vpop.permute.xlu1 %2102  ;;  %2615 = vrot.lane.b32.xlu0 %v5887_v20, %s4723_s13 }
 0x344   : > { %3926 = vst.msk [vmem:[%s5501_s8 + $0x4c] sm:$0xf] %vm1854_vm0, %v2103_v50 }
 0x345   : > { %2179 = vrot.lane.b32.xlu1 %v5904_v60, %s4723_s13  ;;  %v2474_v11 = vpop.permute.xlu0 %2473 }
 0x346   : > { %4053 = vst.msk [vmem:[%s5511_s21 + $0xc8] sm:$0xf] %vm1854_vm0, %v2474_v11 }
 0x347   : > { %v2541_v26 = vpop.permute.xlu1 %2540  ;;  %2165 = vrot.lane.b32.xlu0 %v5938_v24, %s4723_s13 }
 0x348   : > { %4070 = vst.msk [vmem:[%s5501_s8 + $0xcc] sm:$0xf] %vm1854_vm0, %v2541_v26 }
 0x349   : > { %2601 = vrot.lane.b32.xlu1 %v5912_v2, %s4723_s13  ;;  %v2105_v63 = vpop.permute.xlu0 %2104 }
 0x34a   : > { %3927 = vst.msk [vmem:[%s5501_s8 + $0x50] sm:$0xf] %vm1854_vm0, %v2105_v63 }
 0x34b   : > { %v2038_v36 = vpop.permute.xlu1 %2037  ;;  %2181 = vrot.lane.b32.xlu0 %v5940_v53, %s4723_s13 }
 0x34c   : > { %3910 = vst.msk [vmem:[%s5511_s21 + $0x4c] sm:$0xf] %vm1854_vm0, %v2038_v36 }
 0x34d   : > { %2617 = vrot.lane.b32.xlu1 %v5914_v8, %s4723_s13  ;;  %v2543_v44 = vpop.permute.xlu0 %2542 }
 0x34e   : > { %4071 = vst.msk [vmem:[%s5501_s8 + $0xd0] sm:$0xf] %vm1854_vm0, %v2543_v44 }
 0x34f   : > { %v2476_v41 = vpop.permute.xlu1 %2475  ;;  %2603 = vrot.lane.b32.xlu0 %v5944_v32, %s4723_s13 }
 0x350   : > { %4054 = vst.msk [vmem:[%s5511_s21 + $0xcc] sm:$0xf] %vm1854_vm0, %v2476_v41 }
 0x351   : > { %2167 = vrot.lane.b32.xlu1 %v5958_v62, %s4723_s13  ;;  %v2040_v39 = vpop.permute.xlu0 %2039 }
 0x352   : > { %3911 = vst.msk [vmem:[%s5511_s21 + $0x50] sm:$0xf] %vm1854_vm0, %v2040_v39 }
 0x353   : > { %v2107_v28 = vpop.permute.xlu1 %2106  ;;  %2619 = vrot.lane.b32.xlu0 %v5946_v54, %s4723_s13 }
 0x354   : > { %3928 = vst.msk [vmem:[%s5501_s8 + $0x54] sm:$0xf] %vm1854_vm0, %v2107_v28 }
 0x355   : > { %2183 = vrot.lane.b32.xlu1 %v5960_v4, %s4723_s13  ;;  %v2478_v52 = vpop.permute.xlu0 %2477 }
 0x356   : > { %4055 = vst.msk [vmem:[%s5511_s21 + $0xd0] sm:$0xf] %vm1854_vm0, %v2478_v52 }
 0x357   : > { %v2545_v33 = vpop.permute.xlu1 %2544  ;;  %2169 = vrot.lane.b32.xlu0 %v5994_v40, %s4723_s13 }
 0x358   : > { %4072 = vst.msk [vmem:[%s5501_s8 + $0xd4] sm:$0xf] %vm1854_vm0, %v2545_v33 }
 0x359   : > { %2605 = vrot.lane.b32.xlu1 %v5968_v7, %s4723_s13  ;;  %v2109_v20 = vpop.permute.xlu0 %2108 }
 0x35a   : > { %3929 = vst.msk [vmem:[%s5501_s8 + $0x58] sm:$0xf] %vm1854_vm0, %v2109_v20 }
 0x35b   : > { %v2042_v37 = vpop.permute.xlu1 %2041  ;;  %2185 = vrot.lane.b32.xlu0 %v5996_v6, %s4723_s13 }
 0x35c   : > { %3912 = vst.msk [vmem:[%s5511_s21 + $0x54] sm:$0xf] %vm1854_vm0, %v2042_v37 }
 0x35d   : > { %2621 = vrot.lane.b32.xlu1 %v5970_v19, %s4723_s13  ;;  %v2547_v60 = vpop.permute.xlu0 %2546 }
 0x35e   : > { %4073 = vst.msk [vmem:[%s5501_s8 + $0xd8] sm:$0xf] %vm1854_vm0, %v2547_v60 }
 0x35f   : > { %v2480_v2 = vpop.permute.xlu1 %2479  ;;  %2607 = vrot.lane.b32.xlu0 %v6000_v61, %s4723_s13 }
 0x360   : > { %4056 = vst.msk [vmem:[%s5511_s21 + $0xd4] sm:$0xf] %vm1854_vm0, %v2480_v2 }
 0x361   : > { %2171 = vrot.lane.b32.xlu1 %v6014_v55, %s4723_s13  ;;  %v2044_v8 = vpop.permute.xlu0 %2043 }
 0x362   : > { %3913 = vst.msk [vmem:[%s5511_s21 + $0x58] sm:$0xf] %vm1854_vm0, %v2044_v8 }
 0x363   : > { %v2111_v24 = vpop.permute.xlu1 %2110  ;;  %2623 = vrot.lane.b32.xlu0 %v6002_v29, %s4723_s13 }
 0x364   : > { %3930 = vst.msk [vmem:[%s5501_s8 + $0x5c] sm:$0xf] %vm1854_vm0, %v2111_v24 }
 0x365   : > { %2187 = vrot.lane.b32.xlu1 %v6016_v3, %s4723_s13  ;;  %v2482_v53 = vpop.permute.xlu0 %2481 }
 0x366   : > { %4057 = vst.msk [vmem:[%s5511_s21 + $0xd8] sm:$0xf] %vm1854_vm0, %v2482_v53 }
 0x367   : > { %v2549_v32 = vpop.permute.xlu1 %2548  ;;  %2173 = vrot.lane.b32.xlu0 %v6050_v30, %s4723_s13 }
 0x368   : > { %4074 = vst.msk [vmem:[%s5501_s8 + $0xdc] sm:$0xf] %vm1854_vm0, %v2549_v32 }
 0x369   : > { %2609 = vrot.lane.b32.xlu1 %v6024_v59, %s4723_s13  ;;  %v2113_v54 = vpop.permute.xlu0 %2112 }
 0x36a   : > { %3931 = vst.msk [vmem:[%s5501_s8 + $0x60] sm:$0xf] %vm1854_vm0, %v2113_v54 }
 0x36b   : > { %v2046_v62 = vpop.permute.xlu1 %2045  ;;  %2189 = vrot.lane.b32.xlu0 %v6052_v23, %s4723_s13 }
 0x36c   : > { %3914 = vst.msk [vmem:[%s5511_s21 + $0x5c] sm:$0xf] %vm1854_vm0, %v2046_v62 }
 0x36d   : > { %2625 = vrot.lane.b32.xlu1 %v6026_v16, %s4723_s13  ;;  %v2551_v4 = vpop.permute.xlu0 %2550 }
 0x36e   : > { %4075 = vst.msk [vmem:[%s5501_s8 + $0xe0] sm:$0xf] %vm1854_vm0, %v2551_v4  ;;  %v2699_v4 = vld [vmem:[%s5511_s21] sm:$0xff] (%p4940_p9)  }
 0x36f   : > { %v2484_v7 = vpop.permute.xlu1 %2483  ;;  %2611 = vrot.lane.b32.xlu0 %v6056_v57, %s4723_s13  ;;  %2700 = vst [vmem:[%s6404_s26] sm:$0xff] (%p4940_p9), %v2699_v4  }
 0x370   : > { %4058 = vst.msk [vmem:[%s5511_s21 + $0xdc] sm:$0xf] %vm1854_vm0, %v2484_v7  ;;  %v2703_v7 = vld [vmem:[%s5511_s21 + $0x8] sm:$0xff] (%p4940_p9)  }
 0x371   : > { %2175 = vrot.lane.b32.xlu1 %v6070_v22, %s4723_s13  ;;  %v2048_v19 = vpop.permute.xlu0 %2047  ;;  %2704 = vst [vmem:[%s6404_s26 + $0x8] sm:$0xff] (%p4940_p9), %v2703_v7  }
 0x372   : > { %3915 = vst.msk [vmem:[%s5511_s21 + $0x60] sm:$0xf] %vm1854_vm0, %v2048_v19  ;;  %v2707_v19 = vld [vmem:[%s5511_s21 + $0x10] sm:$0xff] (%p4940_p9)  }
 0x373   : > { %v2115_v40 = vpop.permute.xlu1 %2114  ;;  %2627 = vrot.lane.b32.xlu0 %v6058_v17, %s4723_s13  ;;  %2708 = vst [vmem:[%s6404_s26 + $0x10] sm:$0xff] (%p4940_p9), %v2707_v19  }
 0x374   : > { %3932 = vst.msk [vmem:[%s5501_s8 + $0x64] sm:$0xf] %vm1854_vm0, %v2115_v40  ;;  %v2711_v40 = vld [vmem:[%s5511_s21 + $0x18] sm:$0xff] (%p4940_p9)  }
 0x375   : > { %2191 = vrot.lane.b32.xlu1 %v6072_v0, %s4723_s13  ;;  %v2486_v6 = vpop.permute.xlu0 %2485  ;;  %2712 = vst [vmem:[%s6404_s26 + $0x18] sm:$0xff] (%p4940_p9), %v2711_v40  }
 0x376   : > { %4059 = vst.msk [vmem:[%s5511_s21 + $0xe0] sm:$0xf] %vm1854_vm0, %v2486_v6  ;;  %v2715_v6 = vld [vmem:[%s5511_s21 + $0x20] sm:$0xff] (%p4940_p9)  }
 0x377   : > { %v2553_v61 = vpop.permute.xlu1 %2552  ;;  %2716 = vst [vmem:[%s6404_s26 + $0x20] sm:$0xff] (%p4940_p9), %v2715_v6  }
 0x378   : > { %4076 = vst.msk [vmem:[%s5501_s8 + $0xe4] sm:$0xf] %vm1854_vm0, %v2553_v61  ;;  %v2719_v61 = vld [vmem:[%s5511_s21 + $0x28] sm:$0xff] (%p4940_p9)  }
 0x379   : > { %2613 = vrot.lane.b32.xlu1 %v6080_v14, %s4723_s13  ;;  %v2117_v29 = vpop.permute.xlu0 %2116  ;;  %2720 = vst [vmem:[%s6404_s26 + $0x28] sm:$0xff] (%p4940_p9), %v2719_v61  }
 0x37a   : > { %3933 = vst.msk [vmem:[%s5501_s8 + $0x68] sm:$0xf] %vm1854_vm0, %v2117_v29  ;;  %v2723_v29 = vld [vmem:[%s5511_s21 + $0x30] sm:$0xff] (%p4940_p9)  }
 0x37b   : > { %v2050_v55 = vpop.permute.xlu1 %2049  ;;  %2724 = vst [vmem:[%s6404_s26 + $0x30] sm:$0xff] (%p4940_p9), %v2723_v29  }
 0x37c   : > { %3916 = vst.msk [vmem:[%s5511_s21 + $0x64] sm:$0xf] %vm1854_vm0, %v2050_v55  ;;  %v2727_v55 = vld [vmem:[%s5511_s21 + $0x38] sm:$0xff] (%p4940_p9)  }
 0x37d   : > { %2629 = vrot.lane.b32.xlu1 %v6082_v51, %s4723_s13  ;;  %v2555_v3 = vpop.permute.xlu0 %2554  ;;  %2728 = vst [vmem:[%s6404_s26 + $0x38] sm:$0xff] (%p4940_p9), %v2727_v55  }
 0x37e   : > { %4077 = vst.msk [vmem:[%s5501_s8 + $0xe8] sm:$0xf] %vm1854_vm0, %v2555_v3  ;;  %v2731_v3 = vld [vmem:[%s5511_s21 + $0x40] sm:$0xff] (%p4940_p9)  }
 0x37f   : > { %v2488_v59 = vpop.permute.xlu1 %2487  ;;  %2732 = vst [vmem:[%s6404_s26 + $0x80] sm:$0xff] (%p4940_p9), %v2731_v3  }
 0x380   : > { %4060 = vst.msk [vmem:[%s5511_s21 + $0xe4] sm:$0xf] %vm1854_vm0, %v2488_v59  ;;  %v2735_v59 = vld [vmem:[%s5511_s21 + $0x48] sm:$0xff] (%p4940_p9)  }
 0x381   : > { %v2052_v16 = vpop.permute.xlu0 %2051  ;;  %2736 = vst [vmem:[%s6404_s26 + $0x88] sm:$0xff] (%p4940_p9), %v2735_v59  }
 0x382   : > { %3917 = vst.msk [vmem:[%s5511_s21 + $0x68] sm:$0xf] %vm1854_vm0, %v2052_v16  ;;  %v2739_v16 = vld [vmem:[%s5511_s21 + $0x50] sm:$0xff] (%p4940_p9)  }
 0x383   : > { %v2119_v43 = vpop.permute.xlu1 %2118  ;;  %2740 = vst [vmem:[%s6404_s26 + $0x90] sm:$0xff] (%p4940_p9), %v2739_v16  }
 0x384   : > { %3934 = vst.msk [vmem:[%s5501_s8 + $0x6c] sm:$0xf] %vm1854_vm0, %v2119_v43  ;;  %v2743_v43 = vld [vmem:[%s5511_s21 + $0x58] sm:$0xff] (%p4940_p9)  }
 0x385   : > { %v2490_v49 = vpop.permute.xlu0 %2489  ;;  %2744 = vst [vmem:[%s6404_s26 + $0x98] sm:$0xff] (%p4940_p9), %v2743_v43  }
 0x386   : > { %4061 = vst.msk [vmem:[%s5511_s21 + $0xe8] sm:$0xf] %vm1854_vm0, %v2490_v49  ;;  %v2747_v49 = vld [vmem:[%s5511_s21 + $0x60] sm:$0xff] (%p4940_p9)  }
 0x387   : > { %v2557_v25 = vpop.permute.xlu1 %2556  ;;  %2748 = vst [vmem:[%s6404_s26 + $0xa0] sm:$0xff] (%p4940_p9), %v2747_v49  }
 0x388   : > { %4078 = vst.msk [vmem:[%s5501_s8 + $0xec] sm:$0xf] %vm1854_vm0, %v2557_v25 }
 0x389   : > { %v2121_v42 = vpop.permute.xlu0 %2120 }
 0x38a   : > { %3935 = vst.msk [vmem:[%s5501_s8 + $0x70] sm:$0xf] %vm1854_vm0, %v2121_v42 }
 0x38b   : > { %v2054_v12 = vpop.permute.xlu1 %2053 }
 0x38c   : > { %3918 = vst.msk [vmem:[%s5511_s21 + $0x6c] sm:$0xf] %vm1854_vm0, %v2054_v12 }
 0x38d   : > { %v2559_v1 = vpop.permute.xlu0 %2558 }
 0x38e   : > { %4079 = vst.msk [vmem:[%s5501_s8 + $0xf0] sm:$0xf] %vm1854_vm0, %v2559_v1  ;;  %v2763_v1 = vld [vmem:[%s5511_s21 + $0x80] sm:$0xff] (%p4940_p9)  }
 0x38f   : > { %v2492_v21 = vpop.permute.xlu1 %2491  ;;  %2764 = vst [vmem:[%s6404_s26 + $0x100] sm:$0xff] (%p4940_p9), %v2763_v1  }
 0x390   : > { %4062 = vst.msk [vmem:[%s5511_s21 + $0xec] sm:$0xf] %vm1854_vm0, %v2492_v21  ;;  %v2767_v21 = vld [vmem:[%s5511_s21 + $0x88] sm:$0xff] (%p4940_p9)  }
 0x391   : > { %v2056_v30 = vpop.permute.xlu0 %2055  ;;  %2768 = vst [vmem:[%s6404_s26 + $0x108] sm:$0xff] (%p4940_p9), %v2767_v21  }
 0x392   : > { %3919 = vst.msk [vmem:[%s5511_s21 + $0x70] sm:$0xf] %vm1854_vm0, %v2056_v30  ;;  %v2771_v30 = vld [vmem:[%s5511_s21 + $0x90] sm:$0xff] (%p4940_p9)  }
 0x393   : > { %v2123_v23 = vpop.permute.xlu1 %2122  ;;  %v2751_v25 = vld [vmem:[%s5511_s21 + $0x68] sm:$0xff] (%p4940_p9)   ;;  %2772 = vst [vmem:[%s6404_s26 + $0x110] sm:$0xff] (%p4940_p9), %v2771_v30  }
 0x394   : > { %3936 = vst.msk [vmem:[%s5501_s8 + $0x74] sm:$0xf] %vm1854_vm0, %v2123_v23  ;;  %2752 = vst [vmem:[%s6404_s26 + $0xa8] sm:$0xff] (%p4940_p9), %v2751_v25   ;;  %v2775_v23 = vld [vmem:[%s5511_s21 + $0x98] sm:$0xff] (%p4940_p9)  }
 0x395   : > { %v2494_v47 = vpop.permute.xlu0 %2493  ;;  %2776 = vst [vmem:[%s6404_s26 + $0x118] sm:$0xff] (%p4940_p9), %v2775_v23  }
 0x396   : > { %4063 = vst.msk [vmem:[%s5511_s21 + $0xf0] sm:$0xf] %vm1854_vm0, %v2494_v47  ;;  %v2779_v47 = vld [vmem:[%s5511_s21 + $0xa0] sm:$0xff] (%p4940_p9)  }
 0x397   : > { %v2561_v56 = vpop.permute.xlu1 %2560  ;;  %2780 = vst [vmem:[%s6404_s26 + $0x120] sm:$0xff] (%p4940_p9), %v2779_v47  }
 0x398   : > { %4080 = vst.msk [vmem:[%s5501_s8 + $0xf4] sm:$0xf] %vm1854_vm0, %v2561_v56  ;;  %v2783_v56 = vld [vmem:[%s5511_s21 + $0xa8] sm:$0xff] (%p4940_p9)  }
 0x399   : > { %v2125_v5 = vpop.permute.xlu0 %2124  ;;  %2784 = vst [vmem:[%s6404_s26 + $0x128] sm:$0xff] (%p4940_p9), %v2783_v56  }
 0x39a   : > { %3937 = vst.msk [vmem:[%s5501_s8 + $0x78] sm:$0xf] %vm1854_vm0, %v2125_v5  ;;  %v2787_v5 = vld [vmem:[%s5511_s21 + $0xb0] sm:$0xff] (%p4940_p9)  }
 0x39b   : > { %v2058_v18 = vpop.permute.xlu1 %2057  ;;  %2788 = vst [vmem:[%s6404_s26 + $0x130] sm:$0xff] (%p4940_p9), %v2787_v5  }
 0x39c   : > { %3920 = vst.msk [vmem:[%s5511_s21 + $0x74] sm:$0xf] %vm1854_vm0, %v2058_v18  ;;  %v2791_v18 = vld [vmem:[%s5511_s21 + $0xb8] sm:$0xff] (%p4940_p9)  }
 0x39d   : > { %v2563_v57 = vpop.permute.xlu0 %2562  ;;  %2792 = vst [vmem:[%s6404_s26 + $0x138] sm:$0xff] (%p4940_p9), %v2791_v18  }
 0x39e   : > { %4081 = vst.msk [vmem:[%s5501_s8 + $0xf8] sm:$0xf] %vm1854_vm0, %v2563_v57  ;;  %v2795_v57 = vld [vmem:[%s5511_s21 + $0xc0] sm:$0xff] (%p4940_p9)  }
 0x39f   : > { %v2496_v17 = vpop.permute.xlu1 %2495  ;;  %2796 = vst [vmem:[%s6404_s26 + $0x180] sm:$0xff] (%p4940_p9), %v2795_v57  }
 0x3a0   : > { %4064 = vst.msk [vmem:[%s5511_s21 + $0xf4] sm:$0xf] %vm1854_vm0, %v2496_v17  ;;  %v2799_v17 = vld [vmem:[%s5511_s21 + $0xc8] sm:$0xff] (%p4940_p9)  }
 0x3a1   : > { %v2060_v15 = vpop.permute.xlu0 %2059  ;;  %2800 = vst [vmem:[%s6404_s26 + $0x188] sm:$0xff] (%p4940_p9), %v2799_v17  }
 0x3a2   : > { %3921 = vst.msk [vmem:[%s5511_s21 + $0x78] sm:$0xf] %vm1854_vm0, %v2060_v15  ;;  %v2803_v15 = vld [vmem:[%s5511_s21 + $0xd0] sm:$0xff] (%p4940_p9)  }
 0x3a3   : > { %v2127_v58 = vpop.permute.xlu1 %2126  ;;  %v2755_v42 = vld [vmem:[%s5511_s21 + $0x70] sm:$0xff] (%p4940_p9)   ;;  %2804 = vst [vmem:[%s6404_s26 + $0x190] sm:$0xff] (%p4940_p9), %v2803_v15  }
 0x3a4   : > { %3938 = vst.msk [vmem:[%s5501_s8 + $0x7c] sm:$0xf] %vm1854_vm0, %v2127_v58  ;;  %2756 = vst [vmem:[%s6404_s26 + $0xb0] sm:$0xff] (%p4940_p9), %v2755_v42   ;;  %v2807_v58 = vld [vmem:[%s5511_s21 + $0xd8] sm:$0xff] (%p4940_p9)  }
 0x3a5   : > { %v2498_v22 = vpop.permute.xlu0 %2497  ;;  %2808 = vst [vmem:[%s6404_s26 + $0x198] sm:$0xff] (%p4940_p9), %v2807_v58  }
 0x3a6   : > { %4065 = vst.msk [vmem:[%s5511_s21 + $0xf8] sm:$0xf] %vm1854_vm0, %v2498_v22  ;;  %v2811_v22 = vld [vmem:[%s5511_s21 + $0xe0] sm:$0xff] (%p4940_p9)  }
 0x3a7   : > { %v2565_v0 = vpop.permute.xlu1 %2564  ;;  %2812 = vst [vmem:[%s6404_s26 + $0x1a0] sm:$0xff] (%p4940_p9), %v2811_v22  }
 0x3a8   : > { %4082 = vst.msk [vmem:[%s5501_s8 + $0xfc] sm:$0xf] %vm1854_vm0, %v2565_v0  ;;  %v2815_v0 = vld [vmem:[%s5511_s21 + $0xe8] sm:$0xff] (%p4940_p9)  }
 0x3a9   : > { %v2162_v14 = vpop.permute.xlu0 %2161  ;;  %2816 = vst [vmem:[%s6404_s26 + $0x1a8] sm:$0xff] (%p4940_p9), %v2815_v0  }
 0x3aa   : > { %3939 = vst.msk [vmem:[%s5894_s27 + $0x40] sm:$0xf] %vm1854_vm0, %v2162_v14  ;;  %v2819_v14 = vld [vmem:[%s5511_s21 + $0xf0] sm:$0xff] (%p4940_p9)  }
 0x3ab   : > { %v2062_v51 = vpop.permute.xlu1 %2061  ;;  %2820 = vst [vmem:[%s6404_s26 + $0x1b0] sm:$0xff] (%p4940_p9), %v2819_v14  }
 0x3ac   : > { %3922 = vst.msk [vmem:[%s5511_s21 + $0x7c] sm:$0xf] %vm1854_vm0, %v2062_v51 }
 0x3ad   : > { %v2178_v35 = vpop.permute.xlu0 %2177 }
 0x3ae   : > { %3947 = vst.msk [vmem:[%s5894_s27 + $0x60] sm:$0xf] %vm1854_vm0, %v2178_v35 }
 0x3af   : > { %v2500_v38 = vpop.permute.xlu1 %2499 }
 0x3b0   : > { %4066 = vst.msk [vmem:[%s5511_s21 + $0xfc] sm:$0xf] %vm1854_vm0, %v2500_v38 }
 0x3b1   : > { %v2600_v46 = vpop.permute.xlu0 %2599 }
 0x3b2   : > { %4083 = vst.msk [vmem:[%s5894_s27 + $0xc0] sm:$0xf] %vm1854_vm0, %v2600_v46 }
 0x3b3   : > { %v2164_v13 = vpop.permute.xlu1 %2163  ;;  %v2759_v12 = vld [vmem:[%s5511_s21 + $0x78] sm:$0xff] (%p4940_p9)  }
 0x3b4   : > { %3940 = vst.msk [vmem:[%s5894_s27 + $0x44] sm:$0xf] %vm1854_vm0, %v2164_v13  ;;  %2760 = vst [vmem:[%s6404_s26 + $0xb8] sm:$0xff] (%p4940_p9), %v2759_v12  }
 0x3b5   : > { %v2616_v10 = vpop.permute.xlu0 %2615 }
 0x3b6   : > { %4091 = vst.msk [vmem:[%s5894_s27 + $0xe0] sm:$0xf] %vm1854_vm0, %v2616_v10 }
 0x3b7   : > { %v2180_v48 = vpop.permute.xlu1 %2179  ;;  %v2823_v51 = vld [vmem:[%s5511_s21 + $0xf8] sm:$0xff] (%p4940_p9)  }
 0x3b8   : > { %3948 = vst.msk [vmem:[%s5894_s27 + $0x64] sm:$0xf] %vm1854_vm0, %v2180_v48  ;;  %2824 = vst [vmem:[%s6404_s26 + $0x1b8] sm:$0xff] (%p4940_p9), %v2823_v51  }
 0x3b9   : > { %v2166_v34 = vpop.permute.xlu0 %2165 }
 0x3ba   : > { %3941 = vst.msk [vmem:[%s5894_s27 + $0x48] sm:$0xf] %vm1854_vm0, %v2166_v34 }
 0x3bb   : > { %v2602_v27 = vpop.permute.xlu1 %2601 }
 0x3bc   : > { %4084 = vst.msk [vmem:[%s5894_s27 + $0xc4] sm:$0xf] %vm1854_vm0, %v2602_v27 }
 0x3bd   : > { %v2182_v45 = vpop.permute.xlu0 %2181 }
 0x3be   : > { %3949 = vst.msk [vmem:[%s5894_s27 + $0x68] sm:$0xf] %vm1854_vm0, %v2182_v45 }
 0x3bf   : > { %v2618_v9 = vpop.permute.xlu1 %2617 }
 0x3c0   : > { %4092 = vst.msk [vmem:[%s5894_s27 + $0xe4] sm:$0xf] %vm1854_vm0, %v2618_v9 }
 0x3c1   : > { %v2604_v31 = vpop.permute.xlu0 %2603 }
 0x3c2   : > { %4085 = vst.msk [vmem:[%s5894_s27 + $0xc8] sm:$0xf] %vm1854_vm0, %v2604_v31 }
 0x3c3   : > { %v2168_v50 = vpop.permute.xlu1 %2167 }
 0x3c4   : > { %3942 = vst.msk [vmem:[%s5894_s27 + $0x4c] sm:$0xf] %vm1854_vm0, %v2168_v50 }
 0x3c5   : > { %v2620_v11 = vpop.permute.xlu0 %2619 }
 0x3c6   : > { %4093 = vst.msk [vmem:[%s5894_s27 + $0xe8] sm:$0xf] %vm1854_vm0, %v2620_v11 }
 0x3c7   : > { %v2184_v26 = vpop.permute.xlu1 %2183 }
 0x3c8   : > { %3950 = vst.msk [vmem:[%s5894_s27 + $0x6c] sm:$0xf] %vm1854_vm0, %v2184_v26 }
 0x3c9   : > { %v2170_v63 = vpop.permute.xlu0 %2169 }
 0x3ca   : > { %3943 = vst.msk [vmem:[%s5894_s27 + $0x50] sm:$0xf] %vm1854_vm0, %v2170_v63 }
 0x3cb   : > { %v2606_v36 = vpop.permute.xlu1 %2605 }
 0x3cc   : > { %4086 = vst.msk [vmem:[%s5894_s27 + $0xcc] sm:$0xf] %vm1854_vm0, %v2606_v36 }
 0x3cd   : > { %v2186_v44 = vpop.permute.xlu0 %2185 }
 0x3ce   : > { %3951 = vst.msk [vmem:[%s5894_s27 + $0x70] sm:$0xf] %vm1854_vm0, %v2186_v44 }
 0x3cf   : > { %v2622_v41 = vpop.permute.xlu1 %2621 }
 0x3d0   : > { %4094 = vst.msk [vmem:[%s5894_s27 + $0xec] sm:$0xf] %vm1854_vm0, %v2622_v41 }
 0x3d1   : > { %v2608_v39 = vpop.permute.xlu0 %2607 }
 0x3d2   : > { %4087 = vst.msk [vmem:[%s5894_s27 + $0xd0] sm:$0xf] %vm1854_vm0, %v2608_v39 }
 0x3d3   : > { %v2172_v28 = vpop.permute.xlu1 %2171 }
 0x3d4   : > { %3944 = vst.msk [vmem:[%s5894_s27 + $0x54] sm:$0xf] %vm1854_vm0, %v2172_v28 }
 0x3d5   : > { %v2624_v52 = vpop.permute.xlu0 %2623 }
 0x3d6   : > { %4095 = vst.msk [vmem:[%s5894_s27 + $0xf0] sm:$0xf] %vm1854_vm0, %v2624_v52 }
 0x3d7   : > { %v2188_v33 = vpop.permute.xlu1 %2187 }
 0x3d8   : > { %3952 = vst.msk [vmem:[%s5894_s27 + $0x74] sm:$0xf] %vm1854_vm0, %v2188_v33 }
 0x3d9   : > { %v2174_v20 = vpop.permute.xlu0 %2173 }
 0x3da   : > { %3945 = vst.msk [vmem:[%s5894_s27 + $0x58] sm:$0xf] %vm1854_vm0, %v2174_v20 }
 0x3db   : > { %v2610_v37 = vpop.permute.xlu1 %2609 }
 0x3dc   : > { %4088 = vst.msk [vmem:[%s5894_s27 + $0xd4] sm:$0xf] %vm1854_vm0, %v2610_v37 }
 0x3dd   : > { %v2190_v60 = vpop.permute.xlu0 %2189 }
 0x3de   : > { %3953 = vst.msk [vmem:[%s5894_s27 + $0x78] sm:$0xf] %vm1854_vm0, %v2190_v60 }
 0x3df   : > { %v2626_v2 = vpop.permute.xlu1 %2625 }
 0x3e0   : > { %4096 = vst.msk [vmem:[%s5894_s27 + $0xf4] sm:$0xf] %vm1854_vm0, %v2626_v2 }
 0x3e1   : > { %v2612_v8 = vpop.permute.xlu0 %2611 }
 0x3e2   : > { %4089 = vst.msk [vmem:[%s5894_s27 + $0xd8] sm:$0xf] %vm1854_vm0, %v2612_v8 }
 0x3e3   : > { %v2176_v24 = vpop.permute.xlu1 %2175 }
 0x3e4   : > { %3946 = vst.msk [vmem:[%s5894_s27 + $0x5c] sm:$0xf] %vm1854_vm0, %v2176_v24 }
 0x3e5   : > { %v2628_v53 = vpop.permute.xlu0 %2627 }
 0x3e6   : > { %4097 = vst.msk [vmem:[%s5894_s27 + $0xf8] sm:$0xf] %vm1854_vm0, %v2628_v53 }
 0x3e7   : > { %v2192_v32 = vpop.permute.xlu1 %2191 }
 0x3e8   : > { %3954 = vst.msk [vmem:[%s5894_s27 + $0x7c] sm:$0xf] %vm1854_vm0, %v2192_v32 }
 0x3ea   : > { %2678 = sbr.rel (!%p4940_p9) target bundleno = 1009 (0x3f1), region = 72 }
 0x3eb   : > { %v2614_v54 = vpop.permute.xlu1 %2613 }
 0x3ec   : > { %4090 = vst.msk [vmem:[%s5894_s27 + $0xdc] sm:$0xf] %vm1854_vm0, %v2614_v54 }
 0x3ef   : > { %v2630_v62 = vpop.permute.xlu1 %2629 }
 0x3f0   : > { %4098 = vst.msk [vmem:[%s5894_s27 + $0xfc] sm:$0xf] %vm1854_vm0, %v2630_v62 }
 0x3f1 PF: > { %2977 = sbr.rel (!%p4940_p9) target bundleno = 1036 (0x40c), region = 113  ;;  %s6677_s23 = sld [smem:[#allocation15_spill]] (%p4940_p9)  ;;  %v2998_v35 = vld [vmem:[%s5501_s8] sm:$0xff] (%p4940_p9)   ;;  %v3002_v38 = vld [vmem:[%s5501_s8 + $0x8] sm:$0xff] (%p4940_p9)   ;;  %v3006_v46 = vld [vmem:[%s5501_s8 + $0x10] sm:$0xff] (%p4940_p9)  }
 0x3f2   : > { %s6678_s16 = sld [smem:[#allocation16_spill]] (%p4940_p9)  ;;  %v3010_v13 = vld [vmem:[%s5501_s8 + $0x18] sm:$0xff] (%p4940_p9)   ;;  %v3014_v10 = vld [vmem:[%s5501_s8 + $0x20] sm:$0xff] (%p4940_p9)   ;;  %v3018_v48 = vld [vmem:[%s5501_s8 + $0x28] sm:$0xff] (%p4940_p9)   ;;  %s6679_s7 = sld [smem:[#allocation23_spill]] (%p4940_p9) }
 0x3f3   : > { %v3022_v34 = vld [vmem:[%s5501_s8 + $0x30] sm:$0xff] (%p4940_p9)   ;;  %v3026_v27 = vld [vmem:[%s5501_s8 + $0x38] sm:$0xff] (%p4940_p9)   ;;  %v3030_v45 = vld [vmem:[%s5501_s8 + $0x40] sm:$0xff] (%p4940_p9)  }
 0x3f4   : > { %v3034_v9 = vld [vmem:[%s5501_s8 + $0x48] sm:$0xff] (%p4940_p9)   ;;  %v3038_v31 = vld [vmem:[%s5501_s8 + $0x50] sm:$0xff] (%p4940_p9)   ;;  %v3042_v50 = vld [vmem:[%s5501_s8 + $0x58] sm:$0xff] (%p4940_p9)  }
 0x3f5   : > { %v3046_v11 = vld [vmem:[%s5501_s8 + $0x60] sm:$0xff] (%p4940_p9)   ;;  %v3050_v26 = vld [vmem:[%s5501_s8 + $0x68] sm:$0xff] (%p4940_p9)   ;;  %v3054_v63 = vld [vmem:[%s5501_s8 + $0x70] sm:$0xff] (%p4940_p9)  }
 0x3f6   : > { %v3058_v36 = vld [vmem:[%s5501_s8 + $0x78] sm:$0xff] (%p4940_p9)   ;;  %v3062_v44 = vld [vmem:[%s5501_s8 + $0x80] sm:$0xff] (%p4940_p9)   ;;  %v3066_v41 = vld [vmem:[%s5501_s8 + $0x88] sm:$0xff] (%p4940_p9)  }
 0x3f7   : > { %s4105_s13 = sshll.u32 (%p4940_p9), %s6677_s23, 4  ;;  %v3070_v39 = vld [vmem:[%s5501_s8 + $0x90] sm:$0xff] (%p4940_p9)   ;;  %v3074_v28 = vld [vmem:[%s5501_s8 + $0x98] sm:$0xff] (%p4940_p9)   ;;  %v3078_v52 = vld [vmem:[%s5501_s8 + $0xa0] sm:$0xff] (%p4940_p9)  }
 0x3f8   : > { %s4106_s21 = sshll.u32 %s6678_s16, 7  ;;  %v3082_v33 = vld [vmem:[%s5501_s8 + $0xa8] sm:$0xff]   ;;  %v3086_v20 = vld [vmem:[%s5501_s8 + $0xb0] sm:$0xff]   ;;  %v3090_v37 = vld [vmem:[%s5501_s8 + $0xb8] sm:$0xff]  }
 0x3f9   : > { %s2980_s12 = sadd.s32 %s4106_s21, %s4105_s13  ;;  %v3094_v60 = vld [vmem:[%s5501_s8 + $0xc0] sm:$0xff]   ;;  %v3098_v2 = vld [vmem:[%s5501_s8 + $0xc8] sm:$0xff]   ;;  %v3102_v8 = vld [vmem:[%s5501_s8 + $0xd0] sm:$0xff]  }
 0x3fa   : > { %s4107_s29 = sshll.u32 %s2980_s12, 2  ;;  %v3106_v24 = vld [vmem:[%s5501_s8 + $0xd8] sm:$0xff]   ;;  %v3110_v53 = vld [vmem:[%s5501_s8 + $0xe0] sm:$0xff]   ;;  %v3114_v32 = vld [vmem:[%s5501_s8 + $0xe8] sm:$0xff]  }
 0x3fb   : > { %s6477_s17 = scalar_lea.vmem %s6679_s7, %s4107_s29  ;;  %v3118_v54 = vld [vmem:[%s5501_s8 + $0xf0] sm:$0xff]   ;;  %v3122_v62 = vld [vmem:[%s5501_s8 + $0xf8] sm:$0xff]  }
 0x3fc   : > { %2999 = vst [vmem:[%s6477_s17] sm:$0xff] %v2998_v35   ;;  %3003 = vst [vmem:[%s6477_s17 + $0x8] sm:$0xff] %v3002_v38  }
 0x3fd   : > { %3007 = vst [vmem:[%s6477_s17 + $0x10] sm:$0xff] %v3006_v46   ;;  %3011 = vst [vmem:[%s6477_s17 + $0x18] sm:$0xff] %v3010_v13  }
 0x3fe   : > { %3015 = vst [vmem:[%s6477_s17 + $0x20] sm:$0xff] %v3014_v10   ;;  %3019 = vst [vmem:[%s6477_s17 + $0x28] sm:$0xff] %v3018_v48  }
 0x3ff   : > { %3023 = vst [vmem:[%s6477_s17 + $0x30] sm:$0xff] %v3022_v34   ;;  %3027 = vst [vmem:[%s6477_s17 + $0x38] sm:$0xff] %v3026_v27  }
 0x400   : > { %3031 = vst [vmem:[%s6477_s17 + $0x80] sm:$0xff] %v3030_v45   ;;  %3035 = vst [vmem:[%s6477_s17 + $0x88] sm:$0xff] %v3034_v9  }
 0x401   : > { %3039 = vst [vmem:[%s6477_s17 + $0x90] sm:$0xff] %v3038_v31   ;;  %3043 = vst [vmem:[%s6477_s17 + $0x98] sm:$0xff] %v3042_v50  }
 0x402   : > { %3047 = vst [vmem:[%s6477_s17 + $0xa0] sm:$0xff] %v3046_v11   ;;  %3051 = vst [vmem:[%s6477_s17 + $0xa8] sm:$0xff] %v3050_v26  }
 0x403   : > { %3055 = vst [vmem:[%s6477_s17 + $0xb0] sm:$0xff] %v3054_v63   ;;  %3059 = vst [vmem:[%s6477_s17 + $0xb8] sm:$0xff] %v3058_v36  }
 0x404   : > { %3063 = vst [vmem:[%s6477_s17 + $0x100] sm:$0xff] %v3062_v44   ;;  %3067 = vst [vmem:[%s6477_s17 + $0x108] sm:$0xff] %v3066_v41  }
 0x405   : > { %3071 = vst [vmem:[%s6477_s17 + $0x110] sm:$0xff] %v3070_v39   ;;  %3075 = vst [vmem:[%s6477_s17 + $0x118] sm:$0xff] %v3074_v28  }
 0x406   : > { %3079 = vst [vmem:[%s6477_s17 + $0x120] sm:$0xff] %v3078_v52   ;;  %3083 = vst [vmem:[%s6477_s17 + $0x128] sm:$0xff] %v3082_v33  }
 0x407   : > { %3087 = vst [vmem:[%s6477_s17 + $0x130] sm:$0xff] %v3086_v20   ;;  %3091 = vst [vmem:[%s6477_s17 + $0x138] sm:$0xff] %v3090_v37  }
 0x408   : > { %3095 = vst [vmem:[%s6477_s17 + $0x180] sm:$0xff] %v3094_v60   ;;  %3099 = vst [vmem:[%s6477_s17 + $0x188] sm:$0xff] %v3098_v2  }
 0x409   : > { %3103 = vst [vmem:[%s6477_s17 + $0x190] sm:$0xff] %v3102_v8   ;;  %3107 = vst [vmem:[%s6477_s17 + $0x198] sm:$0xff] %v3106_v24  }
 0x40a   : > { %3111 = vst [vmem:[%s6477_s17 + $0x1a0] sm:$0xff] %v3110_v53   ;;  %3115 = vst [vmem:[%s6477_s17 + $0x1a8] sm:$0xff] %v3114_v32  }
 0x40b   : > { %3119 = vst [vmem:[%s6477_s17 + $0x1b0] sm:$0xff] %v3118_v54   ;;  %3123 = vst [vmem:[%s6477_s17 + $0x1b8] sm:$0xff] %v3122_v62  }
 0x40c PF: > { %3276 = sbr.rel (!%p4940_p9) target bundleno = 1063 (0x427), region = 154  ;;  %s6680_s5 = sld [smem:[#allocation15_spill]] (%p4940_p9)  ;;  %v3297_v4 = vld [vmem:[%s5894_s27] sm:$0xff] (%p4940_p9)   ;;  %v3301_v7 = vld [vmem:[%s5894_s27 + $0x8] sm:$0xff] (%p4940_p9)   ;;  %v3305_v19 = vld [vmem:[%s5894_s27 + $0x10] sm:$0xff] (%p4940_p9)  }
 0x40d   : > { %s6681_s6 = sld [smem:[#allocation16_spill]] (%p4940_p9)  ;;  %v3309_v40 = vld [vmem:[%s5894_s27 + $0x18] sm:$0xff] (%p4940_p9)   ;;  %v3313_v6 = vld [vmem:[%s5894_s27 + $0x20] sm:$0xff] (%p4940_p9)   ;;  %v3317_v61 = vld [vmem:[%s5894_s27 + $0x28] sm:$0xff] (%p4940_p9)   ;;  %s6682_s26 = sld [smem:[#allocation24_spill]] (%p4940_p9) }
 0x40e   : > { %v3321_v29 = vld [vmem:[%s5894_s27 + $0x30] sm:$0xff] (%p4940_p9)   ;;  %v3325_v55 = vld [vmem:[%s5894_s27 + $0x38] sm:$0xff] (%p4940_p9)   ;;  %v3329_v3 = vld [vmem:[%s5894_s27 + $0x40] sm:$0xff] (%p4940_p9)  }
 0x40f   : > { %v3333_v59 = vld [vmem:[%s5894_s27 + $0x48] sm:$0xff] (%p4940_p9)   ;;  %v3337_v16 = vld [vmem:[%s5894_s27 + $0x50] sm:$0xff] (%p4940_p9)   ;;  %v3341_v43 = vld [vmem:[%s5894_s27 + $0x58] sm:$0xff] (%p4940_p9)  }
 0x410   : > { %v3345_v49 = vld [vmem:[%s5894_s27 + $0x60] sm:$0xff] (%p4940_p9)   ;;  %v3349_v25 = vld [vmem:[%s5894_s27 + $0x68] sm:$0xff] (%p4940_p9)   ;;  %v3353_v42 = vld [vmem:[%s5894_s27 + $0x70] sm:$0xff] (%p4940_p9)  }
 0x411   : > { %v3357_v12 = vld [vmem:[%s5894_s27 + $0x78] sm:$0xff] (%p4940_p9)   ;;  %v3361_v1 = vld [vmem:[%s5894_s27 + $0x80] sm:$0xff] (%p4940_p9)   ;;  %v3365_v21 = vld [vmem:[%s5894_s27 + $0x88] sm:$0xff] (%p4940_p9)  }
 0x412   : > { %s4108_s8 = sshll.u32 (%p4940_p9), %s6680_s5, 4  ;;  %v3369_v30 = vld [vmem:[%s5894_s27 + $0x90] sm:$0xff] (%p4940_p9)   ;;  %v3373_v23 = vld [vmem:[%s5894_s27 + $0x98] sm:$0xff] (%p4940_p9)   ;;  %v3377_v47 = vld [vmem:[%s5894_s27 + $0xa0] sm:$0xff] (%p4940_p9)  }
 0x413   : > { %s4109_s9 = sshll.u32 %s6681_s6, 7  ;;  %v3381_v56 = vld [vmem:[%s5894_s27 + $0xa8] sm:$0xff]   ;;  %v3385_v5 = vld [vmem:[%s5894_s27 + $0xb0] sm:$0xff]   ;;  %v3389_v18 = vld [vmem:[%s5894_s27 + $0xb8] sm:$0xff]  }
 0x414   : > { %s3279_s10 = sadd.s32 %s4109_s9, %s4108_s8  ;;  %v3393_v57 = vld [vmem:[%s5894_s27 + $0xc0] sm:$0xff]   ;;  %v3397_v17 = vld [vmem:[%s5894_s27 + $0xc8] sm:$0xff]   ;;  %v3401_v15 = vld [vmem:[%s5894_s27 + $0xd0] sm:$0xff]  }
 0x415   : > { %s4110_s22 = sshll.u32 %s3279_s10, 2  ;;  %v3405_v58 = vld [vmem:[%s5894_s27 + $0xd8] sm:$0xff]   ;;  %v3409_v22 = vld [vmem:[%s5894_s27 + $0xe0] sm:$0xff]   ;;  %v3413_v0 = vld [vmem:[%s5894_s27 + $0xe8] sm:$0xff]  }
 0x416   : > { %s6550_s23 = scalar_lea.vmem %s6682_s26, %s4110_s22  ;;  %v3417_v14 = vld [vmem:[%s5894_s27 + $0xf0] sm:$0xff]   ;;  %v3421_v51 = vld [vmem:[%s5894_s27 + $0xf8] sm:$0xff]  }
 0x417   : > { %3298 = vst [vmem:[%s6550_s23] sm:$0xff] %v3297_v4   ;;  %3302 = vst [vmem:[%s6550_s23 + $0x8] sm:$0xff] %v3301_v7  }
 0x418   : > { %3306 = vst [vmem:[%s6550_s23 + $0x10] sm:$0xff] %v3305_v19   ;;  %3310 = vst [vmem:[%s6550_s23 + $0x18] sm:$0xff] %v3309_v40  }
 0x419   : > { %3314 = vst [vmem:[%s6550_s23 + $0x20] sm:$0xff] %v3313_v6   ;;  %3318 = vst [vmem:[%s6550_s23 + $0x28] sm:$0xff] %v3317_v61  }
 0x41a   : > { %3322 = vst [vmem:[%s6550_s23 + $0x30] sm:$0xff] %v3321_v29   ;;  %3326 = vst [vmem:[%s6550_s23 + $0x38] sm:$0xff] %v3325_v55  }
 0x41b   : > { %3330 = vst [vmem:[%s6550_s23 + $0x80] sm:$0xff] %v3329_v3   ;;  %3334 = vst [vmem:[%s6550_s23 + $0x88] sm:$0xff] %v3333_v59  }
 0x41c   : > { %3338 = vst [vmem:[%s6550_s23 + $0x90] sm:$0xff] %v3337_v16   ;;  %3342 = vst [vmem:[%s6550_s23 + $0x98] sm:$0xff] %v3341_v43  }
 0x41d   : > { %3346 = vst [vmem:[%s6550_s23 + $0xa0] sm:$0xff] %v3345_v49   ;;  %3350 = vst [vmem:[%s6550_s23 + $0xa8] sm:$0xff] %v3349_v25  }
 0x41e   : > { %3354 = vst [vmem:[%s6550_s23 + $0xb0] sm:$0xff] %v3353_v42   ;;  %3358 = vst [vmem:[%s6550_s23 + $0xb8] sm:$0xff] %v3357_v12  }
 0x41f   : > { %3362 = vst [vmem:[%s6550_s23 + $0x100] sm:$0xff] %v3361_v1   ;;  %3366 = vst [vmem:[%s6550_s23 + $0x108] sm:$0xff] %v3365_v21  }
 0x420   : > { %3370 = vst [vmem:[%s6550_s23 + $0x110] sm:$0xff] %v3369_v30   ;;  %3374 = vst [vmem:[%s6550_s23 + $0x118] sm:$0xff] %v3373_v23  }
 0x421   : > { %3378 = vst [vmem:[%s6550_s23 + $0x120] sm:$0xff] %v3377_v47   ;;  %3382 = vst [vmem:[%s6550_s23 + $0x128] sm:$0xff] %v3381_v56  }
 0x422   : > { %3386 = vst [vmem:[%s6550_s23 + $0x130] sm:$0xff] %v3385_v5   ;;  %3390 = vst [vmem:[%s6550_s23 + $0x138] sm:$0xff] %v3389_v18  }
 0x423   : > { %3394 = vst [vmem:[%s6550_s23 + $0x180] sm:$0xff] %v3393_v57   ;;  %3398 = vst [vmem:[%s6550_s23 + $0x188] sm:$0xff] %v3397_v17  }
 0x424   : > { %3402 = vst [vmem:[%s6550_s23 + $0x190] sm:$0xff] %v3401_v15   ;;  %3406 = vst [vmem:[%s6550_s23 + $0x198] sm:$0xff] %v3405_v58  }
 0x425   : > { %3410 = vst [vmem:[%s6550_s23 + $0x1a0] sm:$0xff] %v3409_v22   ;;  %3414 = vst [vmem:[%s6550_s23 + $0x1a8] sm:$0xff] %v3413_v0  }
 0x426   : > { %3418 = vst [vmem:[%s6550_s23 + $0x1b0] sm:$0xff] %v3417_v14   ;;  %3422 = vst [vmem:[%s6550_s23 + $0x1b8] sm:$0xff] %v3421_v51  }
 0x427 PF: > { %s26_s20 = sadd.s32 1, %s4713_s20   ;;  %s6683_s21 = sld [smem:[#allocation17_spill]] }
 0x428   : > { %p23_p9 = scmp.ge.s32.totalorder %s26_s20, 6   ;;  %s6684_s13 = smov %s4689_s14 }
 0x429   : > { %s6685_s14 = smov %s4693_s15  ;;  %s6686_s15 = smov %s4953_s3 }
 0x42a   : > { %s6687_s16 = smov %s4705_s18  ;;  %s6688_s17 = smov %s4709_s19 }
 0x42b   : > { %s6690_s19 = smov %s6696_s28  ;;  %25 = sbr.rel (!%p23_p9) target bundleno = 15 (0xf), region = 260 }
 0x42d   : > { %s6689_s18 = smov %s6683_s21 }
 0x432   :  { %3599 = vsyncpa [#allocation3], 1 }
 0x433   :  { %3601 = vsyncpa [#allocation3 + $0x1], 1 }
 0x434   :  { %3602 = vsyncpa [#allocation5], 1 }
 0x435   :  { %3603 = vsyncpa [#allocation8], 1 }

</bundles_post_ra>
